<compile_context>
chip_gen: v7x
topology: tpu7x:2x2x1
jax: 0.10.0
libtpu: 0.0.40
codegen_flags: <defaults>
</compile_context>

<pallas_src>
import numpy as np

import jax
import jax.numpy as jnp
from jax import lax
from jax.experimental import pallas as pl
from jax.experimental.pallas import tpu as pltpu

EPS = 1e-5


# ------------------------------ Pallas kernel -------------------------------

def make_resnet_kernel(slots, nb):
    """Build the fused kernel; `slots` maps packed-operand name -> (row0, rows, cols)."""

    def kernel(patches_ref, mp_ref, s8_ref, tail_w_ref, tail_b_ref, pack_ref, out_ref):
        f32 = jnp.float32
        bf16 = jnp.bfloat16

        def P(name):
            r0, nr, nc = slots[name]          # static Python ints
            return pack_ref[r0:r0 + nr, :nc]

        def mm(a, b):
            # bf16 MXU operands, f32 accumulate.
            return jnp.dot(a.astype(bf16), b.astype(bf16), preferred_element_type=f32)

        def conv3x3(h, sel, wcat, bias, cout_b, relu):
            # 3x3 / stride 1 / pad 1 conv + folded BN:
            #   A = h @ [kron(I_N,W_0) | ... | kron(I_N,W_8)]   (one matmul)
            #   out = sum_t S_t @ A[:, t*C:(t+1)*C] + shift     (9 exact row gathers)
            a = mm(h, wcat)                                     # (m, 9*cout_b) f32
            acc = None
            for t in range(9):
                at = a[:, t * cout_b:(t + 1) * cout_b]
                c = mm(sel(t), at)
                acc = c if acc is None else acc + c
            acc = acc + bias.astype(f32)
            return jnp.maximum(acc, 0.0) if relu else acc

        def basic_block(h, sel, wa, ba, wb, bb, cout_b):
            o1 = conv3x3(h, sel, wa, ba, cout_b, relu=True)
            o2 = conv3x3(o1, sel, wb, bb, cout_b, relu=False)
            return jnp.maximum(o1 + o2, 0.0)

        def down_1x1(h, d, w, b):
            # 1x1 stride-2 conv + folded BN: spatial row-select, then channel matmul.
            return mm(mm(d, h), w) + b.astype(f32)

        # ---- stem: conv1(7x7,s2,p3) + bn1 + relu (im2col patches built in XLA) ----
        y = mm(patches_ref[...], P("w_stem")) + P("b_stem").astype(f32)   # (256, nb*3)
        y = jnp.maximum(y, 0.0)    # ReLU required for the zero-padded maxpool trick below.

        # ---- maxpool 3x3 s2 p1: ONE merged selection matmul, then 8 VPU maxes ----
        z = mm(mp_ref[...], y)                                            # (576, nb*3)
        h = z[0:64, :]
        for t in range(1, 9):
            h = jnp.maximum(h, z[t * 64:(t + 1) * 64, :])                 # (64, nb*3)

        sel8 = lambda t: s8_ref[t]
        sel4 = lambda t: P("s4_%d" % t)
        sel2 = lambda t: P("s2_%d" % t)

        h = basic_block(h, sel8, P("wcat1a"), P("b1a"), P("wcat1b"), P("b1b"), nb * 3)
        h = down_1x1(h, P("d2"), P("wc2"), P("bc2"))                      # (16, nb*6)
        h = basic_block(h, sel4, P("wcat2a"), P("b2a"), P("wcat2b"), P("b2b"), nb * 6)
        h = down_1x1(h, P("d3"), P("wc3"), P("bc3"))                      # (4, nb*12)
        h = basic_block(h, sel2, P("wcat3a"), P("b3a"), P("wcat3b"), P("b3b"), nb * 12)
        h = down_1x1(h, P("d4"), P("wc4"), P("bc4"))                      # (1, nb*24)

        # ---- layers 4..11: 1x1 spatial -> padded 3x3 conv == center-tap matmul ----
        for k in range(8):
            o1 = jnp.maximum(mm(h, tail_w_ref[2 * k]) + tail_b_ref[2 * k].astype(f32), 0.0)
            o2 = mm(o1, tail_w_ref[2 * k + 1]) + tail_b_ref[2 * k + 1].astype(f32)
            h = jnp.maximum(o1 + o2, 0.0)

        # ---- avgpool((1,1)) at 1x1 spatial == identity; flatten; fc ----
        logits = mm(h, P("w_fc")) + P("b_fc").astype(f32)                 # (1, nb*10)
        out_ref[...] = logits.astype(out_ref.dtype)

    return kernel


# ------------------------------ JAX-side glue --------------------------------

def _zero_map(ndim):
    return lambda i, _n=ndim: (0,) * _n


def stem_patches(x_nhwc, kh=7, kw=7, stride=2, pad=3):
    """im2col for the stem conv (runs as plain XLA ops on the raw input)."""
    N, H, W, C = x_nhwc.shape
    Ho = (H + 2 * pad - kh) // stride + 1
    Wo = (W + 2 * pad - kw) // stride + 1
    xp = jnp.pad(x_nhwc, ((0, 0), (pad, pad), (pad, pad), (0, 0)))
    cols = []
    for i in range(kh):
        for j in range(kw):
            cols.append(xp[:, i:i + stride * Ho:stride, j:j + stride * Wo:stride, :])
    patches = jnp.stack(cols, axis=3)                       # (N, Ho, Wo, kh*kw, C)
    return patches.reshape(N, Ho * Wo, kh * kw * C), Ho, Wo


def make_forward(slots, nb):
    kernel = make_resnet_kernel(slots, nb)

    def forward(x_nchw, arrays):
        assert x_nchw.shape[0] == nb
        x = jnp.transpose(x_nchw, (0, 2, 3, 1))             # NCHW -> NHWC
        patches, _, _ = stem_patches(x)                     # (nb, 256, 49)
        m, kk = patches.shape[1], patches.shape[2]
        # batch folded into lanes: column layout [n*49 + tap]
        patches = jnp.transpose(patches, (1, 0, 2)).reshape(m, nb * kk).astype(jnp.bfloat16)

        inputs = [patches, arrays["mp"], arrays["s8"],
                  arrays["tail_w"], arrays["tail_b"], arrays["pack"]]
        in_specs = [pl.BlockSpec(tuple(a.shape), _zero_map(a.ndim)) for a in inputs]

        out = pl.pallas_call(
            kernel,
            grid=(1,),
            in_specs=in_specs,
            out_specs=pl.BlockSpec((1, nb * 10), lambda i: (0, 0)),
            out_shape=jax.ShapeDtypeStruct((1, nb * 10), jnp.float32),
            compiler_params=pltpu.CompilerParams(
                dimension_semantics=("arbitrary",)),
        )(*inputs)
        return out.reshape(nb, 10)

    return forward


# ------------------------- structure (selection) matrices --------------------

def conv3x3_selection(h, w):
    """(9, h*w, h*w) per-tap row selection for a 3x3/s1/p1 conv on an h x w grid."""
    m = h * w
    s = np.zeros((9, m, m), np.float32)
    for di in range(3):
        for dj in range(3):
            t = di * 3 + dj
            for i in range(h):
                for j in range(w):
                    ii, jj = i + di - 1, j + dj - 1
                    if 0 <= ii < h and 0 <= jj < w:
                        s[t, i * w + j, ii * w + jj] = 1.0
    return s


def maxpool3x3s2_selection(h_in, w_in):
    """(9, ho*wo, h_in*w_in) per-tap selection for MaxPool2d(k=3, s=2, p=1)."""
    ho = (h_in + 2 - 3) // 2 + 1
    wo = (w_in + 2 - 3) // 2 + 1
    s = np.zeros((9, ho * wo, h_in * w_in), np.float32)
    for di in range(3):
        for dj in range(3):
            t = di * 3 + dj
            for i in range(ho):
                for j in range(wo):
                    ii, jj = 2 * i + di - 1, 2 * j + dj - 1
                    if 0 <= ii < h_in and 0 <= jj < w_in:
                        s[t, i * wo + j, ii * w_in + jj] = 1.0
    return s


def stride2_selection(h_in, w_in):
    """(ho*wo, h_in*w_in) row selection for a 1x1 stride-2 (no pad) conv."""
    ho = (h_in - 1) // 2 + 1
    wo = (w_in - 1) // 2 + 1
    s = np.zeros((ho * wo, h_in * w_in), np.float32)
    for i in range(ho):
        for j in range(wo):
            s[i * wo + j, (2 * i) * w_in + 2 * j] = 1.0
    return s


# ----------------------- kernel-operand packing (host side) ------------------

def _make_pack(entries, align=8):
    """Pack small 2-D operands row-wise into one lane-padded f32 array."""
    width = max(int(a.shape[1]) for _, a in entries)
    width = ((width + 127) // 128) * 128
    slots, rows, r = {}, [], 0
    for name, arr in entries:
        arr = np.asarray(arr, np.float32)
        nr, nc = arr.shape
        slots[name] = (r, nr, nc)
        padded = np.zeros((nr, width), np.float32)
        padded[:, :nc] = arr
        rows.append(padded)
        pad_r = (-nr) % align
        if pad_r:
            rows.append(np.zeros((pad_r, width), np.float32))
        r += nr + pad_r
    return np.concatenate(rows, axis=0), slots


def build_kernel_operands(net, nb):
    """Fold batch into lanes (kron'd channel weights), fuse per-tap conv weights,
    merge maxpool taps, pack all small operands, and cast everything to bf16."""
    f32 = np.float32

    def kron_b(w):                      # (cin, cout) -> (nb*cin, nb*cout)
        return np.kron(np.eye(nb, dtype=f32), np.asarray(w, f32))

    def tile_b(b):                      # (1, c) -> (1, nb*c)
        return np.tile(np.asarray(b, f32).reshape(1, -1), (1, nb))

    def wcat(w9):                       # (9, cin, cout) -> (nb*cin, 9*nb*cout)
        w9 = np.asarray(w9, f32)
        return np.concatenate([kron_b(w9[t]) for t in range(9)], axis=1)

    entries = [("w_stem", kron_b(net["w_stem"])), ("b_stem", tile_b(net["b_stem"]))]
    for tag in ("1", "2", "3"):
        entries += [
            ("wcat%sa" % tag, wcat(net["w%sa" % tag])), ("b%sa" % tag, tile_b(net["b%sa" % tag])),
            ("wcat%sb" % tag, wcat(net["w%sb" % tag])), ("b%sb" % tag, tile_b(net["b%sb" % tag])),
        ]
    for tag in ("2", "3", "4"):
        entries += [("wc%s" % tag, kron_b(net["wc%s" % tag])),
                    ("bc%s" % tag, tile_b(net["bc%s" % tag]))]

    s4 = conv3x3_selection(4, 4)
    s2 = conv3x3_selection(2, 2)
    entries += [("s4_%d" % t, s4[t]) for t in range(9)]
    entries += [("s2_%d" % t, s2[t]) for t in range(9)]
    entries += [("d2", stride2_selection(8, 8)),
                ("d3", stride2_selection(4, 4)),
                ("d4", stride2_selection(2, 2))]
    entries += [("w_fc", kron_b(net["w_fc"])), ("b_fc", tile_b(net["b_fc"]))]

    pack, slots = _make_pack(entries)

    mp = maxpool3x3s2_selection(16, 16).reshape(9 * 64, 256)        # merged taps
    s8 = conv3x3_selection(8, 8)                                    # (9, 64, 64)
    w_tail = np.asarray(net["w_tail"], f32)                         # (16, 24, 24)
    b_tail = np.asarray(net["b_tail"], f32)                         # (16, 1, 24)
    tail_w = np.stack([kron_b(w_tail[k]) for k in range(16)])       # (16, 48, 48)
    tail_b = np.stack([tile_b(b_tail[k]) for k in range(16)])       # (16, 1, 48)

    bf = jnp.bfloat16
    arrays = {
        "pack": jnp.asarray(pack, bf),
        "mp": jnp.asarray(mp, bf),
        "s8": jnp.asarray(s8, bf),
        "tail_w": jnp.asarray(tail_w, bf),
        "tail_b": jnp.asarray(tail_b, bf),
    }
    return arrays, slots


# --------------------------- deterministic params ----------------------------

def bn_fold(key, c):
    k1, k2, k3, k4 = jax.random.split(key, 4)
    gamma = 1.0 + 0.1 * jax.random.normal(k1, (c,), jnp.float32)
    beta = 0.1 * jax.random.normal(k2, (c,), jnp.float32)
    mean = 0.1 * jax.random.normal(k3, (c,), jnp.float32)
    var = 1.0 + 0.1 * jnp.abs(jax.random.normal(k4, (c,), jnp.float32))
    scale = gamma / jnp.sqrt(var + EPS)
    shift = beta - mean * scale
    return scale, shift


def spatial_block_params(key, c, tag):
    k1, k2, k3, k4 = jax.random.split(key, 4)
    s1, sh1 = bn_fold(k2, c)
    s2, sh2 = bn_fold(k4, c)
    wa = 0.1 * jax.random.normal(k1, (3, 3, c, c), jnp.float32) * s1[None, None, None, :]
    wb = 0.1 * jax.random.normal(k3, (3, 3, c, c), jnp.float32) * s2[None, None, None, :]
    return {
        "w%sa" % tag: wa.reshape(9, c, c), "b%sa" % tag: sh1.reshape(1, c),
        "w%sb" % tag: wb.reshape(9, c, c), "b%sb" % tag: sh2.reshape(1, c),
    }


def tail_block_params(key, c):
    # BasicBlock(24) at 1x1 spatial: only the center tap of each 3x3 conv matters.
    k1, k2, k3, k4 = jax.random.split(key, 4)
    s1, sh1 = bn_fold(k2, c)
    s2, sh2 = bn_fold(k4, c)
    wa = 0.1 * jax.random.normal(k1, (3, 3, c, c), jnp.float32)[1, 1] * s1[None, :]
    wb = 0.1 * jax.random.normal(k3, (3, 3, c, c), jnp.float32)[1, 1] * s2[None, :]
    return wa, sh1.reshape(1, c), wb, sh2.reshape(1, c)


def init_params(key):
    keys = jax.random.split(key, 24)
    net = {}

    # Stem: Conv2d(1, 3, k=7, s=2, p=3, bias=False) + BN(3); scale folded into W.
    w = 0.1 * jax.random.normal(keys[0], (7, 7, 1, 3), jnp.float32)
    scale, shift = bn_fold(keys[1], 3)
    net["w_stem"] = (w * scale[None, None, None, :]).reshape(49, 3)
    net["b_stem"] = shift.reshape(1, 3)

    net.update(spatial_block_params(keys[2], 3, "1"))          # layer1 @ 8x8

    w = 0.1 * jax.random.normal(keys[3], (1, 1, 3, 6), jnp.float32)
    scale, shift = bn_fold(keys[4], 6)
    net["wc2"] = w[0, 0] * scale[None, :]
    net["bc2"] = shift.reshape(1, 6)

    net.update(spatial_block_params(keys[5], 6, "2"))          # layer2 @ 4x4

    w = 0.1 * jax.random.normal(keys[6], (1, 1, 6, 12), jnp.float32)
    scale, shift = bn_fold(keys[7], 12)
    net["wc3"] = w[0, 0] * scale[None, :]
    net["bc3"] = shift.reshape(1, 12)

    net.update(spatial_block_params(keys[8], 12, "3"))         # layer3 @ 2x2

    w = 0.1 * jax.random.normal(keys[9], (1, 1, 12, 24), jnp.float32)
    scale, shift = bn_fold(keys[10], 24)
    net["wc4"] = w[0, 0] * scale[None, :]
    net["bc4"] = shift.reshape(1, 24)

    wt, bt = [], []
    for i in range(8):                                         # layers 4..11 @ 1x1
        wa, ba, wb, bb = tail_block_params(keys[11 + i], 24)
        wt += [wa, wb]
        bt += [ba, bb]
    net["w_tail"] = jnp.stack(wt)                              # (16, 24, 24)
    net["b_tail"] = jnp.stack(bt)                              # (16, 1, 24)

    net["w_fc"] = 0.1 * jax.random.normal(keys[19], (24, 10), jnp.float32)
    net["b_fc"] = 0.1 * jax.random.normal(keys[20], (10,), jnp.float32).reshape(1, 10)
    return net


# ------------------------------ pure-JAX reference ---------------------------

def _ref_conv(x, w_hwio, stride, pad):
    return lax.conv_general_dilated(
        x, w_hwio, window_strides=(stride, stride),
        padding=((pad, pad), (pad, pad)),
        dimension_numbers=("NHWC", "HWIO", "NHWC"),
        precision=lax.Precision.HIGHEST)


def resnet_reference(x_nchw, net):
    hp = lax.Precision.HIGHEST
    x = jnp.transpose(x_nchw, (0, 2, 3, 1))
    y = _ref_conv(x, net["w_stem"].reshape(7, 7, 1, 3), 2, 3) + net["b_stem"].reshape(1, 1, 1, 3)
    y = jnp.maximum(y, 0.0)
    y = lax.reduce_window(y, -jnp.inf, lax.max, (1, 3, 3, 1), (1, 2, 2, 1),
                          ((0, 0), (1, 1), (1, 1), (0, 0)))

    def block(h, wa, ba, wb, bb):
        c = wa.shape[-1]
        o1 = jnp.maximum(_ref_conv(h, wa.reshape(3, 3, c, c), 1, 1) + ba.reshape(1, 1, 1, c), 0.0)
        o2 = _ref_conv(o1, wb.reshape(3, 3, c, c), 1, 1) + bb.reshape(1, 1, 1, c)
        return jnp.maximum(o1 + o2, 0.0)

    def down(h, w, b):
        cin, cout = w.shape
        return _ref_conv(h, w.reshape(1, 1, cin, cout), 2, 0) + b.reshape(1, 1, 1, cout)

    y = block(y, net["w1a"], net["b1a"], net["w1b"], net["b1b"])
    y = down(y, net["wc2"], net["bc2"])
    y = block(y, net["w2a"], net["b2a"], net["w2b"], net["b2b"])
    y = down(y, net["wc3"], net["bc3"])
    y = block(y, net["w3a"], net["b3a"], net["w3b"], net["b3b"])
    y = down(y, net["wc4"], net["bc4"])

    h = y.reshape(y.shape[0], 24)
    for k in range(8):
        o1 = jnp.maximum(jnp.dot(h, net["w_tail"][2 * k], precision=hp) + net["b_tail"][2 * k], 0.0)
        o2 = jnp.dot(o1, net["w_tail"][2 * k + 1], precision=hp) + net["b_tail"][2 * k + 1]
        h = jnp.maximum(o1 + o2, 0.0)
    return jnp.dot(h, net["w_fc"], precision=hp) + net["b_fc"]


# ---------------------------------- main --------------------------------------

if __name__ == "__main__":
    key = jax.random.PRNGKey(0)
    kp, kx = jax.random.split(key)

    net = init_params(kp)
    # Round params (and input) to bf16-representable values so the bf16-operand
    # kernel and the f32-accumulated XLA reference see identical weights; the
    # only remaining divergence is the kernel's bf16 activation rounding.
    net = {k: v.astype(jnp.bfloat16).astype(jnp.float32) for k, v in net.items()}

    NB = 2
    # NCHW input like the PyTorch module (Conv2d(1, 3, k=7, s=2, p=3)): (2, 1, 32, 32)
    x = jax.random.normal(kx, (NB, 1, 32, 32), jnp.float32)
    x = x.astype(jnp.bfloat16).astype(jnp.float32)

    arrays, slots = build_kernel_operands(net, NB)
    fwd = jax.jit(make_forward(slots, NB))

    out = jax.block_until_ready(fwd(x, arrays))
    assert out.shape == (NB, 10), out.shape
    assert bool(jnp.all(jnp.isfinite(out)))

    ref = jax.jit(resnet_reference)(x, net)
    err = float(jnp.max(jnp.abs(out - ref)))
    assert bool(jnp.allclose(out, ref, rtol=5e-2, atol=5e-2)), ("mismatch", err, out, ref)

    print("KERNEL_OK")
</pallas_src>

<mosaic_0001>
module attributes {stable_mosaic.version = 11 : i64} {
  func.func @kernel(%arg0: i32, %arg1: memref<256x98xbf16, #tpu.memory_space<vmem>>, %arg2: memref<576x256xbf16, #tpu.memory_space<vmem>>, %arg3: memref<9x64x64xbf16, #tpu.memory_space<vmem>>, %arg4: memref<16x48x48xbf16, #tpu.memory_space<vmem>>, %arg5: memref<16x1x48xbf16, #tpu.memory_space<vmem>>, %arg6: memref<632x256xbf16, #tpu.memory_space<vmem>>, %arg7: memref<1x20xf32, #tpu.memory_space<vmem>>) attributes {dimension_semantics = [#tpu.dimension_semantics<arbitrary>], iteration_bounds = array<i64: 1>, scalar_prefetch = 0 : i64, scratch_operands = 0 : i64, tpu.core_type = #tpu.core_type<tc>, window_params = [{pipeline_mode = #tpu.pipeline_mode<synchronous>, transform_indices = @transform_0, window_bounds = array<i64: 256, 98>}, {pipeline_mode = #tpu.pipeline_mode<synchronous>, transform_indices = @transform_1, window_bounds = array<i64: 576, 256>}, {pipeline_mode = #tpu.pipeline_mode<synchronous>, transform_indices = @transform_2, window_bounds = array<i64: 9, 64, 64>}, {pipeline_mode = #tpu.pipeline_mode<synchronous>, transform_indices = @transform_3, window_bounds = array<i64: 16, 48, 48>}, {pipeline_mode = #tpu.pipeline_mode<synchronous>, transform_indices = @transform_4, window_bounds = array<i64: 16, 1, 48>}, {pipeline_mode = #tpu.pipeline_mode<synchronous>, transform_indices = @transform_5, window_bounds = array<i64: 632, 256>}, {pipeline_mode = #tpu.pipeline_mode<synchronous>, transform_indices = @transform_6, window_bounds = array<i64: 1, 20>}]} {
    %c0 = arith.constant 0 : index
    %c0_0 = arith.constant 0 : index
    %0 = vector.load %arg1[%c0, %c0_0] : memref<256x98xbf16, #tpu.memory_space<vmem>>, vector<256x98xbf16>
    %c0_1 = arith.constant 0 : index
    %c0_2 = arith.constant 0 : index
    %1 = vector.load %arg6[%c0_1, %c0_2] : memref<632x256xbf16, #tpu.memory_space<vmem>>, vector<98x6xbf16>
    %cst = arith.constant dense<0.000000e+00> : vector<256x6xf32>
    %2 = tpu.matmul %0, %1, %cst {dimension_numbers = #tpu.dot_dimension_numbers<[1], [0], [0], [1], [0, 0, 1, 1], [], []>} : vector<256x98xbf16>, vector<98x6xbf16>, vector<256x6xf32> -> vector<256x6xf32>
    %c104 = arith.constant 104 : index
    %c0_3 = arith.constant 0 : index
    %3 = vector.load %arg6[%c104, %c0_3] : memref<632x256xbf16, #tpu.memory_space<vmem>>, vector<1x6xbf16>
    %4 = arith.extf %3 : vector<1x6xbf16> to vector<1x6xf32>
    %5 = vector.broadcast %4 : vector<1x6xf32> to vector<256x6xf32>
    %6 = arith.addf %2, %5 : vector<256x6xf32>
    %cst_4 = arith.constant 0.000000e+00 : f32
    %7 = vector.broadcast %cst_4 : f32 to vector<256x6xf32>
    %8 = arith.maximumf %6, %7 : vector<256x6xf32>
    %c0_5 = arith.constant 0 : index
    %c0_6 = arith.constant 0 : index
    %9 = vector.load %arg2[%c0_5, %c0_6] : memref<576x256xbf16, #tpu.memory_space<vmem>>, vector<576x256xbf16>
    %10 = arith.truncf %8 : vector<256x6xf32> to vector<256x6xbf16>
    %cst_7 = arith.constant dense<0.000000e+00> : vector<576x6xf32>
    %11 = tpu.matmul %9, %10, %cst_7 {dimension_numbers = #tpu.dot_dimension_numbers<[1], [0], [0], [1], [0, 0, 1, 1], [], []>} : vector<576x256xbf16>, vector<256x6xbf16>, vector<576x6xf32> -> vector<576x6xf32>
    %12 = vector.extract_strided_slice %11 {offsets = [0, 0], sizes = [64, 6], strides = [1, 1]} : vector<576x6xf32> to vector<64x6xf32>
    %13 = vector.extract_strided_slice %11 {offsets = [64, 0], sizes = [64, 6], strides = [1, 1]} : vector<576x6xf32> to vector<64x6xf32>
    %14 = arith.maximumf %12, %13 : vector<64x6xf32>
    %15 = vector.extract_strided_slice %11 {offsets = [128, 0], sizes = [64, 6], strides = [1, 1]} : vector<576x6xf32> to vector<64x6xf32>
    %16 = arith.maximumf %14, %15 : vector<64x6xf32>
    %17 = vector.extract_strided_slice %11 {offsets = [192, 0], sizes = [64, 6], strides = [1, 1]} : vector<576x6xf32> to vector<64x6xf32>
    %18 = arith.maximumf %16, %17 : vector<64x6xf32>
    %19 = vector.extract_strided_slice %11 {offsets = [256, 0], sizes = [64, 6], strides = [1, 1]} : vector<576x6xf32> to vector<64x6xf32>
    %20 = arith.maximumf %18, %19 : vector<64x6xf32>
    %21 = vector.extract_strided_slice %11 {offsets = [320, 0], sizes = [64, 6], strides = [1, 1]} : vector<576x6xf32> to vector<64x6xf32>
    %22 = arith.maximumf %20, %21 : vector<64x6xf32>
    %23 = vector.extract_strided_slice %11 {offsets = [384, 0], sizes = [64, 6], strides = [1, 1]} : vector<576x6xf32> to vector<64x6xf32>
    %24 = arith.maximumf %22, %23 : vector<64x6xf32>
    %25 = vector.extract_strided_slice %11 {offsets = [448, 0], sizes = [64, 6], strides = [1, 1]} : vector<576x6xf32> to vector<64x6xf32>
    %26 = arith.maximumf %24, %25 : vector<64x6xf32>
    %27 = vector.extract_strided_slice %11 {offsets = [512, 0], sizes = [64, 6], strides = [1, 1]} : vector<576x6xf32> to vector<64x6xf32>
    %28 = arith.maximumf %26, %27 : vector<64x6xf32>
    %c112 = arith.constant 112 : index
    %c0_8 = arith.constant 0 : index
    %29 = vector.load %arg6[%c112, %c0_8] : memref<632x256xbf16, #tpu.memory_space<vmem>>, vector<6x54xbf16>
    %c120 = arith.constant 120 : index
    %c0_9 = arith.constant 0 : index
    %30 = vector.load %arg6[%c120, %c0_9] : memref<632x256xbf16, #tpu.memory_space<vmem>>, vector<1x6xbf16>
    %c128 = arith.constant 128 : index
    %c0_10 = arith.constant 0 : index
    %31 = vector.load %arg6[%c128, %c0_10] : memref<632x256xbf16, #tpu.memory_space<vmem>>, vector<6x54xbf16>
    %c136 = arith.constant 136 : index
    %c0_11 = arith.constant 0 : index
    %32 = vector.load %arg6[%c136, %c0_11] : memref<632x256xbf16, #tpu.memory_space<vmem>>, vector<1x6xbf16>
    %33 = arith.truncf %28 : vector<64x6xf32> to vector<64x6xbf16>
    %cst_12 = arith.constant dense<0.000000e+00> : vector<64x54xf32>
    %34 = tpu.matmul %33, %29, %cst_12 {dimension_numbers = #tpu.dot_dimension_numbers<[1], [0], [0], [1], [0, 0, 1, 1], [], []>} : vector<64x6xbf16>, vector<6x54xbf16>, vector<64x54xf32> -> vector<64x54xf32>
    %35 = vector.extract_strided_slice %34 {offsets = [0, 0], sizes = [64, 6], strides = [1, 1]} : vector<64x54xf32> to vector<64x6xf32>
    %c0_13 = arith.constant 0 : index
    %c0_14 = arith.constant 0 : index
    %c0_15 = arith.constant 0 : index
    %36 = vector.load %arg3[%c0_13, %c0_14, %c0_15] : memref<9x64x64xbf16, #tpu.memory_space<vmem>>, vector<1x64x64xbf16>
    %37 = vector.shape_cast %36 : vector<1x64x64xbf16> to vector<64x64xbf16>
    %38 = arith.truncf %35 : vector<64x6xf32> to vector<64x6xbf16>
    %cst_16 = arith.constant dense<0.000000e+00> : vector<64x6xf32>
    %39 = tpu.matmul %37, %38, %cst_16 {dimension_numbers = #tpu.dot_dimension_numbers<[1], [0], [0], [1], [0, 0, 1, 1], [], []>} : vector<64x64xbf16>, vector<64x6xbf16>, vector<64x6xf32> -> vector<64x6xf32>
    %40 = vector.extract_strided_slice %34 {offsets = [0, 6], sizes = [64, 6], strides = [1, 1]} : vector<64x54xf32> to vector<64x6xf32>
    %c1 = arith.constant 1 : index
    %c0_17 = arith.constant 0 : index
    %c0_18 = arith.constant 0 : index
    %41 = vector.load %arg3[%c1, %c0_17, %c0_18] : memref<9x64x64xbf16, #tpu.memory_space<vmem>>, vector<1x64x64xbf16>
    %42 = vector.shape_cast %41 : vector<1x64x64xbf16> to vector<64x64xbf16>
    %43 = arith.truncf %40 : vector<64x6xf32> to vector<64x6xbf16>
    %cst_19 = arith.constant dense<0.000000e+00> : vector<64x6xf32>
    %44 = tpu.matmul %42, %43, %cst_19 {dimension_numbers = #tpu.dot_dimension_numbers<[1], [0], [0], [1], [0, 0, 1, 1], [], []>} : vector<64x64xbf16>, vector<64x6xbf16>, vector<64x6xf32> -> vector<64x6xf32>
    %45 = arith.addf %39, %44 : vector<64x6xf32>
    %46 = vector.extract_strided_slice %34 {offsets = [0, 12], sizes = [64, 6], strides = [1, 1]} : vector<64x54xf32> to vector<64x6xf32>
    %c2 = arith.constant 2 : index
    %c0_20 = arith.constant 0 : index
    %c0_21 = arith.constant 0 : index
    %47 = vector.load %arg3[%c2, %c0_20, %c0_21] : memref<9x64x64xbf16, #tpu.memory_space<vmem>>, vector<1x64x64xbf16>
    %48 = vector.shape_cast %47 : vector<1x64x64xbf16> to vector<64x64xbf16>
    %49 = arith.truncf %46 : vector<64x6xf32> to vector<64x6xbf16>
    %cst_22 = arith.constant dense<0.000000e+00> : vector<64x6xf32>
    %50 = tpu.matmul %48, %49, %cst_22 {dimension_numbers = #tpu.dot_dimension_numbers<[1], [0], [0], [1], [0, 0, 1, 1], [], []>} : vector<64x64xbf16>, vector<64x6xbf16>, vector<64x6xf32> -> vector<64x6xf32>
    %51 = arith.addf %45, %50 : vector<64x6xf32>
    %52 = vector.extract_strided_slice %34 {offsets = [0, 18], sizes = [64, 6], strides = [1, 1]} : vector<64x54xf32> to vector<64x6xf32>
    %c3 = arith.constant 3 : index
    %c0_23 = arith.constant 0 : index
    %c0_24 = arith.constant 0 : index
    %53 = vector.load %arg3[%c3, %c0_23, %c0_24] : memref<9x64x64xbf16, #tpu.memory_space<vmem>>, vector<1x64x64xbf16>
    %54 = vector.shape_cast %53 : vector<1x64x64xbf16> to vector<64x64xbf16>
    %55 = arith.truncf %52 : vector<64x6xf32> to vector<64x6xbf16>
    %cst_25 = arith.constant dense<0.000000e+00> : vector<64x6xf32>
    %56 = tpu.matmul %54, %55, %cst_25 {dimension_numbers = #tpu.dot_dimension_numbers<[1], [0], [0], [1], [0, 0, 1, 1], [], []>} : vector<64x64xbf16>, vector<64x6xbf16>, vector<64x6xf32> -> vector<64x6xf32>
    %57 = arith.addf %51, %56 : vector<64x6xf32>
    %58 = vector.extract_strided_slice %34 {offsets = [0, 24], sizes = [64, 6], strides = [1, 1]} : vector<64x54xf32> to vector<64x6xf32>
    %c4 = arith.constant 4 : index
    %c0_26 = arith.constant 0 : index
    %c0_27 = arith.constant 0 : index
    %59 = vector.load %arg3[%c4, %c0_26, %c0_27] : memref<9x64x64xbf16, #tpu.memory_space<vmem>>, vector<1x64x64xbf16>
    %60 = vector.shape_cast %59 : vector<1x64x64xbf16> to vector<64x64xbf16>
    %61 = arith.truncf %58 : vector<64x6xf32> to vector<64x6xbf16>
    %cst_28 = arith.constant dense<0.000000e+00> : vector<64x6xf32>
    %62 = tpu.matmul %60, %61, %cst_28 {dimension_numbers = #tpu.dot_dimension_numbers<[1], [0], [0], [1], [0, 0, 1, 1], [], []>} : vector<64x64xbf16>, vector<64x6xbf16>, vector<64x6xf32> -> vector<64x6xf32>
    %63 = arith.addf %57, %62 : vector<64x6xf32>
    %64 = vector.extract_strided_slice %34 {offsets = [0, 30], sizes = [64, 6], strides = [1, 1]} : vector<64x54xf32> to vector<64x6xf32>
    %c5 = arith.constant 5 : index
    %c0_29 = arith.constant 0 : index
    %c0_30 = arith.constant 0 : index
    %65 = vector.load %arg3[%c5, %c0_29, %c0_30] : memref<9x64x64xbf16, #tpu.memory_space<vmem>>, vector<1x64x64xbf16>
    %66 = vector.shape_cast %65 : vector<1x64x64xbf16> to vector<64x64xbf16>
    %67 = arith.truncf %64 : vector<64x6xf32> to vector<64x6xbf16>
    %cst_31 = arith.constant dense<0.000000e+00> : vector<64x6xf32>
    %68 = tpu.matmul %66, %67, %cst_31 {dimension_numbers = #tpu.dot_dimension_numbers<[1], [0], [0], [1], [0, 0, 1, 1], [], []>} : vector<64x64xbf16>, vector<64x6xbf16>, vector<64x6xf32> -> vector<64x6xf32>
    %69 = arith.addf %63, %68 : vector<64x6xf32>
    %70 = vector.extract_strided_slice %34 {offsets = [0, 36], sizes = [64, 6], strides = [1, 1]} : vector<64x54xf32> to vector<64x6xf32>
    %c6 = arith.constant 6 : index
    %c0_32 = arith.constant 0 : index
    %c0_33 = arith.constant 0 : index
    %71 = vector.load %arg3[%c6, %c0_32, %c0_33] : memref<9x64x64xbf16, #tpu.memory_space<vmem>>, vector<1x64x64xbf16>
    %72 = vector.shape_cast %71 : vector<1x64x64xbf16> to vector<64x64xbf16>
    %73 = arith.truncf %70 : vector<64x6xf32> to vector<64x6xbf16>
    %cst_34 = arith.constant dense<0.000000e+00> : vector<64x6xf32>
    %74 = tpu.matmul %72, %73, %cst_34 {dimension_numbers = #tpu.dot_dimension_numbers<[1], [0], [0], [1], [0, 0, 1, 1], [], []>} : vector<64x64xbf16>, vector<64x6xbf16>, vector<64x6xf32> -> vector<64x6xf32>
    %75 = arith.addf %69, %74 : vector<64x6xf32>
    %76 = vector.extract_strided_slice %34 {offsets = [0, 42], sizes = [64, 6], strides = [1, 1]} : vector<64x54xf32> to vector<64x6xf32>
    %c7 = arith.constant 7 : index
    %c0_35 = arith.constant 0 : index
    %c0_36 = arith.constant 0 : index
    %77 = vector.load %arg3[%c7, %c0_35, %c0_36] : memref<9x64x64xbf16, #tpu.memory_space<vmem>>, vector<1x64x64xbf16>
    %78 = vector.shape_cast %77 : vector<1x64x64xbf16> to vector<64x64xbf16>
    %79 = arith.truncf %76 : vector<64x6xf32> to vector<64x6xbf16>
    %cst_37 = arith.constant dense<0.000000e+00> : vector<64x6xf32>
    %80 = tpu.matmul %78, %79, %cst_37 {dimension_numbers = #tpu.dot_dimension_numbers<[1], [0], [0], [1], [0, 0, 1, 1], [], []>} : vector<64x64xbf16>, vector<64x6xbf16>, vector<64x6xf32> -> vector<64x6xf32>
    %81 = arith.addf %75, %80 : vector<64x6xf32>
    %82 = vector.extract_strided_slice %34 {offsets = [0, 48], sizes = [64, 6], strides = [1, 1]} : vector<64x54xf32> to vector<64x6xf32>
    %c8 = arith.constant 8 : index
    %c0_38 = arith.constant 0 : index
    %c0_39 = arith.constant 0 : index
    %83 = vector.load %arg3[%c8, %c0_38, %c0_39] : memref<9x64x64xbf16, #tpu.memory_space<vmem>>, vector<1x64x64xbf16>
    %84 = vector.shape_cast %83 : vector<1x64x64xbf16> to vector<64x64xbf16>
    %85 = arith.truncf %82 : vector<64x6xf32> to vector<64x6xbf16>
    %cst_40 = arith.constant dense<0.000000e+00> : vector<64x6xf32>
    %86 = tpu.matmul %84, %85, %cst_40 {dimension_numbers = #tpu.dot_dimension_numbers<[1], [0], [0], [1], [0, 0, 1, 1], [], []>} : vector<64x64xbf16>, vector<64x6xbf16>, vector<64x6xf32> -> vector<64x6xf32>
    %87 = arith.addf %81, %86 : vector<64x6xf32>
    %88 = arith.extf %30 : vector<1x6xbf16> to vector<1x6xf32>
    %89 = vector.broadcast %88 : vector<1x6xf32> to vector<64x6xf32>
    %90 = arith.addf %87, %89 : vector<64x6xf32>
    %cst_41 = arith.constant 0.000000e+00 : f32
    %91 = vector.broadcast %cst_41 : f32 to vector<64x6xf32>
    %92 = arith.maximumf %90, %91 : vector<64x6xf32>
    %93 = arith.truncf %92 : vector<64x6xf32> to vector<64x6xbf16>
    %cst_42 = arith.constant dense<0.000000e+00> : vector<64x54xf32>
    %94 = tpu.matmul %93, %31, %cst_42 {dimension_numbers = #tpu.dot_dimension_numbers<[1], [0], [0], [1], [0, 0, 1, 1], [], []>} : vector<64x6xbf16>, vector<6x54xbf16>, vector<64x54xf32> -> vector<64x54xf32>
    %95 = vector.extract_strided_slice %94 {offsets = [0, 0], sizes = [64, 6], strides = [1, 1]} : vector<64x54xf32> to vector<64x6xf32>
    %c0_43 = arith.constant 0 : index
    %c0_44 = arith.constant 0 : index
    %c0_45 = arith.constant 0 : index
    %96 = vector.load %arg3[%c0_43, %c0_44, %c0_45] : memref<9x64x64xbf16, #tpu.memory_space<vmem>>, vector<1x64x64xbf16>
    %97 = vector.shape_cast %96 : vector<1x64x64xbf16> to vector<64x64xbf16>
    %98 = arith.truncf %95 : vector<64x6xf32> to vector<64x6xbf16>
    %cst_46 = arith.constant dense<0.000000e+00> : vector<64x6xf32>
    %99 = tpu.matmul %97, %98, %cst_46 {dimension_numbers = #tpu.dot_dimension_numbers<[1], [0], [0], [1], [0, 0, 1, 1], [], []>} : vector<64x64xbf16>, vector<64x6xbf16>, vector<64x6xf32> -> vector<64x6xf32>
    %100 = vector.extract_strided_slice %94 {offsets = [0, 6], sizes = [64, 6], strides = [1, 1]} : vector<64x54xf32> to vector<64x6xf32>
    %c1_47 = arith.constant 1 : index
    %c0_48 = arith.constant 0 : index
    %c0_49 = arith.constant 0 : index
    %101 = vector.load %arg3[%c1_47, %c0_48, %c0_49] : memref<9x64x64xbf16, #tpu.memory_space<vmem>>, vector<1x64x64xbf16>
    %102 = vector.shape_cast %101 : vector<1x64x64xbf16> to vector<64x64xbf16>
    %103 = arith.truncf %100 : vector<64x6xf32> to vector<64x6xbf16>
    %cst_50 = arith.constant dense<0.000000e+00> : vector<64x6xf32>
    %104 = tpu.matmul %102, %103, %cst_50 {dimension_numbers = #tpu.dot_dimension_numbers<[1], [0], [0], [1], [0, 0, 1, 1], [], []>} : vector<64x64xbf16>, vector<64x6xbf16>, vector<64x6xf32> -> vector<64x6xf32>
    %105 = arith.addf %99, %104 : vector<64x6xf32>
    %106 = vector.extract_strided_slice %94 {offsets = [0, 12], sizes = [64, 6], strides = [1, 1]} : vector<64x54xf32> to vector<64x6xf32>
    %c2_51 = arith.constant 2 : index
    %c0_52 = arith.constant 0 : index
    %c0_53 = arith.constant 0 : index
    %107 = vector.load %arg3[%c2_51, %c0_52, %c0_53] : memref<9x64x64xbf16, #tpu.memory_space<vmem>>, vector<1x64x64xbf16>
    %108 = vector.shape_cast %107 : vector<1x64x64xbf16> to vector<64x64xbf16>
    %109 = arith.truncf %106 : vector<64x6xf32> to vector<64x6xbf16>
    %cst_54 = arith.constant dense<0.000000e+00> : vector<64x6xf32>
    %110 = tpu.matmul %108, %109, %cst_54 {dimension_numbers = #tpu.dot_dimension_numbers<[1], [0], [0], [1], [0, 0, 1, 1], [], []>} : vector<64x64xbf16>, vector<64x6xbf16>, vector<64x6xf32> -> vector<64x6xf32>
    %111 = arith.addf %105, %110 : vector<64x6xf32>
    %112 = vector.extract_strided_slice %94 {offsets = [0, 18], sizes = [64, 6], strides = [1, 1]} : vector<64x54xf32> to vector<64x6xf32>
    %c3_55 = arith.constant 3 : index
    %c0_56 = arith.constant 0 : index
    %c0_57 = arith.constant 0 : index
    %113 = vector.load %arg3[%c3_55, %c0_56, %c0_57] : memref<9x64x64xbf16, #tpu.memory_space<vmem>>, vector<1x64x64xbf16>
    %114 = vector.shape_cast %113 : vector<1x64x64xbf16> to vector<64x64xbf16>
    %115 = arith.truncf %112 : vector<64x6xf32> to vector<64x6xbf16>
    %cst_58 = arith.constant dense<0.000000e+00> : vector<64x6xf32>
    %116 = tpu.matmul %114, %115, %cst_58 {dimension_numbers = #tpu.dot_dimension_numbers<[1], [0], [0], [1], [0, 0, 1, 1], [], []>} : vector<64x64xbf16>, vector<64x6xbf16>, vector<64x6xf32> -> vector<64x6xf32>
    %117 = arith.addf %111, %116 : vector<64x6xf32>
    %118 = vector.extract_strided_slice %94 {offsets = [0, 24], sizes = [64, 6], strides = [1, 1]} : vector<64x54xf32> to vector<64x6xf32>
    %c4_59 = arith.constant 4 : index
    %c0_60 = arith.constant 0 : index
    %c0_61 = arith.constant 0 : index
    %119 = vector.load %arg3[%c4_59, %c0_60, %c0_61] : memref<9x64x64xbf16, #tpu.memory_space<vmem>>, vector<1x64x64xbf16>
    %120 = vector.shape_cast %119 : vector<1x64x64xbf16> to vector<64x64xbf16>
    %121 = arith.truncf %118 : vector<64x6xf32> to vector<64x6xbf16>
    %cst_62 = arith.constant dense<0.000000e+00> : vector<64x6xf32>
    %122 = tpu.matmul %120, %121, %cst_62 {dimension_numbers = #tpu.dot_dimension_numbers<[1], [0], [0], [1], [0, 0, 1, 1], [], []>} : vector<64x64xbf16>, vector<64x6xbf16>, vector<64x6xf32> -> vector<64x6xf32>
    %123 = arith.addf %117, %122 : vector<64x6xf32>
    %124 = vector.extract_strided_slice %94 {offsets = [0, 30], sizes = [64, 6], strides = [1, 1]} : vector<64x54xf32> to vector<64x6xf32>
    %c5_63 = arith.constant 5 : index
    %c0_64 = arith.constant 0 : index
    %c0_65 = arith.constant 0 : index
    %125 = vector.load %arg3[%c5_63, %c0_64, %c0_65] : memref<9x64x64xbf16, #tpu.memory_space<vmem>>, vector<1x64x64xbf16>
    %126 = vector.shape_cast %125 : vector<1x64x64xbf16> to vector<64x64xbf16>
    %127 = arith.truncf %124 : vector<64x6xf32> to vector<64x6xbf16>
    %cst_66 = arith.constant dense<0.000000e+00> : vector<64x6xf32>
    %128 = tpu.matmul %126, %127, %cst_66 {dimension_numbers = #tpu.dot_dimension_numbers<[1], [0], [0], [1], [0, 0, 1, 1], [], []>} : vector<64x64xbf16>, vector<64x6xbf16>, vector<64x6xf32> -> vector<64x6xf32>
    %129 = arith.addf %123, %128 : vector<64x6xf32>
    %130 = vector.extract_strided_slice %94 {offsets = [0, 36], sizes = [64, 6], strides = [1, 1]} : vector<64x54xf32> to vector<64x6xf32>
    %c6_67 = arith.constant 6 : index
    %c0_68 = arith.constant 0 : index
    %c0_69 = arith.constant 0 : index
    %131 = vector.load %arg3[%c6_67, %c0_68, %c0_69] : memref<9x64x64xbf16, #tpu.memory_space<vmem>>, vector<1x64x64xbf16>
    %132 = vector.shape_cast %131 : vector<1x64x64xbf16> to vector<64x64xbf16>
    %133 = arith.truncf %130 : vector<64x6xf32> to vector<64x6xbf16>
    %cst_70 = arith.constant dense<0.000000e+00> : vector<64x6xf32>
    %134 = tpu.matmul %132, %133, %cst_70 {dimension_numbers = #tpu.dot_dimension_numbers<[1], [0], [0], [1], [0, 0, 1, 1], [], []>} : vector<64x64xbf16>, vector<64x6xbf16>, vector<64x6xf32> -> vector<64x6xf32>
    %135 = arith.addf %129, %134 : vector<64x6xf32>
    %136 = vector.extract_strided_slice %94 {offsets = [0, 42], sizes = [64, 6], strides = [1, 1]} : vector<64x54xf32> to vector<64x6xf32>
    %c7_71 = arith.constant 7 : index
    %c0_72 = arith.constant 0 : index
    %c0_73 = arith.constant 0 : index
    %137 = vector.load %arg3[%c7_71, %c0_72, %c0_73] : memref<9x64x64xbf16, #tpu.memory_space<vmem>>, vector<1x64x64xbf16>
    %138 = vector.shape_cast %137 : vector<1x64x64xbf16> to vector<64x64xbf16>
    %139 = arith.truncf %136 : vector<64x6xf32> to vector<64x6xbf16>
    %cst_74 = arith.constant dense<0.000000e+00> : vector<64x6xf32>
    %140 = tpu.matmul %138, %139, %cst_74 {dimension_numbers = #tpu.dot_dimension_numbers<[1], [0], [0], [1], [0, 0, 1, 1], [], []>} : vector<64x64xbf16>, vector<64x6xbf16>, vector<64x6xf32> -> vector<64x6xf32>
    %141 = arith.addf %135, %140 : vector<64x6xf32>
    %142 = vector.extract_strided_slice %94 {offsets = [0, 48], sizes = [64, 6], strides = [1, 1]} : vector<64x54xf32> to vector<64x6xf32>
    %c8_75 = arith.constant 8 : index
    %c0_76 = arith.constant 0 : index
    %c0_77 = arith.constant 0 : index
    %143 = vector.load %arg3[%c8_75, %c0_76, %c0_77] : memref<9x64x64xbf16, #tpu.memory_space<vmem>>, vector<1x64x64xbf16>
    %144 = vector.shape_cast %143 : vector<1x64x64xbf16> to vector<64x64xbf16>
    %145 = arith.truncf %142 : vector<64x6xf32> to vector<64x6xbf16>
    %cst_78 = arith.constant dense<0.000000e+00> : vector<64x6xf32>
    %146 = tpu.matmul %144, %145, %cst_78 {dimension_numbers = #tpu.dot_dimension_numbers<[1], [0], [0], [1], [0, 0, 1, 1], [], []>} : vector<64x64xbf16>, vector<64x6xbf16>, vector<64x6xf32> -> vector<64x6xf32>
    %147 = arith.addf %141, %146 : vector<64x6xf32>
    %148 = arith.extf %32 : vector<1x6xbf16> to vector<1x6xf32>
    %149 = vector.broadcast %148 : vector<1x6xf32> to vector<64x6xf32>
    %150 = arith.addf %147, %149 : vector<64x6xf32>
    %151 = arith.addf %92, %150 : vector<64x6xf32>
    %cst_79 = arith.constant 0.000000e+00 : f32
    %152 = vector.broadcast %cst_79 : f32 to vector<64x6xf32>
    %153 = arith.maximumf %151, %152 : vector<64x6xf32>
    %c544 = arith.constant 544 : index
    %c0_80 = arith.constant 0 : index
    %154 = vector.load %arg6[%c544, %c0_80] : memref<632x256xbf16, #tpu.memory_space<vmem>>, vector<16x64xbf16>
    %c256 = arith.constant 256 : index
    %c0_81 = arith.constant 0 : index
    %155 = vector.load %arg6[%c256, %c0_81] : memref<632x256xbf16, #tpu.memory_space<vmem>>, vector<6x12xbf16>
    %c264 = arith.constant 264 : index
    %c0_82 = arith.constant 0 : index
    %156 = vector.load %arg6[%c264, %c0_82] : memref<632x256xbf16, #tpu.memory_space<vmem>>, vector<1x12xbf16>
    %157 = arith.truncf %153 : vector<64x6xf32> to vector<64x6xbf16>
    %cst_83 = arith.constant dense<0.000000e+00> : vector<16x6xf32>
    %158 = tpu.matmul %154, %157, %cst_83 {dimension_numbers = #tpu.dot_dimension_numbers<[1], [0], [0], [1], [0, 0, 1, 1], [], []>} : vector<16x64xbf16>, vector<64x6xbf16>, vector<16x6xf32> -> vector<16x6xf32>
    %159 = arith.truncf %158 : vector<16x6xf32> to vector<16x6xbf16>
    %cst_84 = arith.constant dense<0.000000e+00> : vector<16x12xf32>
    %160 = tpu.matmul %159, %155, %cst_84 {dimension_numbers = #tpu.dot_dimension_numbers<[1], [0], [0], [1], [0, 0, 1, 1], [], []>} : vector<16x6xbf16>, vector<6x12xbf16>, vector<16x12xf32> -> vector<16x12xf32>
    %161 = arith.extf %156 : vector<1x12xbf16> to vector<1x12xf32>
    %162 = vector.broadcast %161 : vector<1x12xf32> to vector<16x12xf32>
    %163 = arith.addf %160, %162 : vector<16x12xf32>
    %c144 = arith.constant 144 : index
    %c0_85 = arith.constant 0 : index
    %164 = vector.load %arg6[%c144, %c0_85] : memref<632x256xbf16, #tpu.memory_space<vmem>>, vector<12x108xbf16>
    %c160 = arith.constant 160 : index
    %c0_86 = arith.constant 0 : index
    %165 = vector.load %arg6[%c160, %c0_86] : memref<632x256xbf16, #tpu.memory_space<vmem>>, vector<1x12xbf16>
    %c168 = arith.constant 168 : index
    %c0_87 = arith.constant 0 : index
    %166 = vector.load %arg6[%c168, %c0_87] : memref<632x256xbf16, #tpu.memory_space<vmem>>, vector<12x108xbf16>
    %c184 = arith.constant 184 : index
    %c0_88 = arith.constant 0 : index
    %167 = vector.load %arg6[%c184, %c0_88] : memref<632x256xbf16, #tpu.memory_space<vmem>>, vector<1x12xbf16>
    %168 = arith.truncf %163 : vector<16x12xf32> to vector<16x12xbf16>
    %cst_89 = arith.constant dense<0.000000e+00> : vector<16x108xf32>
    %169 = tpu.matmul %168, %164, %cst_89 {dimension_numbers = #tpu.dot_dimension_numbers<[1], [0], [0], [1], [0, 0, 1, 1], [], []>} : vector<16x12xbf16>, vector<12x108xbf16>, vector<16x108xf32> -> vector<16x108xf32>
    %170 = vector.extract_strided_slice %169 {offsets = [0, 0], sizes = [16, 12], strides = [1, 1]} : vector<16x108xf32> to vector<16x12xf32>
    %c328 = arith.constant 328 : index
    %c0_90 = arith.constant 0 : index
    %171 = vector.load %arg6[%c328, %c0_90] : memref<632x256xbf16, #tpu.memory_space<vmem>>, vector<16x16xbf16>
    %172 = arith.truncf %170 : vector<16x12xf32> to vector<16x12xbf16>
    %cst_91 = arith.constant dense<0.000000e+00> : vector<16x12xf32>
    %173 = tpu.matmul %171, %172, %cst_91 {dimension_numbers = #tpu.dot_dimension_numbers<[1], [0], [0], [1], [0, 0, 1, 1], [], []>} : vector<16x16xbf16>, vector<16x12xbf16>, vector<16x12xf32> -> vector<16x12xf32>
    %174 = vector.extract_strided_slice %169 {offsets = [0, 12], sizes = [16, 12], strides = [1, 1]} : vector<16x108xf32> to vector<16x12xf32>
    %c344 = arith.constant 344 : index
    %c0_92 = arith.constant 0 : index
    %175 = vector.load %arg6[%c344, %c0_92] : memref<632x256xbf16, #tpu.memory_space<vmem>>, vector<16x16xbf16>
    %176 = arith.truncf %174 : vector<16x12xf32> to vector<16x12xbf16>
    %cst_93 = arith.constant dense<0.000000e+00> : vector<16x12xf32>
    %177 = tpu.matmul %175, %176, %cst_93 {dimension_numbers = #tpu.dot_dimension_numbers<[1], [0], [0], [1], [0, 0, 1, 1], [], []>} : vector<16x16xbf16>, vector<16x12xbf16>, vector<16x12xf32> -> vector<16x12xf32>
    %178 = arith.addf %173, %177 : vector<16x12xf32>
    %179 = vector.extract_strided_slice %169 {offsets = [0, 24], sizes = [16, 12], strides = [1, 1]} : vector<16x108xf32> to vector<16x12xf32>
    %c360 = arith.constant 360 : index
    %c0_94 = arith.constant 0 : index
    %180 = vector.load %arg6[%c360, %c0_94] : memref<632x256xbf16, #tpu.memory_space<vmem>>, vector<16x16xbf16>
    %181 = arith.truncf %179 : vector<16x12xf32> to vector<16x12xbf16>
    %cst_95 = arith.constant dense<0.000000e+00> : vector<16x12xf32>
    %182 = tpu.matmul %180, %181, %cst_95 {dimension_numbers = #tpu.dot_dimension_numbers<[1], [0], [0], [1], [0, 0, 1, 1], [], []>} : vector<16x16xbf16>, vector<16x12xbf16>, vector<16x12xf32> -> vector<16x12xf32>
    %183 = arith.addf %178, %182 : vector<16x12xf32>
    %184 = vector.extract_strided_slice %169 {offsets = [0, 36], sizes = [16, 12], strides = [1, 1]} : vector<16x108xf32> to vector<16x12xf32>
    %c376 = arith.constant 376 : index
    %c0_96 = arith.constant 0 : index
    %185 = vector.load %arg6[%c376, %c0_96] : memref<632x256xbf16, #tpu.memory_space<vmem>>, vector<16x16xbf16>
    %186 = arith.truncf %184 : vector<16x12xf32> to vector<16x12xbf16>
    %cst_97 = arith.constant dense<0.000000e+00> : vector<16x12xf32>
    %187 = tpu.matmul %185, %186, %cst_97 {dimension_numbers = #tpu.dot_dimension_numbers<[1], [0], [0], [1], [0, 0, 1, 1], [], []>} : vector<16x16xbf16>, vector<16x12xbf16>, vector<16x12xf32> -> vector<16x12xf32>
    %188 = arith.addf %183, %187 : vector<16x12xf32>
    %189 = vector.extract_strided_slice %169 {offsets = [0, 48], sizes = [16, 12], strides = [1, 1]} : vector<16x108xf32> to vector<16x12xf32>
    %c392 = arith.constant 392 : index
    %c0_98 = arith.constant 0 : index
    %190 = vector.load %arg6[%c392, %c0_98] : memref<632x256xbf16, #tpu.memory_space<vmem>>, vector<16x16xbf16>
    %191 = arith.truncf %189 : vector<16x12xf32> to vector<16x12xbf16>
    %cst_99 = arith.constant dense<0.000000e+00> : vector<16x12xf32>
    %192 = tpu.matmul %190, %191, %cst_99 {dimension_numbers = #tpu.dot_dimension_numbers<[1], [0], [0], [1], [0, 0, 1, 1], [], []>} : vector<16x16xbf16>, vector<16x12xbf16>, vector<16x12xf32> -> vector<16x12xf32>
    %193 = arith.addf %188, %192 : vector<16x12xf32>
    %194 = vector.extract_strided_slice %169 {offsets = [0, 60], sizes = [16, 12], strides = [1, 1]} : vector<16x108xf32> to vector<16x12xf32>
    %c408 = arith.constant 408 : index
    %c0_100 = arith.constant 0 : index
    %195 = vector.load %arg6[%c408, %c0_100] : memref<632x256xbf16, #tpu.memory_space<vmem>>, vector<16x16xbf16>
    %196 = arith.truncf %194 : vector<16x12xf32> to vector<16x12xbf16>
    %cst_101 = arith.constant dense<0.000000e+00> : vector<16x12xf32>
    %197 = tpu.matmul %195, %196, %cst_101 {dimension_numbers = #tpu.dot_dimension_numbers<[1], [0], [0], [1], [0, 0, 1, 1], [], []>} : vector<16x16xbf16>, vector<16x12xbf16>, vector<16x12xf32> -> vector<16x12xf32>
    %198 = arith.addf %193, %197 : vector<16x12xf32>
    %199 = vector.extract_strided_slice %169 {offsets = [0, 72], sizes = [16, 12], strides = [1, 1]} : vector<16x108xf32> to vector<16x12xf32>
    %c424 = arith.constant 424 : index
    %c0_102 = arith.constant 0 : index
    %200 = vector.load %arg6[%c424, %c0_102] : memref<632x256xbf16, #tpu.memory_space<vmem>>, vector<16x16xbf16>
    %201 = arith.truncf %199 : vector<16x12xf32> to vector<16x12xbf16>
    %cst_103 = arith.constant dense<0.000000e+00> : vector<16x12xf32>
    %202 = tpu.matmul %200, %201, %cst_103 {dimension_numbers = #tpu.dot_dimension_numbers<[1], [0], [0], [1], [0, 0, 1, 1], [], []>} : vector<16x16xbf16>, vector<16x12xbf16>, vector<16x12xf32> -> vector<16x12xf32>
    %203 = arith.addf %198, %202 : vector<16x12xf32>
    %204 = vector.extract_strided_slice %169 {offsets = [0, 84], sizes = [16, 12], strides = [1, 1]} : vector<16x108xf32> to vector<16x12xf32>
    %c440 = arith.constant 440 : index
    %c0_104 = arith.constant 0 : index
    %205 = vector.load %arg6[%c440, %c0_104] : memref<632x256xbf16, #tpu.memory_space<vmem>>, vector<16x16xbf16>
    %206 = arith.truncf %204 : vector<16x12xf32> to vector<16x12xbf16>
    %cst_105 = arith.constant dense<0.000000e+00> : vector<16x12xf32>
    %207 = tpu.matmul %205, %206, %cst_105 {dimension_numbers = #tpu.dot_dimension_numbers<[1], [0], [0], [1], [0, 0, 1, 1], [], []>} : vector<16x16xbf16>, vector<16x12xbf16>, vector<16x12xf32> -> vector<16x12xf32>
    %208 = arith.addf %203, %207 : vector<16x12xf32>
    %209 = vector.extract_strided_slice %169 {offsets = [0, 96], sizes = [16, 12], strides = [1, 1]} : vector<16x108xf32> to vector<16x12xf32>
    %c456 = arith.constant 456 : index
    %c0_106 = arith.constant 0 : index
    %210 = vector.load %arg6[%c456, %c0_106] : memref<632x256xbf16, #tpu.memory_space<vmem>>, vector<16x16xbf16>
    %211 = arith.truncf %209 : vector<16x12xf32> to vector<16x12xbf16>
    %cst_107 = arith.constant dense<0.000000e+00> : vector<16x12xf32>
    %212 = tpu.matmul %210, %211, %cst_107 {dimension_numbers = #tpu.dot_dimension_numbers<[1], [0], [0], [1], [0, 0, 1, 1], [], []>} : vector<16x16xbf16>, vector<16x12xbf16>, vector<16x12xf32> -> vector<16x12xf32>
    %213 = arith.addf %208, %212 : vector<16x12xf32>
    %214 = arith.extf %165 : vector<1x12xbf16> to vector<1x12xf32>
    %215 = vector.broadcast %214 : vector<1x12xf32> to vector<16x12xf32>
    %216 = arith.addf %213, %215 : vector<16x12xf32>
    %cst_108 = arith.constant 0.000000e+00 : f32
    %217 = vector.broadcast %cst_108 : f32 to vector<16x12xf32>
    %218 = arith.maximumf %216, %217 : vector<16x12xf32>
    %219 = arith.truncf %218 : vector<16x12xf32> to vector<16x12xbf16>
    %cst_109 = arith.constant dense<0.000000e+00> : vector<16x108xf32>
    %220 = tpu.matmul %219, %166, %cst_109 {dimension_numbers = #tpu.dot_dimension_numbers<[1], [0], [0], [1], [0, 0, 1, 1], [], []>} : vector<16x12xbf16>, vector<12x108xbf16>, vector<16x108xf32> -> vector<16x108xf32>
    %221 = vector.extract_strided_slice %220 {offsets = [0, 0], sizes = [16, 12], strides = [1, 1]} : vector<16x108xf32> to vector<16x12xf32>
    %c328_110 = arith.constant 328 : index
    %c0_111 = arith.constant 0 : index
    %222 = vector.load %arg6[%c328_110, %c0_111] : memref<632x256xbf16, #tpu.memory_space<vmem>>, vector<16x16xbf16>
    %223 = arith.truncf %221 : vector<16x12xf32> to vector<16x12xbf16>
    %cst_112 = arith.constant dense<0.000000e+00> : vector<16x12xf32>
    %224 = tpu.matmul %222, %223, %cst_112 {dimension_numbers = #tpu.dot_dimension_numbers<[1], [0], [0], [1], [0, 0, 1, 1], [], []>} : vector<16x16xbf16>, vector<16x12xbf16>, vector<16x12xf32> -> vector<16x12xf32>
    %225 = vector.extract_strided_slice %220 {offsets = [0, 12], sizes = [16, 12], strides = [1, 1]} : vector<16x108xf32> to vector<16x12xf32>
    %c344_113 = arith.constant 344 : index
    %c0_114 = arith.constant 0 : index
    %226 = vector.load %arg6[%c344_113, %c0_114] : memref<632x256xbf16, #tpu.memory_space<vmem>>, vector<16x16xbf16>
    %227 = arith.truncf %225 : vector<16x12xf32> to vector<16x12xbf16>
    %cst_115 = arith.constant dense<0.000000e+00> : vector<16x12xf32>
    %228 = tpu.matmul %226, %227, %cst_115 {dimension_numbers = #tpu.dot_dimension_numbers<[1], [0], [0], [1], [0, 0, 1, 1], [], []>} : vector<16x16xbf16>, vector<16x12xbf16>, vector<16x12xf32> -> vector<16x12xf32>
    %229 = arith.addf %224, %228 : vector<16x12xf32>
    %230 = vector.extract_strided_slice %220 {offsets = [0, 24], sizes = [16, 12], strides = [1, 1]} : vector<16x108xf32> to vector<16x12xf32>
    %c360_116 = arith.constant 360 : index
    %c0_117 = arith.constant 0 : index
    %231 = vector.load %arg6[%c360_116, %c0_117] : memref<632x256xbf16, #tpu.memory_space<vmem>>, vector<16x16xbf16>
    %232 = arith.truncf %230 : vector<16x12xf32> to vector<16x12xbf16>
    %cst_118 = arith.constant dense<0.000000e+00> : vector<16x12xf32>
    %233 = tpu.matmul %231, %232, %cst_118 {dimension_numbers = #tpu.dot_dimension_numbers<[1], [0], [0], [1], [0, 0, 1, 1], [], []>} : vector<16x16xbf16>, vector<16x12xbf16>, vector<16x12xf32> -> vector<16x12xf32>
    %234 = arith.addf %229, %233 : vector<16x12xf32>
    %235 = vector.extract_strided_slice %220 {offsets = [0, 36], sizes = [16, 12], strides = [1, 1]} : vector<16x108xf32> to vector<16x12xf32>
    %c376_119 = arith.constant 376 : index
    %c0_120 = arith.constant 0 : index
    %236 = vector.load %arg6[%c376_119, %c0_120] : memref<632x256xbf16, #tpu.memory_space<vmem>>, vector<16x16xbf16>
    %237 = arith.truncf %235 : vector<16x12xf32> to vector<16x12xbf16>
    %cst_121 = arith.constant dense<0.000000e+00> : vector<16x12xf32>
    %238 = tpu.matmul %236, %237, %cst_121 {dimension_numbers = #tpu.dot_dimension_numbers<[1], [0], [0], [1], [0, 0, 1, 1], [], []>} : vector<16x16xbf16>, vector<16x12xbf16>, vector<16x12xf32> -> vector<16x12xf32>
    %239 = arith.addf %234, %238 : vector<16x12xf32>
    %240 = vector.extract_strided_slice %220 {offsets = [0, 48], sizes = [16, 12], strides = [1, 1]} : vector<16x108xf32> to vector<16x12xf32>
    %c392_122 = arith.constant 392 : index
    %c0_123 = arith.constant 0 : index
    %241 = vector.load %arg6[%c392_122, %c0_123] : memref<632x256xbf16, #tpu.memory_space<vmem>>, vector<16x16xbf16>
    %242 = arith.truncf %240 : vector<16x12xf32> to vector<16x12xbf16>
    %cst_124 = arith.constant dense<0.000000e+00> : vector<16x12xf32>
    %243 = tpu.matmul %241, %242, %cst_124 {dimension_numbers = #tpu.dot_dimension_numbers<[1], [0], [0], [1], [0, 0, 1, 1], [], []>} : vector<16x16xbf16>, vector<16x12xbf16>, vector<16x12xf32> -> vector<16x12xf32>
    %244 = arith.addf %239, %243 : vector<16x12xf32>
    %245 = vector.extract_strided_slice %220 {offsets = [0, 60], sizes = [16, 12], strides = [1, 1]} : vector<16x108xf32> to vector<16x12xf32>
    %c408_125 = arith.constant 408 : index
    %c0_126 = arith.constant 0 : index
    %246 = vector.load %arg6[%c408_125, %c0_126] : memref<632x256xbf16, #tpu.memory_space<vmem>>, vector<16x16xbf16>
    %247 = arith.truncf %245 : vector<16x12xf32> to vector<16x12xbf16>
    %cst_127 = arith.constant dense<0.000000e+00> : vector<16x12xf32>
    %248 = tpu.matmul %246, %247, %cst_127 {dimension_numbers = #tpu.dot_dimension_numbers<[1], [0], [0], [1], [0, 0, 1, 1], [], []>} : vector<16x16xbf16>, vector<16x12xbf16>, vector<16x12xf32> -> vector<16x12xf32>
    %249 = arith.addf %244, %248 : vector<16x12xf32>
    %250 = vector.extract_strided_slice %220 {offsets = [0, 72], sizes = [16, 12], strides = [1, 1]} : vector<16x108xf32> to vector<16x12xf32>
    %c424_128 = arith.constant 424 : index
    %c0_129 = arith.constant 0 : index
    %251 = vector.load %arg6[%c424_128, %c0_129] : memref<632x256xbf16, #tpu.memory_space<vmem>>, vector<16x16xbf16>
    %252 = arith.truncf %250 : vector<16x12xf32> to vector<16x12xbf16>
    %cst_130 = arith.constant dense<0.000000e+00> : vector<16x12xf32>
    %253 = tpu.matmul %251, %252, %cst_130 {dimension_numbers = #tpu.dot_dimension_numbers<[1], [0], [0], [1], [0, 0, 1, 1], [], []>} : vector<16x16xbf16>, vector<16x12xbf16>, vector<16x12xf32> -> vector<16x12xf32>
    %254 = arith.addf %249, %253 : vector<16x12xf32>
    %255 = vector.extract_strided_slice %220 {offsets = [0, 84], sizes = [16, 12], strides = [1, 1]} : vector<16x108xf32> to vector<16x12xf32>
    %c440_131 = arith.constant 440 : index
    %c0_132 = arith.constant 0 : index
    %256 = vector.load %arg6[%c440_131, %c0_132] : memref<632x256xbf16, #tpu.memory_space<vmem>>, vector<16x16xbf16>
    %257 = arith.truncf %255 : vector<16x12xf32> to vector<16x12xbf16>
    %cst_133 = arith.constant dense<0.000000e+00> : vector<16x12xf32>
    %258 = tpu.matmul %256, %257, %cst_133 {dimension_numbers = #tpu.dot_dimension_numbers<[1], [0], [0], [1], [0, 0, 1, 1], [], []>} : vector<16x16xbf16>, vector<16x12xbf16>, vector<16x12xf32> -> vector<16x12xf32>
    %259 = arith.addf %254, %258 : vector<16x12xf32>
    %260 = vector.extract_strided_slice %220 {offsets = [0, 96], sizes = [16, 12], strides = [1, 1]} : vector<16x108xf32> to vector<16x12xf32>
    %c456_134 = arith.constant 456 : index
    %c0_135 = arith.constant 0 : index
    %261 = vector.load %arg6[%c456_134, %c0_135] : memref<632x256xbf16, #tpu.memory_space<vmem>>, vector<16x16xbf16>
    %262 = arith.truncf %260 : vector<16x12xf32> to vector<16x12xbf16>
    %cst_136 = arith.constant dense<0.000000e+00> : vector<16x12xf32>
    %263 = tpu.matmul %261, %262, %cst_136 {dimension_numbers = #tpu.dot_dimension_numbers<[1], [0], [0], [1], [0, 0, 1, 1], [], []>} : vector<16x16xbf16>, vector<16x12xbf16>, vector<16x12xf32> -> vector<16x12xf32>
    %264 = arith.addf %259, %263 : vector<16x12xf32>
    %265 = arith.extf %167 : vector<1x12xbf16> to vector<1x12xf32>
    %266 = vector.broadcast %265 : vector<1x12xf32> to vector<16x12xf32>
    %267 = arith.addf %264, %266 : vector<16x12xf32>
    %268 = arith.addf %218, %267 : vector<16x12xf32>
    %cst_137 = arith.constant 0.000000e+00 : f32
    %269 = vector.broadcast %cst_137 : f32 to vector<16x12xf32>
    %270 = arith.maximumf %268, %269 : vector<16x12xf32>
    %c560 = arith.constant 560 : index
    %c0_138 = arith.constant 0 : index
    %271 = vector.load %arg6[%c560, %c0_138] : memref<632x256xbf16, #tpu.memory_space<vmem>>, vector<4x16xbf16>
    %c272 = arith.constant 272 : index
    %c0_139 = arith.constant 0 : index
    %272 = vector.load %arg6[%c272, %c0_139] : memref<632x256xbf16, #tpu.memory_space<vmem>>, vector<12x24xbf16>
    %c288 = arith.constant 288 : index
    %c0_140 = arith.constant 0 : index
    %273 = vector.load %arg6[%c288, %c0_140] : memref<632x256xbf16, #tpu.memory_space<vmem>>, vector<1x24xbf16>
    %274 = arith.truncf %270 : vector<16x12xf32> to vector<16x12xbf16>
    %cst_141 = arith.constant dense<0.000000e+00> : vector<4x12xf32>
    %275 = tpu.matmul %271, %274, %cst_141 {dimension_numbers = #tpu.dot_dimension_numbers<[1], [0], [0], [1], [0, 0, 1, 1], [], []>} : vector<4x16xbf16>, vector<16x12xbf16>, vector<4x12xf32> -> vector<4x12xf32>
    %276 = arith.truncf %275 : vector<4x12xf32> to vector<4x12xbf16>
    %cst_142 = arith.constant dense<0.000000e+00> : vector<4x24xf32>
    %277 = tpu.matmul %276, %272, %cst_142 {dimension_numbers = #tpu.dot_dimension_numbers<[1], [0], [0], [1], [0, 0, 1, 1], [], []>} : vector<4x12xbf16>, vector<12x24xbf16>, vector<4x24xf32> -> vector<4x24xf32>
    %278 = arith.extf %273 : vector<1x24xbf16> to vector<1x24xf32>
    %279 = vector.broadcast %278 : vector<1x24xf32> to vector<4x24xf32>
    %280 = arith.addf %277, %279 : vector<4x24xf32>
    %c192 = arith.constant 192 : index
    %c0_143 = arith.constant 0 : index
    %281 = vector.load %arg6[%c192, %c0_143] : memref<632x256xbf16, #tpu.memory_space<vmem>>, vector<24x216xbf16>
    %c216 = arith.constant 216 : index
    %c0_144 = arith.constant 0 : index
    %282 = vector.load %arg6[%c216, %c0_144] : memref<632x256xbf16, #tpu.memory_space<vmem>>, vector<1x24xbf16>
    %c224 = arith.constant 224 : index
    %c0_145 = arith.constant 0 : index
    %283 = vector.load %arg6[%c224, %c0_145] : memref<632x256xbf16, #tpu.memory_space<vmem>>, vector<24x216xbf16>
    %c248 = arith.constant 248 : index
    %c0_146 = arith.constant 0 : index
    %284 = vector.load %arg6[%c248, %c0_146] : memref<632x256xbf16, #tpu.memory_space<vmem>>, vector<1x24xbf16>
    %285 = arith.truncf %280 : vector<4x24xf32> to vector<4x24xbf16>
    %cst_147 = arith.constant dense<0.000000e+00> : vector<4x216xf32>
    %286 = tpu.matmul %285, %281, %cst_147 {dimension_numbers = #tpu.dot_dimension_numbers<[1], [0], [0], [1], [0, 0, 1, 1], [], []>} : vector<4x24xbf16>, vector<24x216xbf16>, vector<4x216xf32> -> vector<4x216xf32>
    %287 = vector.extract_strided_slice %286 {offsets = [0, 0], sizes = [4, 24], strides = [1, 1]} : vector<4x216xf32> to vector<4x24xf32>
    %c472 = arith.constant 472 : index
    %c0_148 = arith.constant 0 : index
    %288 = vector.load %arg6[%c472, %c0_148] : memref<632x256xbf16, #tpu.memory_space<vmem>>, vector<4x4xbf16>
    %289 = arith.truncf %287 : vector<4x24xf32> to vector<4x24xbf16>
    %cst_149 = arith.constant dense<0.000000e+00> : vector<4x24xf32>
    %290 = tpu.matmul %288, %289, %cst_149 {dimension_numbers = #tpu.dot_dimension_numbers<[1], [0], [0], [1], [0, 0, 1, 1], [], []>} : vector<4x4xbf16>, vector<4x24xbf16>, vector<4x24xf32> -> vector<4x24xf32>
    %291 = vector.extract_strided_slice %286 {offsets = [0, 24], sizes = [4, 24], strides = [1, 1]} : vector<4x216xf32> to vector<4x24xf32>
    %c480 = arith.constant 480 : index
    %c0_150 = arith.constant 0 : index
    %292 = vector.load %arg6[%c480, %c0_150] : memref<632x256xbf16, #tpu.memory_space<vmem>>, vector<4x4xbf16>
    %293 = arith.truncf %291 : vector<4x24xf32> to vector<4x24xbf16>
    %cst_151 = arith.constant dense<0.000000e+00> : vector<4x24xf32>
    %294 = tpu.matmul %292, %293, %cst_151 {dimension_numbers = #tpu.dot_dimension_numbers<[1], [0], [0], [1], [0, 0, 1, 1], [], []>} : vector<4x4xbf16>, vector<4x24xbf16>, vector<4x24xf32> -> vector<4x24xf32>
    %295 = arith.addf %290, %294 : vector<4x24xf32>
    %296 = vector.extract_strided_slice %286 {offsets = [0, 48], sizes = [4, 24], strides = [1, 1]} : vector<4x216xf32> to vector<4x24xf32>
    %c488 = arith.constant 488 : index
    %c0_152 = arith.constant 0 : index
    %297 = vector.load %arg6[%c488, %c0_152] : memref<632x256xbf16, #tpu.memory_space<vmem>>, vector<4x4xbf16>
    %298 = arith.truncf %296 : vector<4x24xf32> to vector<4x24xbf16>
    %cst_153 = arith.constant dense<0.000000e+00> : vector<4x24xf32>
    %299 = tpu.matmul %297, %298, %cst_153 {dimension_numbers = #tpu.dot_dimension_numbers<[1], [0], [0], [1], [0, 0, 1, 1], [], []>} : vector<4x4xbf16>, vector<4x24xbf16>, vector<4x24xf32> -> vector<4x24xf32>
    %300 = arith.addf %295, %299 : vector<4x24xf32>
    %301 = vector.extract_strided_slice %286 {offsets = [0, 72], sizes = [4, 24], strides = [1, 1]} : vector<4x216xf32> to vector<4x24xf32>
    %c496 = arith.constant 496 : index
    %c0_154 = arith.constant 0 : index
    %302 = vector.load %arg6[%c496, %c0_154] : memref<632x256xbf16, #tpu.memory_space<vmem>>, vector<4x4xbf16>
    %303 = arith.truncf %301 : vector<4x24xf32> to vector<4x24xbf16>
    %cst_155 = arith.constant dense<0.000000e+00> : vector<4x24xf32>
    %304 = tpu.matmul %302, %303, %cst_155 {dimension_numbers = #tpu.dot_dimension_numbers<[1], [0], [0], [1], [0, 0, 1, 1], [], []>} : vector<4x4xbf16>, vector<4x24xbf16>, vector<4x24xf32> -> vector<4x24xf32>
    %305 = arith.addf %300, %304 : vector<4x24xf32>
    %306 = vector.extract_strided_slice %286 {offsets = [0, 96], sizes = [4, 24], strides = [1, 1]} : vector<4x216xf32> to vector<4x24xf32>
    %c504 = arith.constant 504 : index
    %c0_156 = arith.constant 0 : index
    %307 = vector.load %arg6[%c504, %c0_156] : memref<632x256xbf16, #tpu.memory_space<vmem>>, vector<4x4xbf16>
    %308 = arith.truncf %306 : vector<4x24xf32> to vector<4x24xbf16>
    %cst_157 = arith.constant dense<0.000000e+00> : vector<4x24xf32>
    %309 = tpu.matmul %307, %308, %cst_157 {dimension_numbers = #tpu.dot_dimension_numbers<[1], [0], [0], [1], [0, 0, 1, 1], [], []>} : vector<4x4xbf16>, vector<4x24xbf16>, vector<4x24xf32> -> vector<4x24xf32>
    %310 = arith.addf %305, %309 : vector<4x24xf32>
    %311 = vector.extract_strided_slice %286 {offsets = [0, 120], sizes = [4, 24], strides = [1, 1]} : vector<4x216xf32> to vector<4x24xf32>
    %c512 = arith.constant 512 : index
    %c0_158 = arith.constant 0 : index
    %312 = vector.load %arg6[%c512, %c0_158] : memref<632x256xbf16, #tpu.memory_space<vmem>>, vector<4x4xbf16>
    %313 = arith.truncf %311 : vector<4x24xf32> to vector<4x24xbf16>
    %cst_159 = arith.constant dense<0.000000e+00> : vector<4x24xf32>
    %314 = tpu.matmul %312, %313, %cst_159 {dimension_numbers = #tpu.dot_dimension_numbers<[1], [0], [0], [1], [0, 0, 1, 1], [], []>} : vector<4x4xbf16>, vector<4x24xbf16>, vector<4x24xf32> -> vector<4x24xf32>
    %315 = arith.addf %310, %314 : vector<4x24xf32>
    %316 = vector.extract_strided_slice %286 {offsets = [0, 144], sizes = [4, 24], strides = [1, 1]} : vector<4x216xf32> to vector<4x24xf32>
    %c520 = arith.constant 520 : index
    %c0_160 = arith.constant 0 : index
    %317 = vector.load %arg6[%c520, %c0_160] : memref<632x256xbf16, #tpu.memory_space<vmem>>, vector<4x4xbf16>
    %318 = arith.truncf %316 : vector<4x24xf32> to vector<4x24xbf16>
    %cst_161 = arith.constant dense<0.000000e+00> : vector<4x24xf32>
    %319 = tpu.matmul %317, %318, %cst_161 {dimension_numbers = #tpu.dot_dimension_numbers<[1], [0], [0], [1], [0, 0, 1, 1], [], []>} : vector<4x4xbf16>, vector<4x24xbf16>, vector<4x24xf32> -> vector<4x24xf32>
    %320 = arith.addf %315, %319 : vector<4x24xf32>
    %321 = vector.extract_strided_slice %286 {offsets = [0, 168], sizes = [4, 24], strides = [1, 1]} : vector<4x216xf32> to vector<4x24xf32>
    %c528 = arith.constant 528 : index
    %c0_162 = arith.constant 0 : index
    %322 = vector.load %arg6[%c528, %c0_162] : memref<632x256xbf16, #tpu.memory_space<vmem>>, vector<4x4xbf16>
    %323 = arith.truncf %321 : vector<4x24xf32> to vector<4x24xbf16>
    %cst_163 = arith.constant dense<0.000000e+00> : vector<4x24xf32>
    %324 = tpu.matmul %322, %323, %cst_163 {dimension_numbers = #tpu.dot_dimension_numbers<[1], [0], [0], [1], [0, 0, 1, 1], [], []>} : vector<4x4xbf16>, vector<4x24xbf16>, vector<4x24xf32> -> vector<4x24xf32>
    %325 = arith.addf %320, %324 : vector<4x24xf32>
    %326 = vector.extract_strided_slice %286 {offsets = [0, 192], sizes = [4, 24], strides = [1, 1]} : vector<4x216xf32> to vector<4x24xf32>
    %c536 = arith.constant 536 : index
    %c0_164 = arith.constant 0 : index
    %327 = vector.load %arg6[%c536, %c0_164] : memref<632x256xbf16, #tpu.memory_space<vmem>>, vector<4x4xbf16>
    %328 = arith.truncf %326 : vector<4x24xf32> to vector<4x24xbf16>
    %cst_165 = arith.constant dense<0.000000e+00> : vector<4x24xf32>
    %329 = tpu.matmul %327, %328, %cst_165 {dimension_numbers = #tpu.dot_dimension_numbers<[1], [0], [0], [1], [0, 0, 1, 1], [], []>} : vector<4x4xbf16>, vector<4x24xbf16>, vector<4x24xf32> -> vector<4x24xf32>
    %330 = arith.addf %325, %329 : vector<4x24xf32>
    %331 = arith.extf %282 : vector<1x24xbf16> to vector<1x24xf32>
    %332 = vector.broadcast %331 : vector<1x24xf32> to vector<4x24xf32>
    %333 = arith.addf %330, %332 : vector<4x24xf32>
    %cst_166 = arith.constant 0.000000e+00 : f32
    %334 = vector.broadcast %cst_166 : f32 to vector<4x24xf32>
    %335 = arith.maximumf %333, %334 : vector<4x24xf32>
    %336 = arith.truncf %335 : vector<4x24xf32> to vector<4x24xbf16>
    %cst_167 = arith.constant dense<0.000000e+00> : vector<4x216xf32>
    %337 = tpu.matmul %336, %283, %cst_167 {dimension_numbers = #tpu.dot_dimension_numbers<[1], [0], [0], [1], [0, 0, 1, 1], [], []>} : vector<4x24xbf16>, vector<24x216xbf16>, vector<4x216xf32> -> vector<4x216xf32>
    %338 = vector.extract_strided_slice %337 {offsets = [0, 0], sizes = [4, 24], strides = [1, 1]} : vector<4x216xf32> to vector<4x24xf32>
    %c472_168 = arith.constant 472 : index
    %c0_169 = arith.constant 0 : index
    %339 = vector.load %arg6[%c472_168, %c0_169] : memref<632x256xbf16, #tpu.memory_space<vmem>>, vector<4x4xbf16>
    %340 = arith.truncf %338 : vector<4x24xf32> to vector<4x24xbf16>
    %cst_170 = arith.constant dense<0.000000e+00> : vector<4x24xf32>
    %341 = tpu.matmul %339, %340, %cst_170 {dimension_numbers = #tpu.dot_dimension_numbers<[1], [0], [0], [1], [0, 0, 1, 1], [], []>} : vector<4x4xbf16>, vector<4x24xbf16>, vector<4x24xf32> -> vector<4x24xf32>
    %342 = vector.extract_strided_slice %337 {offsets = [0, 24], sizes = [4, 24], strides = [1, 1]} : vector<4x216xf32> to vector<4x24xf32>
    %c480_171 = arith.constant 480 : index
    %c0_172 = arith.constant 0 : index
    %343 = vector.load %arg6[%c480_171, %c0_172] : memref<632x256xbf16, #tpu.memory_space<vmem>>, vector<4x4xbf16>
    %344 = arith.truncf %342 : vector<4x24xf32> to vector<4x24xbf16>
    %cst_173 = arith.constant dense<0.000000e+00> : vector<4x24xf32>
    %345 = tpu.matmul %343, %344, %cst_173 {dimension_numbers = #tpu.dot_dimension_numbers<[1], [0], [0], [1], [0, 0, 1, 1], [], []>} : vector<4x4xbf16>, vector<4x24xbf16>, vector<4x24xf32> -> vector<4x24xf32>
    %346 = arith.addf %341, %345 : vector<4x24xf32>
    %347 = vector.extract_strided_slice %337 {offsets = [0, 48], sizes = [4, 24], strides = [1, 1]} : vector<4x216xf32> to vector<4x24xf32>
    %c488_174 = arith.constant 488 : index
    %c0_175 = arith.constant 0 : index
    %348 = vector.load %arg6[%c488_174, %c0_175] : memref<632x256xbf16, #tpu.memory_space<vmem>>, vector<4x4xbf16>
    %349 = arith.truncf %347 : vector<4x24xf32> to vector<4x24xbf16>
    %cst_176 = arith.constant dense<0.000000e+00> : vector<4x24xf32>
    %350 = tpu.matmul %348, %349, %cst_176 {dimension_numbers = #tpu.dot_dimension_numbers<[1], [0], [0], [1], [0, 0, 1, 1], [], []>} : vector<4x4xbf16>, vector<4x24xbf16>, vector<4x24xf32> -> vector<4x24xf32>
    %351 = arith.addf %346, %350 : vector<4x24xf32>
    %352 = vector.extract_strided_slice %337 {offsets = [0, 72], sizes = [4, 24], strides = [1, 1]} : vector<4x216xf32> to vector<4x24xf32>
    %c496_177 = arith.constant 496 : index
    %c0_178 = arith.constant 0 : index
    %353 = vector.load %arg6[%c496_177, %c0_178] : memref<632x256xbf16, #tpu.memory_space<vmem>>, vector<4x4xbf16>
    %354 = arith.truncf %352 : vector<4x24xf32> to vector<4x24xbf16>
    %cst_179 = arith.constant dense<0.000000e+00> : vector<4x24xf32>
    %355 = tpu.matmul %353, %354, %cst_179 {dimension_numbers = #tpu.dot_dimension_numbers<[1], [0], [0], [1], [0, 0, 1, 1], [], []>} : vector<4x4xbf16>, vector<4x24xbf16>, vector<4x24xf32> -> vector<4x24xf32>
    %356 = arith.addf %351, %355 : vector<4x24xf32>
    %357 = vector.extract_strided_slice %337 {offsets = [0, 96], sizes = [4, 24], strides = [1, 1]} : vector<4x216xf32> to vector<4x24xf32>
    %c504_180 = arith.constant 504 : index
    %c0_181 = arith.constant 0 : index
    %358 = vector.load %arg6[%c504_180, %c0_181] : memref<632x256xbf16, #tpu.memory_space<vmem>>, vector<4x4xbf16>
    %359 = arith.truncf %357 : vector<4x24xf32> to vector<4x24xbf16>
    %cst_182 = arith.constant dense<0.000000e+00> : vector<4x24xf32>
    %360 = tpu.matmul %358, %359, %cst_182 {dimension_numbers = #tpu.dot_dimension_numbers<[1], [0], [0], [1], [0, 0, 1, 1], [], []>} : vector<4x4xbf16>, vector<4x24xbf16>, vector<4x24xf32> -> vector<4x24xf32>
    %361 = arith.addf %356, %360 : vector<4x24xf32>
    %362 = vector.extract_strided_slice %337 {offsets = [0, 120], sizes = [4, 24], strides = [1, 1]} : vector<4x216xf32> to vector<4x24xf32>
    %c512_183 = arith.constant 512 : index
    %c0_184 = arith.constant 0 : index
    %363 = vector.load %arg6[%c512_183, %c0_184] : memref<632x256xbf16, #tpu.memory_space<vmem>>, vector<4x4xbf16>
    %364 = arith.truncf %362 : vector<4x24xf32> to vector<4x24xbf16>
    %cst_185 = arith.constant dense<0.000000e+00> : vector<4x24xf32>
    %365 = tpu.matmul %363, %364, %cst_185 {dimension_numbers = #tpu.dot_dimension_numbers<[1], [0], [0], [1], [0, 0, 1, 1], [], []>} : vector<4x4xbf16>, vector<4x24xbf16>, vector<4x24xf32> -> vector<4x24xf32>
    %366 = arith.addf %361, %365 : vector<4x24xf32>
    %367 = vector.extract_strided_slice %337 {offsets = [0, 144], sizes = [4, 24], strides = [1, 1]} : vector<4x216xf32> to vector<4x24xf32>
    %c520_186 = arith.constant 520 : index
    %c0_187 = arith.constant 0 : index
    %368 = vector.load %arg6[%c520_186, %c0_187] : memref<632x256xbf16, #tpu.memory_space<vmem>>, vector<4x4xbf16>
    %369 = arith.truncf %367 : vector<4x24xf32> to vector<4x24xbf16>
    %cst_188 = arith.constant dense<0.000000e+00> : vector<4x24xf32>
    %370 = tpu.matmul %368, %369, %cst_188 {dimension_numbers = #tpu.dot_dimension_numbers<[1], [0], [0], [1], [0, 0, 1, 1], [], []>} : vector<4x4xbf16>, vector<4x24xbf16>, vector<4x24xf32> -> vector<4x24xf32>
    %371 = arith.addf %366, %370 : vector<4x24xf32>
    %372 = vector.extract_strided_slice %337 {offsets = [0, 168], sizes = [4, 24], strides = [1, 1]} : vector<4x216xf32> to vector<4x24xf32>
    %c528_189 = arith.constant 528 : index
    %c0_190 = arith.constant 0 : index
    %373 = vector.load %arg6[%c528_189, %c0_190] : memref<632x256xbf16, #tpu.memory_space<vmem>>, vector<4x4xbf16>
    %374 = arith.truncf %372 : vector<4x24xf32> to vector<4x24xbf16>
    %cst_191 = arith.constant dense<0.000000e+00> : vector<4x24xf32>
    %375 = tpu.matmul %373, %374, %cst_191 {dimension_numbers = #tpu.dot_dimension_numbers<[1], [0], [0], [1], [0, 0, 1, 1], [], []>} : vector<4x4xbf16>, vector<4x24xbf16>, vector<4x24xf32> -> vector<4x24xf32>
    %376 = arith.addf %371, %375 : vector<4x24xf32>
    %377 = vector.extract_strided_slice %337 {offsets = [0, 192], sizes = [4, 24], strides = [1, 1]} : vector<4x216xf32> to vector<4x24xf32>
    %c536_192 = arith.constant 536 : index
    %c0_193 = arith.constant 0 : index
    %378 = vector.load %arg6[%c536_192, %c0_193] : memref<632x256xbf16, #tpu.memory_space<vmem>>, vector<4x4xbf16>
    %379 = arith.truncf %377 : vector<4x24xf32> to vector<4x24xbf16>
    %cst_194 = arith.constant dense<0.000000e+00> : vector<4x24xf32>
    %380 = tpu.matmul %378, %379, %cst_194 {dimension_numbers = #tpu.dot_dimension_numbers<[1], [0], [0], [1], [0, 0, 1, 1], [], []>} : vector<4x4xbf16>, vector<4x24xbf16>, vector<4x24xf32> -> vector<4x24xf32>
    %381 = arith.addf %376, %380 : vector<4x24xf32>
    %382 = arith.extf %284 : vector<1x24xbf16> to vector<1x24xf32>
    %383 = vector.broadcast %382 : vector<1x24xf32> to vector<4x24xf32>
    %384 = arith.addf %381, %383 : vector<4x24xf32>
    %385 = arith.addf %335, %384 : vector<4x24xf32>
    %cst_195 = arith.constant 0.000000e+00 : f32
    %386 = vector.broadcast %cst_195 : f32 to vector<4x24xf32>
    %387 = arith.maximumf %385, %386 : vector<4x24xf32>
    %c568 = arith.constant 568 : index
    %c0_196 = arith.constant 0 : index
    %388 = vector.load %arg6[%c568, %c0_196] : memref<632x256xbf16, #tpu.memory_space<vmem>>, vector<1x4xbf16>
    %c296 = arith.constant 296 : index
    %c0_197 = arith.constant 0 : index
    %389 = vector.load %arg6[%c296, %c0_197] : memref<632x256xbf16, #tpu.memory_space<vmem>>, vector<24x48xbf16>
    %c320 = arith.constant 320 : index
    %c0_198 = arith.constant 0 : index
    %390 = vector.load %arg6[%c320, %c0_198] : memref<632x256xbf16, #tpu.memory_space<vmem>>, vector<1x48xbf16>
    %391 = arith.truncf %387 : vector<4x24xf32> to vector<4x24xbf16>
    %cst_199 = arith.constant dense<0.000000e+00> : vector<1x24xf32>
    %392 = tpu.matmul %388, %391, %cst_199 {dimension_numbers = #tpu.dot_dimension_numbers<[1], [0], [0], [1], [0, 0, 1, 1], [], []>} : vector<1x4xbf16>, vector<4x24xbf16>, vector<1x24xf32> -> vector<1x24xf32>
    %393 = arith.truncf %392 : vector<1x24xf32> to vector<1x24xbf16>
    %cst_200 = arith.constant dense<0.000000e+00> : vector<1x48xf32>
    %394 = tpu.matmul %393, %389, %cst_200 {dimension_numbers = #tpu.dot_dimension_numbers<[1], [0], [0], [1], [0, 0, 1, 1], [], []>} : vector<1x24xbf16>, vector<24x48xbf16>, vector<1x48xf32> -> vector<1x48xf32>
    %395 = arith.extf %390 : vector<1x48xbf16> to vector<1x48xf32>
    %396 = arith.addf %394, %395 : vector<1x48xf32>
    %c0_201 = arith.constant 0 : index
    %c0_202 = arith.constant 0 : index
    %c0_203 = arith.constant 0 : index
    %397 = vector.load %arg4[%c0_201, %c0_202, %c0_203] : memref<16x48x48xbf16, #tpu.memory_space<vmem>>, vector<1x48x48xbf16>
    %398 = vector.shape_cast %397 : vector<1x48x48xbf16> to vector<48x48xbf16>
    %399 = arith.truncf %396 : vector<1x48xf32> to vector<1x48xbf16>
    %cst_204 = arith.constant dense<0.000000e+00> : vector<1x48xf32>
    %400 = tpu.matmul %399, %398, %cst_204 {dimension_numbers = #tpu.dot_dimension_numbers<[1], [0], [0], [1], [0, 0, 1, 1], [], []>} : vector<1x48xbf16>, vector<48x48xbf16>, vector<1x48xf32> -> vector<1x48xf32>
    %c0_205 = arith.constant 0 : index
    %c0_206 = arith.constant 0 : index
    %c0_207 = arith.constant 0 : index
    %401 = vector.load %arg5[%c0_205, %c0_206, %c0_207] : memref<16x1x48xbf16, #tpu.memory_space<vmem>>, vector<1x1x48xbf16>
    %402 = vector.shape_cast %401 : vector<1x1x48xbf16> to vector<1x48xbf16>
    %403 = arith.extf %402 : vector<1x48xbf16> to vector<1x48xf32>
    %404 = arith.addf %400, %403 : vector<1x48xf32>
    %cst_208 = arith.constant 0.000000e+00 : f32
    %405 = vector.broadcast %cst_208 : f32 to vector<1x48xf32>
    %406 = arith.maximumf %404, %405 : vector<1x48xf32>
    %c1_209 = arith.constant 1 : index
    %c0_210 = arith.constant 0 : index
    %c0_211 = arith.constant 0 : index
    %407 = vector.load %arg4[%c1_209, %c0_210, %c0_211] : memref<16x48x48xbf16, #tpu.memory_space<vmem>>, vector<1x48x48xbf16>
    %408 = vector.shape_cast %407 : vector<1x48x48xbf16> to vector<48x48xbf16>
    %409 = arith.truncf %406 : vector<1x48xf32> to vector<1x48xbf16>
    %cst_212 = arith.constant dense<0.000000e+00> : vector<1x48xf32>
    %410 = tpu.matmul %409, %408, %cst_212 {dimension_numbers = #tpu.dot_dimension_numbers<[1], [0], [0], [1], [0, 0, 1, 1], [], []>} : vector<1x48xbf16>, vector<48x48xbf16>, vector<1x48xf32> -> vector<1x48xf32>
    %c1_213 = arith.constant 1 : index
    %c0_214 = arith.constant 0 : index
    %c0_215 = arith.constant 0 : index
    %411 = vector.load %arg5[%c1_213, %c0_214, %c0_215] : memref<16x1x48xbf16, #tpu.memory_space<vmem>>, vector<1x1x48xbf16>
    %412 = vector.shape_cast %411 : vector<1x1x48xbf16> to vector<1x48xbf16>
    %413 = arith.extf %412 : vector<1x48xbf16> to vector<1x48xf32>
    %414 = arith.addf %410, %413 : vector<1x48xf32>
    %415 = arith.addf %406, %414 : vector<1x48xf32>
    %cst_216 = arith.constant 0.000000e+00 : f32
    %416 = vector.broadcast %cst_216 : f32 to vector<1x48xf32>
    %417 = arith.maximumf %415, %416 : vector<1x48xf32>
    %c2_217 = arith.constant 2 : index
    %c0_218 = arith.constant 0 : index
    %c0_219 = arith.constant 0 : index
    %418 = vector.load %arg4[%c2_217, %c0_218, %c0_219] : memref<16x48x48xbf16, #tpu.memory_space<vmem>>, vector<1x48x48xbf16>
    %419 = vector.shape_cast %418 : vector<1x48x48xbf16> to vector<48x48xbf16>
    %420 = arith.truncf %417 : vector<1x48xf32> to vector<1x48xbf16>
    %cst_220 = arith.constant dense<0.000000e+00> : vector<1x48xf32>
    %421 = tpu.matmul %420, %419, %cst_220 {dimension_numbers = #tpu.dot_dimension_numbers<[1], [0], [0], [1], [0, 0, 1, 1], [], []>} : vector<1x48xbf16>, vector<48x48xbf16>, vector<1x48xf32> -> vector<1x48xf32>
    %c2_221 = arith.constant 2 : index
    %c0_222 = arith.constant 0 : index
    %c0_223 = arith.constant 0 : index
    %422 = vector.load %arg5[%c2_221, %c0_222, %c0_223] : memref<16x1x48xbf16, #tpu.memory_space<vmem>>, vector<1x1x48xbf16>
    %423 = vector.shape_cast %422 : vector<1x1x48xbf16> to vector<1x48xbf16>
    %424 = arith.extf %423 : vector<1x48xbf16> to vector<1x48xf32>
    %425 = arith.addf %421, %424 : vector<1x48xf32>
    %cst_224 = arith.constant 0.000000e+00 : f32
    %426 = vector.broadcast %cst_224 : f32 to vector<1x48xf32>
    %427 = arith.maximumf %425, %426 : vector<1x48xf32>
    %c3_225 = arith.constant 3 : index
    %c0_226 = arith.constant 0 : index
    %c0_227 = arith.constant 0 : index
    %428 = vector.load %arg4[%c3_225, %c0_226, %c0_227] : memref<16x48x48xbf16, #tpu.memory_space<vmem>>, vector<1x48x48xbf16>
    %429 = vector.shape_cast %428 : vector<1x48x48xbf16> to vector<48x48xbf16>
    %430 = arith.truncf %427 : vector<1x48xf32> to vector<1x48xbf16>
    %cst_228 = arith.constant dense<0.000000e+00> : vector<1x48xf32>
    %431 = tpu.matmul %430, %429, %cst_228 {dimension_numbers = #tpu.dot_dimension_numbers<[1], [0], [0], [1], [0, 0, 1, 1], [], []>} : vector<1x48xbf16>, vector<48x48xbf16>, vector<1x48xf32> -> vector<1x48xf32>
    %c3_229 = arith.constant 3 : index
    %c0_230 = arith.constant 0 : index
    %c0_231 = arith.constant 0 : index
    %432 = vector.load %arg5[%c3_229, %c0_230, %c0_231] : memref<16x1x48xbf16, #tpu.memory_space<vmem>>, vector<1x1x48xbf16>
    %433 = vector.shape_cast %432 : vector<1x1x48xbf16> to vector<1x48xbf16>
    %434 = arith.extf %433 : vector<1x48xbf16> to vector<1x48xf32>
    %435 = arith.addf %431, %434 : vector<1x48xf32>
    %436 = arith.addf %427, %435 : vector<1x48xf32>
    %cst_232 = arith.constant 0.000000e+00 : f32
    %437 = vector.broadcast %cst_232 : f32 to vector<1x48xf32>
    %438 = arith.maximumf %436, %437 : vector<1x48xf32>
    %c4_233 = arith.constant 4 : index
    %c0_234 = arith.constant 0 : index
    %c0_235 = arith.constant 0 : index
    %439 = vector.load %arg4[%c4_233, %c0_234, %c0_235] : memref<16x48x48xbf16, #tpu.memory_space<vmem>>, vector<1x48x48xbf16>
    %440 = vector.shape_cast %439 : vector<1x48x48xbf16> to vector<48x48xbf16>
    %441 = arith.truncf %438 : vector<1x48xf32> to vector<1x48xbf16>
    %cst_236 = arith.constant dense<0.000000e+00> : vector<1x48xf32>
    %442 = tpu.matmul %441, %440, %cst_236 {dimension_numbers = #tpu.dot_dimension_numbers<[1], [0], [0], [1], [0, 0, 1, 1], [], []>} : vector<1x48xbf16>, vector<48x48xbf16>, vector<1x48xf32> -> vector<1x48xf32>
    %c4_237 = arith.constant 4 : index
    %c0_238 = arith.constant 0 : index
    %c0_239 = arith.constant 0 : index
    %443 = vector.load %arg5[%c4_237, %c0_238, %c0_239] : memref<16x1x48xbf16, #tpu.memory_space<vmem>>, vector<1x1x48xbf16>
    %444 = vector.shape_cast %443 : vector<1x1x48xbf16> to vector<1x48xbf16>
    %445 = arith.extf %444 : vector<1x48xbf16> to vector<1x48xf32>
    %446 = arith.addf %442, %445 : vector<1x48xf32>
    %cst_240 = arith.constant 0.000000e+00 : f32
    %447 = vector.broadcast %cst_240 : f32 to vector<1x48xf32>
    %448 = arith.maximumf %446, %447 : vector<1x48xf32>
    %c5_241 = arith.constant 5 : index
    %c0_242 = arith.constant 0 : index
    %c0_243 = arith.constant 0 : index
    %449 = vector.load %arg4[%c5_241, %c0_242, %c0_243] : memref<16x48x48xbf16, #tpu.memory_space<vmem>>, vector<1x48x48xbf16>
    %450 = vector.shape_cast %449 : vector<1x48x48xbf16> to vector<48x48xbf16>
    %451 = arith.truncf %448 : vector<1x48xf32> to vector<1x48xbf16>
    %cst_244 = arith.constant dense<0.000000e+00> : vector<1x48xf32>
    %452 = tpu.matmul %451, %450, %cst_244 {dimension_numbers = #tpu.dot_dimension_numbers<[1], [0], [0], [1], [0, 0, 1, 1], [], []>} : vector<1x48xbf16>, vector<48x48xbf16>, vector<1x48xf32> -> vector<1x48xf32>
    %c5_245 = arith.constant 5 : index
    %c0_246 = arith.constant 0 : index
    %c0_247 = arith.constant 0 : index
    %453 = vector.load %arg5[%c5_245, %c0_246, %c0_247] : memref<16x1x48xbf16, #tpu.memory_space<vmem>>, vector<1x1x48xbf16>
    %454 = vector.shape_cast %453 : vector<1x1x48xbf16> to vector<1x48xbf16>
    %455 = arith.extf %454 : vector<1x48xbf16> to vector<1x48xf32>
    %456 = arith.addf %452, %455 : vector<1x48xf32>
    %457 = arith.addf %448, %456 : vector<1x48xf32>
    %cst_248 = arith.constant 0.000000e+00 : f32
    %458 = vector.broadcast %cst_248 : f32 to vector<1x48xf32>
    %459 = arith.maximumf %457, %458 : vector<1x48xf32>
    %c6_249 = arith.constant 6 : index
    %c0_250 = arith.constant 0 : index
    %c0_251 = arith.constant 0 : index
    %460 = vector.load %arg4[%c6_249, %c0_250, %c0_251] : memref<16x48x48xbf16, #tpu.memory_space<vmem>>, vector<1x48x48xbf16>
    %461 = vector.shape_cast %460 : vector<1x48x48xbf16> to vector<48x48xbf16>
    %462 = arith.truncf %459 : vector<1x48xf32> to vector<1x48xbf16>
    %cst_252 = arith.constant dense<0.000000e+00> : vector<1x48xf32>
    %463 = tpu.matmul %462, %461, %cst_252 {dimension_numbers = #tpu.dot_dimension_numbers<[1], [0], [0], [1], [0, 0, 1, 1], [], []>} : vector<1x48xbf16>, vector<48x48xbf16>, vector<1x48xf32> -> vector<1x48xf32>
    %c6_253 = arith.constant 6 : index
    %c0_254 = arith.constant 0 : index
    %c0_255 = arith.constant 0 : index
    %464 = vector.load %arg5[%c6_253, %c0_254, %c0_255] : memref<16x1x48xbf16, #tpu.memory_space<vmem>>, vector<1x1x48xbf16>
    %465 = vector.shape_cast %464 : vector<1x1x48xbf16> to vector<1x48xbf16>
    %466 = arith.extf %465 : vector<1x48xbf16> to vector<1x48xf32>
    %467 = arith.addf %463, %466 : vector<1x48xf32>
    %cst_256 = arith.constant 0.000000e+00 : f32
    %468 = vector.broadcast %cst_256 : f32 to vector<1x48xf32>
    %469 = arith.maximumf %467, %468 : vector<1x48xf32>
    %c7_257 = arith.constant 7 : index
    %c0_258 = arith.constant 0 : index
    %c0_259 = arith.constant 0 : index
    %470 = vector.load %arg4[%c7_257, %c0_258, %c0_259] : memref<16x48x48xbf16, #tpu.memory_space<vmem>>, vector<1x48x48xbf16>
    %471 = vector.shape_cast %470 : vector<1x48x48xbf16> to vector<48x48xbf16>
    %472 = arith.truncf %469 : vector<1x48xf32> to vector<1x48xbf16>
    %cst_260 = arith.constant dense<0.000000e+00> : vector<1x48xf32>
    %473 = tpu.matmul %472, %471, %cst_260 {dimension_numbers = #tpu.dot_dimension_numbers<[1], [0], [0], [1], [0, 0, 1, 1], [], []>} : vector<1x48xbf16>, vector<48x48xbf16>, vector<1x48xf32> -> vector<1x48xf32>
    %c7_261 = arith.constant 7 : index
    %c0_262 = arith.constant 0 : index
    %c0_263 = arith.constant 0 : index
    %474 = vector.load %arg5[%c7_261, %c0_262, %c0_263] : memref<16x1x48xbf16, #tpu.memory_space<vmem>>, vector<1x1x48xbf16>
    %475 = vector.shape_cast %474 : vector<1x1x48xbf16> to vector<1x48xbf16>
    %476 = arith.extf %475 : vector<1x48xbf16> to vector<1x48xf32>
    %477 = arith.addf %473, %476 : vector<1x48xf32>
    %478 = arith.addf %469, %477 : vector<1x48xf32>
    %cst_264 = arith.constant 0.000000e+00 : f32
    %479 = vector.broadcast %cst_264 : f32 to vector<1x48xf32>
    %480 = arith.maximumf %478, %479 : vector<1x48xf32>
    %c8_265 = arith.constant 8 : index
    %c0_266 = arith.constant 0 : index
    %c0_267 = arith.constant 0 : index
    %481 = vector.load %arg4[%c8_265, %c0_266, %c0_267] : memref<16x48x48xbf16, #tpu.memory_space<vmem>>, vector<1x48x48xbf16>
    %482 = vector.shape_cast %481 : vector<1x48x48xbf16> to vector<48x48xbf16>
    %483 = arith.truncf %480 : vector<1x48xf32> to vector<1x48xbf16>
    %cst_268 = arith.constant dense<0.000000e+00> : vector<1x48xf32>
    %484 = tpu.matmul %483, %482, %cst_268 {dimension_numbers = #tpu.dot_dimension_numbers<[1], [0], [0], [1], [0, 0, 1, 1], [], []>} : vector<1x48xbf16>, vector<48x48xbf16>, vector<1x48xf32> -> vector<1x48xf32>
    %c8_269 = arith.constant 8 : index
    %c0_270 = arith.constant 0 : index
    %c0_271 = arith.constant 0 : index
    %485 = vector.load %arg5[%c8_269, %c0_270, %c0_271] : memref<16x1x48xbf16, #tpu.memory_space<vmem>>, vector<1x1x48xbf16>
    %486 = vector.shape_cast %485 : vector<1x1x48xbf16> to vector<1x48xbf16>
    %487 = arith.extf %486 : vector<1x48xbf16> to vector<1x48xf32>
    %488 = arith.addf %484, %487 : vector<1x48xf32>
    %cst_272 = arith.constant 0.000000e+00 : f32
    %489 = vector.broadcast %cst_272 : f32 to vector<1x48xf32>
    %490 = arith.maximumf %488, %489 : vector<1x48xf32>
    %c9 = arith.constant 9 : index
    %c0_273 = arith.constant 0 : index
    %c0_274 = arith.constant 0 : index
    %491 = vector.load %arg4[%c9, %c0_273, %c0_274] : memref<16x48x48xbf16, #tpu.memory_space<vmem>>, vector<1x48x48xbf16>
    %492 = vector.shape_cast %491 : vector<1x48x48xbf16> to vector<48x48xbf16>
    %493 = arith.truncf %490 : vector<1x48xf32> to vector<1x48xbf16>
    %cst_275 = arith.constant dense<0.000000e+00> : vector<1x48xf32>
    %494 = tpu.matmul %493, %492, %cst_275 {dimension_numbers = #tpu.dot_dimension_numbers<[1], [0], [0], [1], [0, 0, 1, 1], [], []>} : vector<1x48xbf16>, vector<48x48xbf16>, vector<1x48xf32> -> vector<1x48xf32>
    %c9_276 = arith.constant 9 : index
    %c0_277 = arith.constant 0 : index
    %c0_278 = arith.constant 0 : index
    %495 = vector.load %arg5[%c9_276, %c0_277, %c0_278] : memref<16x1x48xbf16, #tpu.memory_space<vmem>>, vector<1x1x48xbf16>
    %496 = vector.shape_cast %495 : vector<1x1x48xbf16> to vector<1x48xbf16>
    %497 = arith.extf %496 : vector<1x48xbf16> to vector<1x48xf32>
    %498 = arith.addf %494, %497 : vector<1x48xf32>
    %499 = arith.addf %490, %498 : vector<1x48xf32>
    %cst_279 = arith.constant 0.000000e+00 : f32
    %500 = vector.broadcast %cst_279 : f32 to vector<1x48xf32>
    %501 = arith.maximumf %499, %500 : vector<1x48xf32>
    %c10 = arith.constant 10 : index
    %c0_280 = arith.constant 0 : index
    %c0_281 = arith.constant 0 : index
    %502 = vector.load %arg4[%c10, %c0_280, %c0_281] : memref<16x48x48xbf16, #tpu.memory_space<vmem>>, vector<1x48x48xbf16>
    %503 = vector.shape_cast %502 : vector<1x48x48xbf16> to vector<48x48xbf16>
    %504 = arith.truncf %501 : vector<1x48xf32> to vector<1x48xbf16>
    %cst_282 = arith.constant dense<0.000000e+00> : vector<1x48xf32>
    %505 = tpu.matmul %504, %503, %cst_282 {dimension_numbers = #tpu.dot_dimension_numbers<[1], [0], [0], [1], [0, 0, 1, 1], [], []>} : vector<1x48xbf16>, vector<48x48xbf16>, vector<1x48xf32> -> vector<1x48xf32>
    %c10_283 = arith.constant 10 : index
    %c0_284 = arith.constant 0 : index
    %c0_285 = arith.constant 0 : index
    %506 = vector.load %arg5[%c10_283, %c0_284, %c0_285] : memref<16x1x48xbf16, #tpu.memory_space<vmem>>, vector<1x1x48xbf16>
    %507 = vector.shape_cast %506 : vector<1x1x48xbf16> to vector<1x48xbf16>
    %508 = arith.extf %507 : vector<1x48xbf16> to vector<1x48xf32>
    %509 = arith.addf %505, %508 : vector<1x48xf32>
    %cst_286 = arith.constant 0.000000e+00 : f32
    %510 = vector.broadcast %cst_286 : f32 to vector<1x48xf32>
    %511 = arith.maximumf %509, %510 : vector<1x48xf32>
    %c11 = arith.constant 11 : index
    %c0_287 = arith.constant 0 : index
    %c0_288 = arith.constant 0 : index
    %512 = vector.load %arg4[%c11, %c0_287, %c0_288] : memref<16x48x48xbf16, #tpu.memory_space<vmem>>, vector<1x48x48xbf16>
    %513 = vector.shape_cast %512 : vector<1x48x48xbf16> to vector<48x48xbf16>
    %514 = arith.truncf %511 : vector<1x48xf32> to vector<1x48xbf16>
    %cst_289 = arith.constant dense<0.000000e+00> : vector<1x48xf32>
    %515 = tpu.matmul %514, %513, %cst_289 {dimension_numbers = #tpu.dot_dimension_numbers<[1], [0], [0], [1], [0, 0, 1, 1], [], []>} : vector<1x48xbf16>, vector<48x48xbf16>, vector<1x48xf32> -> vector<1x48xf32>
    %c11_290 = arith.constant 11 : index
    %c0_291 = arith.constant 0 : index
    %c0_292 = arith.constant 0 : index
    %516 = vector.load %arg5[%c11_290, %c0_291, %c0_292] : memref<16x1x48xbf16, #tpu.memory_space<vmem>>, vector<1x1x48xbf16>
    %517 = vector.shape_cast %516 : vector<1x1x48xbf16> to vector<1x48xbf16>
    %518 = arith.extf %517 : vector<1x48xbf16> to vector<1x48xf32>
    %519 = arith.addf %515, %518 : vector<1x48xf32>
    %520 = arith.addf %511, %519 : vector<1x48xf32>
    %cst_293 = arith.constant 0.000000e+00 : f32
    %521 = vector.broadcast %cst_293 : f32 to vector<1x48xf32>
    %522 = arith.maximumf %520, %521 : vector<1x48xf32>
    %c12 = arith.constant 12 : index
    %c0_294 = arith.constant 0 : index
    %c0_295 = arith.constant 0 : index
    %523 = vector.load %arg4[%c12, %c0_294, %c0_295] : memref<16x48x48xbf16, #tpu.memory_space<vmem>>, vector<1x48x48xbf16>
    %524 = vector.shape_cast %523 : vector<1x48x48xbf16> to vector<48x48xbf16>
    %525 = arith.truncf %522 : vector<1x48xf32> to vector<1x48xbf16>
    %cst_296 = arith.constant dense<0.000000e+00> : vector<1x48xf32>
    %526 = tpu.matmul %525, %524, %cst_296 {dimension_numbers = #tpu.dot_dimension_numbers<[1], [0], [0], [1], [0, 0, 1, 1], [], []>} : vector<1x48xbf16>, vector<48x48xbf16>, vector<1x48xf32> -> vector<1x48xf32>
    %c12_297 = arith.constant 12 : index
    %c0_298 = arith.constant 0 : index
    %c0_299 = arith.constant 0 : index
    %527 = vector.load %arg5[%c12_297, %c0_298, %c0_299] : memref<16x1x48xbf16, #tpu.memory_space<vmem>>, vector<1x1x48xbf16>
    %528 = vector.shape_cast %527 : vector<1x1x48xbf16> to vector<1x48xbf16>
    %529 = arith.extf %528 : vector<1x48xbf16> to vector<1x48xf32>
    %530 = arith.addf %526, %529 : vector<1x48xf32>
    %cst_300 = arith.constant 0.000000e+00 : f32
    %531 = vector.broadcast %cst_300 : f32 to vector<1x48xf32>
    %532 = arith.maximumf %530, %531 : vector<1x48xf32>
    %c13 = arith.constant 13 : index
    %c0_301 = arith.constant 0 : index
    %c0_302 = arith.constant 0 : index
    %533 = vector.load %arg4[%c13, %c0_301, %c0_302] : memref<16x48x48xbf16, #tpu.memory_space<vmem>>, vector<1x48x48xbf16>
    %534 = vector.shape_cast %533 : vector<1x48x48xbf16> to vector<48x48xbf16>
    %535 = arith.truncf %532 : vector<1x48xf32> to vector<1x48xbf16>
    %cst_303 = arith.constant dense<0.000000e+00> : vector<1x48xf32>
    %536 = tpu.matmul %535, %534, %cst_303 {dimension_numbers = #tpu.dot_dimension_numbers<[1], [0], [0], [1], [0, 0, 1, 1], [], []>} : vector<1x48xbf16>, vector<48x48xbf16>, vector<1x48xf32> -> vector<1x48xf32>
    %c13_304 = arith.constant 13 : index
    %c0_305 = arith.constant 0 : index
    %c0_306 = arith.constant 0 : index
    %537 = vector.load %arg5[%c13_304, %c0_305, %c0_306] : memref<16x1x48xbf16, #tpu.memory_space<vmem>>, vector<1x1x48xbf16>
    %538 = vector.shape_cast %537 : vector<1x1x48xbf16> to vector<1x48xbf16>
    %539 = arith.extf %538 : vector<1x48xbf16> to vector<1x48xf32>
    %540 = arith.addf %536, %539 : vector<1x48xf32>
    %541 = arith.addf %532, %540 : vector<1x48xf32>
    %cst_307 = arith.constant 0.000000e+00 : f32
    %542 = vector.broadcast %cst_307 : f32 to vector<1x48xf32>
    %543 = arith.maximumf %541, %542 : vector<1x48xf32>
    %c14 = arith.constant 14 : index
    %c0_308 = arith.constant 0 : index
    %c0_309 = arith.constant 0 : index
    %544 = vector.load %arg4[%c14, %c0_308, %c0_309] : memref<16x48x48xbf16, #tpu.memory_space<vmem>>, vector<1x48x48xbf16>
    %545 = vector.shape_cast %544 : vector<1x48x48xbf16> to vector<48x48xbf16>
    %546 = arith.truncf %543 : vector<1x48xf32> to vector<1x48xbf16>
    %cst_310 = arith.constant dense<0.000000e+00> : vector<1x48xf32>
    %547 = tpu.matmul %546, %545, %cst_310 {dimension_numbers = #tpu.dot_dimension_numbers<[1], [0], [0], [1], [0, 0, 1, 1], [], []>} : vector<1x48xbf16>, vector<48x48xbf16>, vector<1x48xf32> -> vector<1x48xf32>
    %c14_311 = arith.constant 14 : index
    %c0_312 = arith.constant 0 : index
    %c0_313 = arith.constant 0 : index
    %548 = vector.load %arg5[%c14_311, %c0_312, %c0_313] : memref<16x1x48xbf16, #tpu.memory_space<vmem>>, vector<1x1x48xbf16>
    %549 = vector.shape_cast %548 : vector<1x1x48xbf16> to vector<1x48xbf16>
    %550 = arith.extf %549 : vector<1x48xbf16> to vector<1x48xf32>
    %551 = arith.addf %547, %550 : vector<1x48xf32>
    %cst_314 = arith.constant 0.000000e+00 : f32
    %552 = vector.broadcast %cst_314 : f32 to vector<1x48xf32>
    %553 = arith.maximumf %551, %552 : vector<1x48xf32>
    %c15 = arith.constant 15 : index
    %c0_315 = arith.constant 0 : index
    %c0_316 = arith.constant 0 : index
    %554 = vector.load %arg4[%c15, %c0_315, %c0_316] : memref<16x48x48xbf16, #tpu.memory_space<vmem>>, vector<1x48x48xbf16>
    %555 = vector.shape_cast %554 : vector<1x48x48xbf16> to vector<48x48xbf16>
    %556 = arith.truncf %553 : vector<1x48xf32> to vector<1x48xbf16>
    %cst_317 = arith.constant dense<0.000000e+00> : vector<1x48xf32>
    %557 = tpu.matmul %556, %555, %cst_317 {dimension_numbers = #tpu.dot_dimension_numbers<[1], [0], [0], [1], [0, 0, 1, 1], [], []>} : vector<1x48xbf16>, vector<48x48xbf16>, vector<1x48xf32> -> vector<1x48xf32>
    %c15_318 = arith.constant 15 : index
    %c0_319 = arith.constant 0 : index
    %c0_320 = arith.constant 0 : index
    %558 = vector.load %arg5[%c15_318, %c0_319, %c0_320] : memref<16x1x48xbf16, #tpu.memory_space<vmem>>, vector<1x1x48xbf16>
    %559 = vector.shape_cast %558 : vector<1x1x48xbf16> to vector<1x48xbf16>
    %560 = arith.extf %559 : vector<1x48xbf16> to vector<1x48xf32>
    %561 = arith.addf %557, %560 : vector<1x48xf32>
    %562 = arith.addf %553, %561 : vector<1x48xf32>
    %cst_321 = arith.constant 0.000000e+00 : f32
    %563 = vector.broadcast %cst_321 : f32 to vector<1x48xf32>
    %564 = arith.maximumf %562, %563 : vector<1x48xf32>
    %c576 = arith.constant 576 : index
    %c0_322 = arith.constant 0 : index
    %565 = vector.load %arg6[%c576, %c0_322] : memref<632x256xbf16, #tpu.memory_space<vmem>>, vector<48x20xbf16>
    %566 = arith.truncf %564 : vector<1x48xf32> to vector<1x48xbf16>
    %cst_323 = arith.constant dense<0.000000e+00> : vector<1x20xf32>
    %567 = tpu.matmul %566, %565, %cst_323 {dimension_numbers = #tpu.dot_dimension_numbers<[1], [0], [0], [1], [0, 0, 1, 1], [], []>} : vector<1x48xbf16>, vector<48x20xbf16>, vector<1x20xf32> -> vector<1x20xf32>
    %c624 = arith.constant 624 : index
    %c0_324 = arith.constant 0 : index
    %568 = vector.load %arg6[%c624, %c0_324] : memref<632x256xbf16, #tpu.memory_space<vmem>>, vector<1x20xbf16>
    %569 = arith.extf %568 : vector<1x20xbf16> to vector<1x20xf32>
    %570 = arith.addf %567, %569 : vector<1x20xf32>
    %c0_325 = arith.constant 0 : index
    %c0_326 = arith.constant 0 : index
    %571 = vector.load %arg7[%c0_325, %c0_326] : memref<1x20xf32, #tpu.memory_space<vmem>>, vector<1x20xf32>
    tpu.vector_store %arg7[%c0_325, %c0_326], %570 {strides = array<i32>} : memref<1x20xf32, #tpu.memory_space<vmem>>, vector<1x20xf32>,
    return
  }
  func.func @transform_0(%arg0: i32) -> (i32, i32) {
    %c0_i32 = arith.constant 0 : i32
    %c0_i32_0 = arith.constant 0 : i32
    %c0_i32_1 = arith.constant 0 : i32
    return %c0_i32, %c0_i32_0 : i32, i32
  }
  func.func @transform_1(%arg0: i32) -> (i32, i32) {
    %c0_i32 = arith.constant 0 : i32
    %c0_i32_0 = arith.constant 0 : i32
    %c0_i32_1 = arith.constant 0 : i32
    return %c0_i32, %c0_i32_0 : i32, i32
  }
  func.func @transform_2(%arg0: i32) -> (i32, i32, i32) {
    %c0_i32 = arith.constant 0 : i32
    %c0_i32_0 = arith.constant 0 : i32
    %c0_i32_1 = arith.constant 0 : i32
    %c0_i32_2 = arith.constant 0 : i32
    return %c0_i32, %c0_i32_0, %c0_i32_1 : i32, i32, i32
  }
  func.func @transform_3(%arg0: i32) -> (i32, i32, i32) {
    %c0_i32 = arith.constant 0 : i32
    %c0_i32_0 = arith.constant 0 : i32
    %c0_i32_1 = arith.constant 0 : i32
    %c0_i32_2 = arith.constant 0 : i32
    return %c0_i32, %c0_i32_0, %c0_i32_1 : i32, i32, i32
  }
  func.func @transform_4(%arg0: i32) -> (i32, i32, i32) {
    %c0_i32 = arith.constant 0 : i32
    %c0_i32_0 = arith.constant 0 : i32
    %c0_i32_1 = arith.constant 0 : i32
    %c0_i32_2 = arith.constant 0 : i32
    return %c0_i32, %c0_i32_0, %c0_i32_1 : i32, i32, i32
  }
  func.func @transform_5(%arg0: i32) -> (i32, i32) {
    %c0_i32 = arith.constant 0 : i32
    %c0_i32_0 = arith.constant 0 : i32
    %c0_i32_1 = arith.constant 0 : i32
    return %c0_i32, %c0_i32_0 : i32, i32
  }
  func.func @transform_6(%arg0: i32) -> (i32, i32) {
    %c0_i32 = arith.constant 0 : i32
    %c0_i32_0 = arith.constant 0 : i32
    %c0_i32_1 = arith.constant 0 : i32
    return %c0_i32, %c0_i32_0 : i32, i32
  }
}

</mosaic_0001>

<bundles_post_ra>
// kernel: forward.1
= control target key start
LH: loop header
LB: loop body
LE: loop exit
PB: predicated region body
PF: predicated region fallthrough
CT: control target
= control target key end

     0   :  { %vm194_vm0 = vcmask 801792   ;;  %vm243_vm1 = vcmask 1040384   ;;  %v10787_v24 = vmov 0   ;;  %v71_v26 = vlaneseq  ;;  %s9066_s16 = smov 122   ;;  %s9067_s17 = smov 116   ;;  %s10780_s5 = inlined_call_operand.vmem [shape: bf16[632,256], index: 5, kind: input, shape index: {}]   ;;  %s10781_s0 = inlined_call_operand.vmem [shape: bf16[256,98], index: 0, kind: input, shape index: {}]   ;;  %s10782_s1 = inlined_call_operand.vmem [shape: bf16[576,256], index: 1, kind: input, shape index: {}]   ;;  %s10783_s2 = inlined_call_operand.vmem [shape: bf16[9,64,64], index: 2, kind: input, shape index: {}]   ;;  %s10784_s3 = inlined_call_operand.vmem [shape: bf16[16,48,48], index: 3, kind: input, shape index: {}]   ;;  %s10785_s4 = inlined_call_operand.vmem [shape: bf16[16,1,48], index: 4, kind: input, shape index: {}]   ;;  %s10786_s6 = inlined_call_operand.vmem [shape: f32[1,20], index: 6, kind: output, shape index: {}]  }
   0x1   :  { %v8822_v0 = vld [vmem:[%s10780_s5] ss:$8 sps:$4 sm:$0xff]   ;;  %v8823_v1 = vld [vmem:[%s10780_s5 + $0x10] ss:$8 sps:$4 sm:$0xff]   ;;  %888 = vmatprep.subr.bf16.mxu1 %v10787_v24  ;;  %v8847_v25 = vld [vmem:[%s10782_s1 + $0x4] ss:$8 sps:$4 sm:$0xff]  }
   0x2   :  { %7876 = vmatprep.subr.bf16.mxu0 %v8822_v0  ;;  %v8824_v2 = vld [vmem:[%s10780_s5 + $0x20] ss:$8 sps:$4 sm:$0xff]   ;;  %v8825_v4 = vld [vmem:[%s10780_s5 + $0x30] ss:$8 sps:$4 sm:$0xff]   ;;  %920 = vmatprep.mubr.bf16.mxu1 %v8847_v25  ;;  %v72_v27 = vshrl.u32 %v71_v26, 7  ;;  %vm1294_vm2 = vcmask 1042432  }
   0x3   :  { %7877 = vmatpush3.bf16.msra.mxu0 %v8822_v0  ;;  %v8829_v3 = vld [vmem:[%s10781_s0] sm:$0xff]   ;;  %v8827_v6 = vld [vmem:[%s10780_s5 + $0x50] ss:$8 sps:$4 sm:$0xff]   ;;  %v8830_v9 = vld [vmem:[%s10781_s0 + $0x8] sm:$0xff]   ;;  %vm1281_vm3 = vcmask 48128   ;;  %vm1420_vm4 = vcmask 523264  }
   0x4   :  { %7878 = vmatprep.subr.bf16.mxu0 %v8823_v1  ;;  %7890 = vmatprep.mubr.msk.bf16.mxu0 %vm194_vm0, %v8829_v3  ;;  %v8826_v5 = vld [vmem:[%s10780_s5 + $0x40] ss:$8 sps:$4 sm:$0xff]   ;;  %v8831_v10 = vld [vmem:[%s10781_s0 + $0x10] sm:$0xff]   ;;  %v8832_v11 = vld [vmem:[%s10781_s0 + $0x18] sm:$0xff]   ;;  %v9211_v30 = vsub.s32 0, %v72_v27  ;;  %s9068_s20 = smov 110  }
   0x5   :  { %v8828_v7 = vld [vmem:[%s10780_s5 + $0x60] ss:$0 sps:$4 sm:$0x11]   ;;  %v8834_v13 = vld [vmem:[%s10781_s0 + $0x28] sm:$0xff]   ;;  %v8835_v14 = vld [vmem:[%s10781_s0 + $0x30] sm:$0xff]   ;;  %s9069_s21 = smov 104  }
   0x6   :  { %v245_v8 = vsel %vm243_vm1, %v8828_v7, 0  ;;  %v8833_v12 = vld [vmem:[%s10781_s0 + $0x20] sm:$0xff]   ;;  %v8836_v15 = vld [vmem:[%s10781_s0 + $0x38] sm:$0xff]   ;;  %v8838_v17 = vld [vmem:[%s10781_s0 + $0x48] sm:$0xff]   ;;  %s9070_s22 = smov 98   ;;  %s9072_s23 = smov 86  }
   0x7   :  { %7879 = vmatpush3.bf16.msra.mxu0 %v8823_v1  ;;  %v8837_v16 = vld [vmem:[%s10781_s0 + $0x40] sm:$0xff]   ;;  %v8839_v18 = vld [vmem:[%s10781_s0 + $0x50] sm:$0xff]   ;;  %v8840_v19 = vld [vmem:[%s10781_s0 + $0x58] sm:$0xff]   ;;  %s9073_s24 = smov 80   ;;  %vm9075_vm5 = vmmov 0   ;;  %vm3482_vm6 = vcmask 1045504  }
   0x8   :  { %7880 = vmatprep.subr.bf16.mxu0 %v8824_v2  ;;  %v8841_v20 = vld [vmem:[%s10781_s0 + $0x60] sm:$0xff]   ;;  %v8842_v21 = vld [vmem:[%s10781_s0 + $0x68] sm:$0xff]   ;;  %v8843_v22 = vld [vmem:[%s10781_s0 + $0x70] sm:$0xff]   ;;  %vm3478_vm7 = vcmask 97280   ;;  %s9076_s8 = smov 68   ;;  %s9077_s9 = smov 56  }
   0x9   :  { %v8844_v23 = vld [vmem:[%s10781_s0 + $0x78] sm:$0xff]   ;;  %v69_v28 = vld [vmem:[%s10780_s5 + $0x68] sm:$0x1]  ;;  %s9071_s0 = smov 92   ;;  %s9078_s10 = smov 44   ;;  %vm3541_vm8 = vcmask 130048  }
   0xa   :  { %v70_v29 = vunpack.c.l.bf16 %v69_v28  ;;  %s9079_s11 = smov 32   ;;  %vm4642_vm9 = vcmask 1043456   ;;  %vm4638_vm10 = vcmask 195584   ;;  %vm4700_vm11 = vcmask 1041408   ;;  %s9080_s28 = smov 8  }
   0xb   :  { %7881 = vmatpush3.bf16.msra.mxu0 %v8824_v2  ;;  %vm4696_vm12 = vcmask 31744   ;;  %s9081_s29 = smov 112   ;;  %s9082_s30 = smov 88   ;;  %vm4947_vm13 = vcmask 64512   ;;  %vm5780_vm14 = vcmask 392192   ;;  %vm6998_vm15 = vcmask 155648  }
   0xc   :  { %7882 = vmatprep.subr.bf16.mxu0 %v8825_v4  ;;  %v9214_v31 = vrot.slane %v70_v29, %v9211_v30  ;;  %s9083_s7 = smov 64  }
   0xf   :  { %7883 = vmatpush3.bf16.msra.mxu0 %v8825_v4 }
  0x10   :  { %7884 = vmatprep.subr.bf16.mxu0 %v8826_v5 }
  0x13   :  { %7885 = vmatpush3.bf16.msra.mxu0 %v8826_v5 }
  0x14   :  { %7886 = vmatprep.subr.bf16.mxu0 %v8827_v6 }
  0x17   :  { %7887 = vmatpush3.bf16.msra.mxu0 %v8827_v6 }
  0x18   :  { %8800 = vmatprep.subr.msk.bf16.mxu0 %vm243_vm1, %v8828_v7 }
  0x1b   :  { %7889 = vmatpush3.bf16.msra.mxu0 %v245_v8 }
  0x1e   :  { %7891 = vmatmul.mubr.msk.bf16.vlgmr.msra.gmra.mrb[0].mxu0 %vm194_vm0, %v8830_v9 }
  0x1f   :  { %7894 = vmatprep.mubr.msk.bf16.mxu0 %vm194_vm0, %v8831_v10 }
  0x26   :  { %7895 = vmatmul.mubr.msk.bf16.gmra.mrb[4].mxu0 %vm194_vm0, %v8832_v11 }
  0x27   :  { %7898 = vmatprep.mubr.msk.bf16.mxu0 %vm194_vm0, %v8833_v12 }
  0x2e   :  { %7899 = vmatmul.mubr.msk.bf16.gmra.mrb[8].mxu0 %vm194_vm0, %v8834_v13 }
  0x2f   :  { %7902 = vmatprep.mubr.msk.bf16.mxu0 %vm194_vm0, %v8835_v14 }
  0x36   :  { %7903 = vmatmul.mubr.msk.bf16.gmra.mrb[12].mxu0 %vm194_vm0, %v8836_v15 }
  0x37   :  { %7906 = vmatprep.mubr.msk.bf16.mxu0 %vm194_vm0, %v8837_v16 }
  0x3e   :  { %7907 = vmatmul.mubr.msk.bf16.gmra.mrb[16].mxu0 %vm194_vm0, %v8838_v17 }
  0x3f   :  { %7910 = vmatprep.mubr.msk.bf16.mxu0 %vm194_vm0, %v8839_v18 }
  0x46   :  { %7911 = vmatmul.mubr.msk.bf16.gmra.mrb[20].mxu0 %vm194_vm0, %v8840_v19 }
  0x47   :  { %7914 = vmatprep.mubr.msk.bf16.mxu0 %vm194_vm0, %v8841_v20 }
  0x4e   :  { %7915 = vmatmul.mubr.msk.bf16.gmra.mrb[24].mxu0 %vm194_vm0, %v8842_v21 }
  0x4f   :  { %7918 = vmatprep.mubr.msk.bf16.mxu0 %vm194_vm0, %v8843_v22 }
  0x56   :  { %7919 = vmatmul.mubr.msk.bf16.gmra.mrb[28].mxu0 %vm194_vm0, %v8844_v23 }
  0xf1   :  { %v7892_v32 = vpop.f32.mrb[0].mxu0 }
  0xf2   :  { %v290_v33 = vadd.f32 %v7892_v32, %v9214_v31  ;;  %v281_v34 = vpop.f32.mrb[1].mxu0 }
  0xf3   :  { %v282_v35 = vadd.f32 %v281_v34, %v9214_v31  ;;  %v7893_v36 = vpop.f32.mrb[2].mxu0 }
  0xf4   :  { %v293_v37 = vadd.f32 %v7893_v36, %v9214_v31  ;;  %v284_v38 = vpop.f32.mrb[3].mxu0  ;;  %v410_v40 = vmax.f32 %v290_v33, 0.0 }
  0xf5   :  { %v285_v39 = vadd.f32 %v284_v38, %v9214_v31  ;;  %v408_v42 = vmax.f32 %v282_v35, 0.0 }
  0xf6   :  { %v411_v41 = vmax.f32 %v293_v37, 0.0 }
  0xf7   :  { %v409_v43 = vmax.f32 %v285_v39, 0.0 }
  0xf8   :  { %v513_v44 = vpack.c.bf16 %v411_v41, %v410_v40 }
  0xf9   :  { %v7896_v45 = vpop.f32.mrb[4].mxu0  ;;  %v512_v46 = vpack.c.bf16 %v409_v43, %v408_v42 }
  0xfa   :  { %v306_v47 = vadd.f32 %v7896_v45, %v9214_v31  ;;  %v297_v48 = vpop.f32.mrb[5].mxu0 }
  0xfb   :  { %v298_v49 = vadd.f32 %v297_v48, %v9214_v31  ;;  %v7897_v50 = vpop.f32.mrb[6].mxu0  ;;  %889 = vmatpush1.bf16.msra.mxu1 %v512_v46 }
  0xfc   :  { %v309_v51 = vadd.f32 %v7897_v50, %v9214_v31  ;;  %v300_v52 = vpop.f32.mrb[7].mxu0  ;;  %890 = vmatprep.subr.bf16.mxu1 %v10787_v24  ;;  %v414_v54 = vmax.f32 %v306_v47, 0.0 }
  0xfd   :  { %v301_v53 = vadd.f32 %v300_v52, %v9214_v31  ;;  %v412_v56 = vmax.f32 %v298_v49, 0.0 }
  0xfe   :  { %v415_v55 = vmax.f32 %v309_v51, 0.0 }
  0xff   :  { %v413_v57 = vmax.f32 %v301_v53, 0.0  ;;  %891 = vmatpush1.bf16.msra.mxu1 %v513_v44 }
 0x100   :  { %v515_v58 = vpack.c.bf16 %v415_v55, %v414_v54  ;;  %892 = vmatprep.subr.bf16.mxu1 %v10787_v24 }
 0x101   :  { %v514_v59 = vpack.c.bf16 %v413_v57, %v412_v56  ;;  %v7900_v60 = vpop.f32.mrb[8].mxu0 }
 0x102   :  { %v322_v61 = vadd.f32 %v7900_v60, %v9214_v31  ;;  %v313_v62 = vpop.f32.mrb[9].mxu0 }
 0x103   :  { %v314_v63 = vadd.f32 %v313_v62, %v9214_v31  ;;  %v7901_v0 = vpop.f32.mrb[10].mxu0  ;;  %893 = vmatpush1.bf16.msra.mxu1 %v514_v59 }
 0x104   :  { %v325_v1 = vadd.f32 %v7901_v0, %v9214_v31  ;;  %v316_v2 = vpop.f32.mrb[11].mxu0  ;;  %894 = vmatprep.subr.bf16.mxu1 %v10787_v24  ;;  %v418_v4 = vmax.f32 %v322_v61, 0.0 }
 0x105   :  { %v317_v3 = vadd.f32 %v316_v2, %v9214_v31  ;;  %v416_v6 = vmax.f32 %v314_v63, 0.0 }
 0x106   :  { %v419_v5 = vmax.f32 %v325_v1, 0.0 }
 0x107   :  { %v417_v7 = vmax.f32 %v317_v3, 0.0  ;;  %895 = vmatpush1.bf16.msra.mxu1 %v515_v58 }
 0x108   :  { %v517_v8 = vpack.c.bf16 %v419_v5, %v418_v4  ;;  %896 = vmatprep.subr.bf16.mxu1 %v10787_v24 }
 0x109   :  { %v516_v9 = vpack.c.bf16 %v417_v7, %v416_v6  ;;  %v7904_v10 = vpop.f32.mrb[12].mxu0 }
 0x10a   :  { %v338_v11 = vadd.f32 %v7904_v10, %v9214_v31  ;;  %v329_v12 = vpop.f32.mrb[13].mxu0 }
 0x10b   :  { %v330_v13 = vadd.f32 %v329_v12, %v9214_v31  ;;  %v7905_v14 = vpop.f32.mrb[14].mxu0  ;;  %897 = vmatpush1.bf16.msra.mxu1 %v516_v9 }
 0x10c   :  { %v341_v15 = vadd.f32 %v7905_v14, %v9214_v31  ;;  %v332_v16 = vpop.f32.mrb[15].mxu0  ;;  %898 = vmatprep.subr.bf16.mxu1 %v10787_v24  ;;  %v422_v18 = vmax.f32 %v338_v11, 0.0 }
 0x10d   :  { %v333_v17 = vadd.f32 %v332_v16, %v9214_v31  ;;  %v420_v20 = vmax.f32 %v330_v13, 0.0 }
 0x10e   :  { %v423_v19 = vmax.f32 %v341_v15, 0.0 }
 0x10f   :  { %v421_v21 = vmax.f32 %v333_v17, 0.0  ;;  %899 = vmatpush1.bf16.msra.mxu1 %v517_v8 }
 0x110   :  { %v519_v22 = vpack.c.bf16 %v423_v19, %v422_v18  ;;  %900 = vmatprep.subr.bf16.mxu1 %v10787_v24  ;;  %v8845_v19 = vld [vmem:[%s10782_s1] ss:$8 sps:$4 sm:$0xff]  }
 0x111   :  { %v518_v23 = vpack.c.bf16 %v421_v21, %v420_v20  ;;  %v7908_v25 = vpop.f32.mrb[16].mxu0  ;;  %v8850_v20 = vld [vmem:[%s10782_s1 + $0x10] ss:$8 sps:$4 sm:$0xff]   ;;  %v8851_v21 = vld [vmem:[%s10782_s1 + $0x24] ss:$8 sps:$4 sm:$0xff]  }
 0x112   :  { %v354_v26 = vadd.f32 %v7908_v25, %v9214_v31  ;;  %v345_v27 = vpop.f32.mrb[17].mxu0  ;;  %v8856_v25 = vld [vmem:[%s10782_s1 + $0x30] ss:$8 sps:$4 sm:$0xff]  }
 0x113   :  { %v346_v28 = vadd.f32 %v345_v27, %v9214_v31  ;;  %v7909_v29 = vpop.f32.mrb[18].mxu0  ;;  %901 = vmatpush1.bf16.msra.mxu1 %v518_v23  ;;  %v8854_v23 = vld [vmem:[%s10782_s1 + $0x34] ss:$8 sps:$4 sm:$0xff]   ;;  %v8859_v27 = vld [vmem:[%s10782_s1 + $0x40] ss:$8 sps:$4 sm:$0xff]  }
 0x114   :  { %v357_v32 = vadd.f32 %v7909_v29, %v9214_v31  ;;  %v348_v33 = vpop.f32.mrb[19].mxu0  ;;  %902 = vmatprep.subr.bf16.mxu1 %v10787_v24  ;;  %v426_v35 = vmax.f32 %v354_v26, 0.0  ;;  %v8857_v26 = vld [vmem:[%s10782_s1 + $0x44] ss:$8 sps:$4 sm:$0xff]   ;;  %v8862_v29 = vld [vmem:[%s10782_s1 + $0x50] ss:$8 sps:$4 sm:$0xff]  }
 0x115   :  { %v349_v34 = vadd.f32 %v348_v33, %v9214_v31  ;;  %v424_v37 = vmax.f32 %v346_v28, 0.0  ;;  %v8860_v28 = vld [vmem:[%s10782_s1 + $0x54] ss:$8 sps:$4 sm:$0xff]   ;;  %v8865_v33 = vld [vmem:[%s10782_s1 + $0x60] ss:$8 sps:$4 sm:$0xff]  }
 0x116   :  { %v427_v36 = vmax.f32 %v357_v32, 0.0  ;;  %v8863_v32 = vld [vmem:[%s10782_s1 + $0x64] ss:$8 sps:$4 sm:$0xff]  }
 0x117   :  { %v425_v38 = vmax.f32 %v349_v34, 0.0  ;;  %903 = vmatpush1.bf16.msra.mxu1 %v519_v22  ;;  %v8853_v22 = vld [vmem:[%s10782_s1 + $0x20] ss:$8 sps:$4 sm:$0xff]   ;;  %v8866_v34 = vld [vmem:[%s10782_s1 + $0x74] ss:$8 sps:$4 sm:$0xff]  }
 0x118   :  { %v521_v39 = vpack.c.bf16 %v427_v36, %v426_v35  ;;  %904 = vmatprep.subr.bf16.mxu1 %v10787_v24  ;;  %v8868_v35 = vld [vmem:[%s10782_s1 + $0x70] ss:$8 sps:$4 sm:$0xff]   ;;  %v8869_v36 = vld [vmem:[%s10782_s1 + $0x84] ss:$8 sps:$4 sm:$0xff]  }
 0x119   :  { %v520_v40 = vpack.c.bf16 %v425_v38, %v424_v37  ;;  %v7912_v41 = vpop.f32.mrb[20].mxu0  ;;  %v8871_v37 = vld [vmem:[%s10782_s1 + $0x80] ss:$8 sps:$4 sm:$0xff]   ;;  %v8872_v38 = vld [vmem:[%s10782_s1 + $0x94] ss:$8 sps:$4 sm:$0xff]  }
 0x11a   :  { %v370_v42 = vadd.f32 %v7912_v41, %v9214_v31  ;;  %v361_v43 = vpop.f32.mrb[21].mxu0  ;;  %v8877_v41 = vld [vmem:[%s10782_s1 + $0xa0] ss:$8 sps:$4 sm:$0xff]  }
 0x11b   :  { %v362_v44 = vadd.f32 %v361_v43, %v9214_v31  ;;  %v7913_v45 = vpop.f32.mrb[22].mxu0  ;;  %905 = vmatpush1.bf16.msra.mxu1 %v520_v40  ;;  %v8875_v40 = vld [vmem:[%s10782_s1 + $0xa4] ss:$8 sps:$4 sm:$0xff]   ;;  %v8880_v43 = vld [vmem:[%s10782_s1 + $0xb0] ss:$8 sps:$4 sm:$0xff]  }
 0x11c   :  { %v373_v46 = vadd.f32 %v7913_v45, %v9214_v31  ;;  %v364_v47 = vpop.f32.mrb[23].mxu0  ;;  %906 = vmatprep.subr.bf16.mxu1 %v10787_v24  ;;  %v430_v49 = vmax.f32 %v370_v42, 0.0  ;;  %v8878_v42 = vld [vmem:[%s10782_s1 + $0xb4] ss:$8 sps:$4 sm:$0xff]   ;;  %v8883_v45 = vld [vmem:[%s10782_s1 + $0xc0] ss:$8 sps:$4 sm:$0xff]  }
 0x11d   :  { %v365_v48 = vadd.f32 %v364_v47, %v9214_v31  ;;  %v428_v51 = vmax.f32 %v362_v44, 0.0  ;;  %v8881_v44 = vld [vmem:[%s10782_s1 + $0xc4] ss:$8 sps:$4 sm:$0xff]   ;;  %v8886_v47 = vld [vmem:[%s10782_s1 + $0xd0] ss:$8 sps:$4 sm:$0xff]  }
 0x11e   :  { %v431_v50 = vmax.f32 %v373_v46, 0.0  ;;  %v8884_v46 = vld [vmem:[%s10782_s1 + $0xd4] ss:$8 sps:$4 sm:$0xff]  }
 0x11f   :  { %v429_v52 = vmax.f32 %v365_v48, 0.0  ;;  %907 = vmatpush1.bf16.msra.mxu1 %v521_v39  ;;  %v8874_v39 = vld [vmem:[%s10782_s1 + $0x90] ss:$8 sps:$4 sm:$0xff]   ;;  %v8887_v48 = vld [vmem:[%s10782_s1 + $0xe4] ss:$8 sps:$4 sm:$0xff]  }
 0x120   :  { %v523_v53 = vpack.c.bf16 %v431_v50, %v430_v49  ;;  %908 = vmatprep.subr.bf16.mxu1 %v10787_v24  ;;  %v8889_v49 = vld [vmem:[%s10782_s1 + $0xe0] ss:$8 sps:$4 sm:$0xff]   ;;  %v8890_v50 = vld [vmem:[%s10782_s1 + $0xf4] ss:$8 sps:$4 sm:$0xff]  }
 0x121   :  { %v522_v54 = vpack.c.bf16 %v429_v52, %v428_v51  ;;  %v7916_v55 = vpop.f32.mrb[24].mxu0  ;;  %v8892_v51 = vld [vmem:[%s10782_s1 + $0xf0] ss:$8 sps:$4 sm:$0xff]   ;;  %v8893_v52 = vld [vmem:[%s10782_s1 + $0x104] ss:$8 sps:$4 sm:$0xff]  }
 0x122   :  { %v386_v56 = vadd.f32 %v7916_v55, %v9214_v31  ;;  %v377_v57 = vpop.f32.mrb[25].mxu0  ;;  %v8898_v55 = vld [vmem:[%s10782_s1 + $0x110] ss:$8 sps:$4 sm:$0xff]  }
 0x123   :  { %v378_v58 = vadd.f32 %v377_v57, %v9214_v31  ;;  %v7917_v59 = vpop.f32.mrb[26].mxu0  ;;  %909 = vmatpush1.bf16.msra.mxu1 %v522_v54  ;;  %v8896_v54 = vld [vmem:[%s10782_s1 + $0x114] ss:$8 sps:$4 sm:$0xff]   ;;  %v8901_v57 = vld [vmem:[%s10782_s1 + $0x120] ss:$8 sps:$4 sm:$0xff]  }
 0x124   :  { %v389_v60 = vadd.f32 %v7917_v59, %v9214_v31  ;;  %v380_v61 = vpop.f32.mrb[27].mxu0  ;;  %910 = vmatprep.subr.bf16.mxu1 %v10787_v24  ;;  %v434_v63 = vmax.f32 %v386_v56, 0.0  ;;  %v8899_v56 = vld [vmem:[%s10782_s1 + $0x124] ss:$8 sps:$4 sm:$0xff]   ;;  %v8904_v59 = vld [vmem:[%s10782_s1 + $0x130] ss:$8 sps:$4 sm:$0xff]  }
 0x125   :  { %v381_v62 = vadd.f32 %v380_v61, %v9214_v31  ;;  %v432_v1 = vmax.f32 %v378_v58, 0.0  ;;  %v8902_v58 = vld [vmem:[%s10782_s1 + $0x134] ss:$8 sps:$4 sm:$0xff]   ;;  %v8907_v61 = vld [vmem:[%s10782_s1 + $0x140] ss:$8 sps:$4 sm:$0xff]  }
 0x126   :  { %v435_v0 = vmax.f32 %v389_v60, 0.0  ;;  %v8905_v60 = vld [vmem:[%s10782_s1 + $0x144] ss:$8 sps:$4 sm:$0xff]  }
 0x127   :  { %v433_v2 = vmax.f32 %v381_v62, 0.0  ;;  %911 = vmatpush1.bf16.msra.mxu1 %v523_v53  ;;  %v8895_v53 = vld [vmem:[%s10782_s1 + $0x100] ss:$8 sps:$4 sm:$0xff]   ;;  %v8908_v62 = vld [vmem:[%s10782_s1 + $0x154] ss:$8 sps:$4 sm:$0xff]  }
 0x128   :  { %v525_v3 = vpack.c.bf16 %v435_v0, %v434_v63  ;;  %912 = vmatprep.subr.bf16.mxu1 %v10787_v24  ;;  %v8910_v63 = vld [vmem:[%s10782_s1 + $0x150] ss:$8 sps:$4 sm:$0xff]   ;;  %v8911_v0 = vld [vmem:[%s10782_s1 + $0x164] ss:$8 sps:$4 sm:$0xff]  }
 0x129   :  { %v524_v4 = vpack.c.bf16 %v433_v2, %v432_v1  ;;  %v7920_v5 = vpop.f32.mrb[28].mxu0  ;;  %v8913_v1 = vld [vmem:[%s10782_s1 + $0x160] ss:$8 sps:$4 sm:$0xff]   ;;  %v8914_v2 = vld [vmem:[%s10782_s1 + $0x174] ss:$8 sps:$4 sm:$0xff]  }
 0x12a   :  { %v402_v6 = vadd.f32 %v7920_v5, %v9214_v31  ;;  %v393_v7 = vpop.f32.mrb[29].mxu0  ;;  %v8919_v5 = vld [vmem:[%s10782_s1 + $0x180] ss:$8 sps:$4 sm:$0xff]  }
 0x12b   :  { %v394_v8 = vadd.f32 %v393_v7, %v9214_v31  ;;  %v7921_v9 = vpop.f32.mrb[30].mxu0  ;;  %913 = vmatpush1.bf16.msra.mxu1 %v524_v4  ;;  %v8917_v4 = vld [vmem:[%s10782_s1 + $0x184] ss:$8 sps:$4 sm:$0xff]   ;;  %v8922_v7 = vld [vmem:[%s10782_s1 + $0x190] ss:$8 sps:$4 sm:$0xff]  }
 0x12c   :  { %v405_v10 = vadd.f32 %v7921_v9, %v9214_v31  ;;  %v396_v11 = vpop.f32.mrb[31].mxu0  ;;  %914 = vmatprep.subr.bf16.mxu1 %v10787_v24  ;;  %v438_v13 = vmax.f32 %v402_v6, 0.0  ;;  %v8920_v6 = vld [vmem:[%s10782_s1 + $0x194] ss:$8 sps:$4 sm:$0xff]   ;;  %v8925_v9 = vld [vmem:[%s10782_s1 + $0x1a0] ss:$8 sps:$4 sm:$0xff]  }
 0x12d   :  { %v397_v12 = vadd.f32 %v396_v11, %v9214_v31  ;;  %v436_v15 = vmax.f32 %v394_v8, 0.0  ;;  %v8848_v31 = vld [vmem:[%s10782_s1 + $0x14] ss:$8 sps:$4 sm:$0xff]   ;;  %v8923_v8 = vld [vmem:[%s10782_s1 + $0x1a4] ss:$8 sps:$4 sm:$0xff]  }
 0x12e   :  { %v439_v14 = vmax.f32 %v405_v10, 0.0  ;;  %v8926_v10 = vld [vmem:[%s10782_s1 + $0x1b4] ss:$8 sps:$4 sm:$0xff]  }
 0x12f   :  { %v437_v16 = vmax.f32 %v397_v12, 0.0  ;;  %915 = vmatpush1.bf16.msra.mxu1 %v525_v3  ;;  %v8916_v3 = vld [vmem:[%s10782_s1 + $0x170] ss:$8 sps:$4 sm:$0xff]  }
 0x130   :  { %v527_v17 = vpack.c.bf16 %v439_v14, %v438_v13  ;;  %916 = vmatprep.subr.bf16.mxu1 %v10787_v24  ;;  %v8928_v13 = vld [vmem:[%s10782_s1 + $0x1b0] ss:$8 sps:$4 sm:$0xff]  }
 0x131   :  { %v526_v18 = vpack.c.bf16 %v437_v16, %v436_v15  ;;  %v8929_v15 = vld [vmem:[%s10782_s1 + $0x1c4] ss:$8 sps:$4 sm:$0xff]  }
 0x133   :  { %917 = vmatpush1.bf16.msra.mxu1 %v526_v18 }
 0x134   :  { %918 = vmatprep.subr.bf16.mxu1 %v10787_v24 }
 0x137   :  { %919 = vmatpush1.bf16.msra.mxu1 %v527_v17 }
 0x13a   :  { %921 = vmatmul.mubr.bf16.vlgmr.msra.gmra.mrb[0].mxu1 %v8845_v19  ;;  %v8931_v19 = vld [vmem:[%s10782_s1 + $0x1c0] ss:$8 sps:$4 sm:$0xff]  }
 0x13b   :  { %928 = vmatprep.mubr.bf16.mxu1 %v8848_v31 }
 0x142   :  { %929 = vmatmul.mubr.bf16.gmra.mrb[4].mxu1 %v8850_v20  ;;  %v8932_v20 = vld [vmem:[%s10782_s1 + $0x1d4] ss:$8 sps:$4 sm:$0xff]  }
 0x143   :  { %936 = vmatprep.mubr.bf16.mxu1 %v8851_v21 }
 0x14a   :  { %937 = vmatmul.mubr.bf16.gmra.mrb[8].mxu1 %v8853_v22 }
 0x14b   :  { %944 = vmatprep.mubr.bf16.mxu1 %v8854_v23 }
 0x152   :  { %945 = vmatmul.mubr.bf16.gmra.mrb[12].mxu1 %v8856_v25  ;;  %v8934_v25 = vld [vmem:[%s10782_s1 + $0x1d0] ss:$8 sps:$4 sm:$0xff]  }
 0x153   :  { %952 = vmatprep.mubr.bf16.mxu1 %v8857_v26 }
 0x15a   :  { %953 = vmatmul.mubr.bf16.gmra.mrb[16].mxu1 %v8859_v27  ;;  %v8935_v27 = vld [vmem:[%s10782_s1 + $0x1e4] ss:$8 sps:$4 sm:$0xff]  }
 0x15b   :  { %960 = vmatprep.mubr.bf16.mxu1 %v8860_v28 }
 0x162   :  { %961 = vmatmul.mubr.bf16.gmra.mrb[20].mxu1 %v8862_v29 }
 0x163   :  { %968 = vmatprep.mubr.bf16.mxu1 %v8863_v32 }
 0x16a   :  { %969 = vmatmul.mubr.bf16.gmra.mrb[24].mxu1 %v8865_v33  ;;  %v8937_v33 = vld [vmem:[%s10782_s1 + $0x1e0] ss:$8 sps:$4 sm:$0xff]  }
 0x16b   :  { %976 = vmatprep.mubr.bf16.mxu1 %v8866_v34 }
 0x172   :  { %977 = vmatmul.mubr.bf16.gmra.mrb[28].mxu1 %v8868_v35  ;;  %v8938_v35 = vld [vmem:[%s10782_s1 + $0x1f4] ss:$8 sps:$4 sm:$0xff]  }
 0x173   :  { %984 = vmatprep.mubr.bf16.mxu1 %v8869_v36 }
 0x17a   :  { %985 = vmatmul.mubr.bf16.gmra.mrb[32].mxu1 %v8871_v37 }
 0x17b   :  { %992 = vmatprep.mubr.bf16.mxu1 %v8872_v38 }
 0x182   :  { %993 = vmatmul.mubr.bf16.gmra.mrb[36].mxu1 %v8874_v39  ;;  %v8940_v39 = vld [vmem:[%s10782_s1 + $0x1f0] ss:$8 sps:$4 sm:$0xff]  }
 0x183   :  { %1000 = vmatprep.mubr.bf16.mxu1 %v8875_v40 }
 0x18a   :  { %1001 = vmatmul.mubr.bf16.gmra.mrb[40].mxu1 %v8877_v41 }
 0x18b   :  { %1008 = vmatprep.mubr.bf16.mxu1 %v8878_v42  ;;  %v8941_v42 = vld [vmem:[%s10782_s1 + $0x204] ss:$8 sps:$4 sm:$0xff]  }
 0x192   :  { %1009 = vmatmul.mubr.bf16.gmra.mrb[44].mxu1 %v8880_v43 }
 0x193   :  { %1016 = vmatprep.mubr.bf16.mxu1 %v8881_v44 }
 0x19a   :  { %1017 = vmatmul.mubr.bf16.gmra.mrb[48].mxu1 %v8883_v45 }
 0x19b   :  { %1024 = vmatprep.mubr.bf16.mxu1 %v8884_v46 }
 0x1a2   :  { %1025 = vmatmul.mubr.bf16.gmra.mrb[52].mxu1 %v8886_v47  ;;  %v8943_v47 = vld [vmem:[%s10782_s1 + $0x200] ss:$8 sps:$4 sm:$0xff]  }
 0x1a3   :  { %1032 = vmatprep.mubr.bf16.mxu1 %v8887_v48 }
 0x1aa   :  { %1033 = vmatmul.mubr.bf16.gmra.mrb[56].mxu1 %v8889_v49 }
 0x1ab   :  { %1040 = vmatprep.mubr.bf16.mxu1 %v8890_v50  ;;  %v8944_v50 = vld [vmem:[%s10782_s1 + $0x214] ss:$8 sps:$4 sm:$0xff]  }
 0x1b2   :  { %1041 = vmatmul.mubr.bf16.gmra.mrb[60].mxu1 %v8892_v51 }
 0x1b3   :  { %1048 = vmatprep.mubr.bf16.mxu1 %v8893_v52 }
 0x1ba   :  { %1049 = vmatmul.mubr.bf16.gmra.mrb[64].mxu1 %v8895_v53 }
 0x1bb   :  { %1056 = vmatprep.mubr.bf16.mxu1 %v8896_v54 }
 0x1c2   :  { %1057 = vmatmul.mubr.bf16.gmra.mrb[68].mxu1 %v8898_v55  ;;  %v8946_v55 = vld [vmem:[%s10782_s1 + $0x210] ss:$8 sps:$4 sm:$0xff]  }
 0x1c3   :  { %1064 = vmatprep.mubr.bf16.mxu1 %v8899_v56 }
 0x1ca   :  { %1065 = vmatmul.mubr.bf16.gmra.mrb[72].mxu1 %v8901_v57 }
 0x1cb   :  { %1072 = vmatprep.mubr.bf16.mxu1 %v8902_v58  ;;  %v8947_v58 = vld [vmem:[%s10782_s1 + $0x224] ss:$8 sps:$4 sm:$0xff]  }
 0x1d2   :  { %1073 = vmatmul.mubr.bf16.gmra.mrb[76].mxu1 %v8904_v59 }
 0x1d3   :  { %1080 = vmatprep.mubr.bf16.mxu1 %v8905_v60 }
 0x1da   :  { %1081 = vmatmul.mubr.bf16.gmra.mrb[80].mxu1 %v8907_v61 }
 0x1db   :  { %1088 = vmatprep.mubr.bf16.mxu1 %v8908_v62 }
 0x1e2   :  { %1089 = vmatmul.mubr.bf16.gmra.mrb[84].mxu1 %v8910_v63 }
 0x1e3   :  { %1096 = vmatprep.mubr.bf16.mxu1 %v8911_v0  ;;  %v8949_v0 = vld [vmem:[%s10782_s1 + $0x220] ss:$8 sps:$4 sm:$0xff]  }
 0x1ea   :  { %1097 = vmatmul.mubr.bf16.gmra.mrb[88].mxu1 %v8913_v1 }
 0x1eb   :  { %1104 = vmatprep.mubr.bf16.mxu1 %v8914_v2  ;;  %v8950_v2 = vld [vmem:[%s10782_s1 + $0x234] ss:$8 sps:$4 sm:$0xff]  }
 0x1f2   :  { %1105 = vmatmul.mubr.bf16.gmra.mrb[92].mxu1 %v8916_v3 }
 0x1f3   :  { %1112 = vmatprep.mubr.bf16.mxu1 %v8917_v4 }
 0x1fa   :  { %1113 = vmatmul.mubr.bf16.gmra.mrb[96].mxu1 %v8919_v5 }
 0x1fb   :  { %1120 = vmatprep.mubr.bf16.mxu1 %v8920_v6 }
 0x202   :  { %1121 = vmatmul.mubr.bf16.gmra.mrb[100].mxu1 %v8922_v7 }
 0x203   :  { %1128 = vmatprep.mubr.bf16.mxu1 %v8923_v8  ;;  %v8952_v8 = vld [vmem:[%s10782_s1 + $0x230] ss:$8 sps:$4 sm:$0xff]  }
 0x20a   :  { %1129 = vmatmul.mubr.bf16.gmra.mrb[104].mxu1 %v8925_v9 }
 0x20b   :  { %1136 = vmatprep.mubr.bf16.mxu1 %v8926_v10 }
 0x20d   :  { %v9425_v11 = vpop.f32.mrb[0].mxu1 }
 0x20e   :  { %v924_v12 = vpop.f32.mrb[1].mxu1 }
 0x20f   :  { %v9430_v14 = vpop.f32.mrb[2].mxu1 }
 0x210   :  { %v927_v16 = vpop.f32.mrb[3].mxu1 }
 0x212   :  { %1137 = vmatmul.mubr.bf16.gmra.mrb[108].mxu1 %v8928_v13 }
 0x213   :  { %1144 = vmatprep.mubr.bf16.mxu1 %v8929_v15 }
 0x215   :  { %v9435_v17 = vpop.f32.mrb[4].mxu1 }
 0x216   :  { %v932_v18 = vpop.f32.mrb[5].mxu1 }
 0x217   :  { %v9440_v31 = vpop.f32.mrb[6].mxu1 }
 0x218   :  { %v935_v21 = vpop.f32.mrb[7].mxu1 }
 0x21a   :  { %1145 = vmatmul.mubr.bf16.gmra.mrb[112].mxu1 %v8931_v19 }
 0x21b   :  { %1152 = vmatprep.mubr.bf16.mxu1 %v8932_v20 }
 0x21d   :  { %v9445_v22 = vpop.f32.mrb[8].mxu1 }
 0x21e   :  { %v940_v23 = vpop.f32.mrb[9].mxu1 }
 0x21f   :  { %v9450_v26 = vpop.f32.mrb[10].mxu1 }
 0x220   :  { %v943_v28 = vpop.f32.mrb[11].mxu1 }
 0x222   :  { %1153 = vmatmul.mubr.bf16.gmra.mrb[116].mxu1 %v8934_v25 }
 0x223   :  { %1160 = vmatprep.mubr.bf16.mxu1 %v8935_v27 }
 0x225   :  { %v9455_v29 = vpop.f32.mrb[12].mxu1 }
 0x226   :  { %v948_v32 = vpop.f32.mrb[13].mxu1 }
 0x227   :  { %v9460_v34 = vpop.f32.mrb[14].mxu1 }
 0x228   :  { %v951_v36 = vpop.f32.mrb[15].mxu1 }
 0x22a   :  { %1161 = vmatmul.mubr.bf16.gmra.mrb[120].mxu1 %v8937_v33 }
 0x22b   :  { %1168 = vmatprep.mubr.bf16.mxu1 %v8938_v35 }
 0x22d   :  { %v954_v37 = vpop.f32.mrb[16].mxu1 }
 0x22e   :  { %v956_v38 = vpop.f32.mrb[17].mxu1  ;;  %v1209_v40 = vmax.f32 %v9425_v11, %v954_v37 }
 0x22f   :  { %v957_v41 = vpop.f32.mrb[18].mxu1 }
 0x230   :  { %v959_v43 = vpop.f32.mrb[19].mxu1  ;;  %v1210_v44 = vmax.f32 %v9430_v14, %v957_v41 }
 0x232   :  { %1169 = vmatmul.mubr.bf16.gmra.mrb[124].mxu1 %v8940_v39 }
 0x233   :  { %1176 = vmatprep.mubr.bf16.mxu1 %v8941_v42 }
 0x235   :  { %v962_v45 = vpop.f32.mrb[20].mxu1 }
 0x236   :  { %v964_v46 = vpop.f32.mrb[21].mxu1  ;;  %v1211_v48 = vmax.f32 %v9435_v17, %v962_v45 }
 0x237   :  { %v965_v49 = vpop.f32.mrb[22].mxu1 }
 0x238   :  { %v967_v51 = vpop.f32.mrb[23].mxu1  ;;  %v1212_v52 = vmax.f32 %v9440_v31, %v965_v49 }
 0x23a   :  { %1177 = vmatmul.mubr.bf16.gmra.mrb[128].mxu1 %v8943_v47 }
 0x23b   :  { %1184 = vmatprep.mubr.bf16.mxu1 %v8944_v50 }
 0x23d   :  { %v970_v53 = vpop.f32.mrb[24].mxu1 }
 0x23e   :  { %v972_v54 = vpop.f32.mrb[25].mxu1  ;;  %v1213_v56 = vmax.f32 %v9445_v22, %v970_v53 }
 0x23f   :  { %v973_v57 = vpop.f32.mrb[26].mxu1 }
 0x240   :  { %v975_v59 = vpop.f32.mrb[27].mxu1  ;;  %v1214_v60 = vmax.f32 %v9450_v26, %v973_v57 }
 0x242   :  { %1185 = vmatmul.mubr.bf16.gmra.mrb[132].mxu1 %v8946_v55 }
 0x243   :  { %1192 = vmatprep.mubr.bf16.mxu1 %v8947_v58 }
 0x245   :  { %v978_v61 = vpop.f32.mrb[28].mxu1 }
 0x246   :  { %v1215_v62 = vmax.f32 %v9455_v29, %v978_v61  ;;  %v980_v63 = vpop.f32.mrb[29].mxu1 }
 0x247   :  { %v981_v1 = vpop.f32.mrb[30].mxu1 }
 0x248   :  { %v1216_v3 = vmax.f32 %v9460_v34, %v981_v1  ;;  %v983_v4 = vpop.f32.mrb[31].mxu1 }
 0x24a   :  { %1193 = vmatmul.mubr.bf16.gmra.mrb[136].mxu1 %v8949_v0 }
 0x24b   :  { %1200 = vmatprep.mubr.bf16.mxu1 %v8950_v2  ;;  %v1273_v2 = vld [vmem:[%s10780_s5 + $0x70] sm:$0x7] }
 0x24c   :  { %8801 = vmatprep.subr.msk.bf16.mxu0 %vm1294_vm2, %v1273_v2 }
 0x24d   :  { %v986_v5 = vpop.f32.mrb[32].mxu1 }
 0x24e   :  { %v1217_v6 = vmax.f32 %v1209_v40, %v986_v5  ;;  %v988_v7 = vpop.f32.mrb[33].mxu1  ;;  %v1296_v5 = vsel %vm1294_vm2, %v1273_v2, 0 }
 0x24f   :  { %v989_v9 = vpop.f32.mrb[34].mxu1  ;;  %7923 = vmatpush3.bf16.msra.mxu0 %v1296_v5 }
 0x250   :  { %v1218_v10 = vmax.f32 %v1210_v44, %v989_v9  ;;  %v991_v11 = vpop.f32.mrb[35].mxu1 }
 0x252   :  { %1201 = vmatmul.mubr.bf16.gmra.mrb[140].mxu1 %v8952_v8 }
 0x255   :  { %v994_v12 = vpop.f32.mrb[36].mxu1 }
 0x256   :  { %v1219_v13 = vmax.f32 %v1211_v48, %v994_v12  ;;  %v996_v14 = vpop.f32.mrb[37].mxu1 }
 0x257   :  { %v997_v15 = vpop.f32.mrb[38].mxu1 }
 0x258   :  { %v1220_v16 = vmax.f32 %v1212_v52, %v997_v15  ;;  %v999_v17 = vpop.f32.mrb[39].mxu1 }
 0x25d   :  { %v1002_v18 = vpop.f32.mrb[40].mxu1 }
 0x25e   :  { %v1221_v19 = vmax.f32 %v1213_v56, %v1002_v18  ;;  %v1004_v31 = vpop.f32.mrb[41].mxu1 }
 0x25f   :  { %v1005_v20 = vpop.f32.mrb[42].mxu1 }
 0x260   :  { %v1222_v21 = vmax.f32 %v1214_v60, %v1005_v20  ;;  %v1007_v22 = vpop.f32.mrb[43].mxu1 }
 0x265   :  { %v1010_v23 = vpop.f32.mrb[44].mxu1 }
 0x266   :  { %v1223_v25 = vmax.f32 %v1215_v62, %v1010_v23  ;;  %v1012_v26 = vpop.f32.mrb[45].mxu1 }
 0x267   :  { %v1013_v27 = vpop.f32.mrb[46].mxu1 }
 0x268   :  { %v1224_v28 = vmax.f32 %v1216_v3, %v1013_v27  ;;  %v1015_v29 = vpop.f32.mrb[47].mxu1 }
 0x26d   :  { %v1018_v32 = vpop.f32.mrb[48].mxu1 }
 0x26e   :  { %v1225_v33 = vmax.f32 %v1217_v6, %v1018_v32  ;;  %v1020_v34 = vpop.f32.mrb[49].mxu1 }
 0x26f   :  { %v1021_v35 = vpop.f32.mrb[50].mxu1 }
 0x270   :  { %v1226_v36 = vmax.f32 %v1218_v10, %v1021_v35  ;;  %v1023_v37 = vpop.f32.mrb[51].mxu1 }
 0x275   :  { %v1026_v38 = vpop.f32.mrb[52].mxu1 }
 0x276   :  { %v1227_v39 = vmax.f32 %v1219_v13, %v1026_v38  ;;  %v1028_v40 = vpop.f32.mrb[53].mxu1 }
 0x277   :  { %v1029_v41 = vpop.f32.mrb[54].mxu1 }
 0x278   :  { %v1228_v42 = vmax.f32 %v1220_v16, %v1029_v41  ;;  %v1031_v43 = vpop.f32.mrb[55].mxu1 }
 0x27d   :  { %v1034_v44 = vpop.f32.mrb[56].mxu1 }
 0x27e   :  { %v1229_v45 = vmax.f32 %v1221_v19, %v1034_v44  ;;  %v1036_v46 = vpop.f32.mrb[57].mxu1 }
 0x27f   :  { %v1037_v47 = vpop.f32.mrb[58].mxu1 }
 0x280   :  { %v1230_v48 = vmax.f32 %v1222_v21, %v1037_v47  ;;  %v1039_v49 = vpop.f32.mrb[59].mxu1 }
 0x285   :  { %v1042_v50 = vpop.f32.mrb[60].mxu1 }
 0x286   :  { %v1231_v51 = vmax.f32 %v1223_v25, %v1042_v50  ;;  %v1044_v52 = vpop.f32.mrb[61].mxu1 }
 0x287   :  { %v1045_v53 = vpop.f32.mrb[62].mxu1 }
 0x288   :  { %v1232_v54 = vmax.f32 %v1224_v28, %v1045_v53  ;;  %v1047_v55 = vpop.f32.mrb[63].mxu1 }
 0x28d   :  { %v1050_v56 = vpop.f32.mrb[64].mxu1 }
 0x28e   :  { %v1233_v57 = vmax.f32 %v1225_v33, %v1050_v56  ;;  %v1052_v58 = vpop.f32.mrb[65].mxu1 }
 0x28f   :  { %v1053_v59 = vpop.f32.mrb[66].mxu1 }
 0x290   :  { %v1234_v60 = vmax.f32 %v1226_v36, %v1053_v59  ;;  %v1055_v61 = vpop.f32.mrb[67].mxu1 }
 0x295   :  { %v1058_v62 = vpop.f32.mrb[68].mxu1 }
 0x296   :  { %v1235_v63 = vmax.f32 %v1227_v39, %v1058_v62  ;;  %v1060_v0 = vpop.f32.mrb[69].mxu1 }
 0x297   :  { %v1061_v1 = vpop.f32.mrb[70].mxu1 }
 0x298   :  { %v1236_v3 = vmax.f32 %v1228_v42, %v1061_v1  ;;  %v1063_v4 = vpop.f32.mrb[71].mxu1 }
 0x29d   :  { %v1066_v6 = vpop.f32.mrb[72].mxu1 }
 0x29e   :  { %v1237_v7 = vmax.f32 %v1229_v45, %v1066_v6  ;;  %v1068_v8 = vpop.f32.mrb[73].mxu1 }
 0x29f   :  { %v1069_v9 = vpop.f32.mrb[74].mxu1 }
 0x2a0   :  { %v1238_v10 = vmax.f32 %v1230_v48, %v1069_v9  ;;  %v1071_v11 = vpop.f32.mrb[75].mxu1 }
 0x2a5   :  { %v1074_v12 = vpop.f32.mrb[76].mxu1 }
 0x2a6   :  { %v1239_v13 = vmax.f32 %v1231_v51, %v1074_v12  ;;  %v1076_v14 = vpop.f32.mrb[77].mxu1 }
 0x2a7   :  { %v1077_v15 = vpop.f32.mrb[78].mxu1 }
 0x2a8   :  { %v1240_v16 = vmax.f32 %v1232_v54, %v1077_v15  ;;  %v1079_v17 = vpop.f32.mrb[79].mxu1 }
 0x2ad   :  { %v1082_v18 = vpop.f32.mrb[80].mxu1 }
 0x2ae   :  { %v1241_v19 = vmax.f32 %v1233_v57, %v1082_v18  ;;  %v1084_v31 = vpop.f32.mrb[81].mxu1 }
 0x2af   :  { %v1085_v20 = vpop.f32.mrb[82].mxu1 }
 0x2b0   :  { %v1242_v21 = vmax.f32 %v1234_v60, %v1085_v20  ;;  %v1087_v22 = vpop.f32.mrb[83].mxu1 }
 0x2b5   :  { %v1090_v23 = vpop.f32.mrb[84].mxu1 }
 0x2b6   :  { %v1243_v25 = vmax.f32 %v1235_v63, %v1090_v23  ;;  %v1092_v26 = vpop.f32.mrb[85].mxu1 }
 0x2b7   :  { %v1093_v27 = vpop.f32.mrb[86].mxu1 }
 0x2b8   :  { %v1244_v28 = vmax.f32 %v1236_v3, %v1093_v27  ;;  %v1095_v29 = vpop.f32.mrb[87].mxu1 }
 0x2bd   :  { %v1098_v32 = vpop.f32.mrb[88].mxu1 }
 0x2be   :  { %v1245_v33 = vmax.f32 %v1237_v7, %v1098_v32  ;;  %v1100_v34 = vpop.f32.mrb[89].mxu1 }
 0x2bf   :  { %v1101_v35 = vpop.f32.mrb[90].mxu1 }
 0x2c0   :  { %v1246_v36 = vmax.f32 %v1238_v10, %v1101_v35  ;;  %v1103_v37 = vpop.f32.mrb[91].mxu1 }
 0x2c5   :  { %v1106_v38 = vpop.f32.mrb[92].mxu1 }
 0x2c6   :  { %v1247_v39 = vmax.f32 %v1239_v13, %v1106_v38  ;;  %v1108_v40 = vpop.f32.mrb[93].mxu1 }
 0x2c7   :  { %v1109_v41 = vpop.f32.mrb[94].mxu1 }
 0x2c8   :  { %v1248_v42 = vmax.f32 %v1240_v16, %v1109_v41  ;;  %v1111_v43 = vpop.f32.mrb[95].mxu1 }
 0x2cd   :  { %v1114_v44 = vpop.f32.mrb[96].mxu1 }
 0x2ce   :  { %v1249_v45 = vmax.f32 %v1241_v19, %v1114_v44  ;;  %v1116_v46 = vpop.f32.mrb[97].mxu1 }
 0x2cf   :  { %v1117_v47 = vpop.f32.mrb[98].mxu1 }
 0x2d0   :  { %v1250_v48 = vmax.f32 %v1242_v21, %v1117_v47  ;;  %v1119_v49 = vpop.f32.mrb[99].mxu1 }
 0x2d5   :  { %v1122_v50 = vpop.f32.mrb[100].mxu1 }
 0x2d6   :  { %v1251_v51 = vmax.f32 %v1243_v25, %v1122_v50  ;;  %v1124_v52 = vpop.f32.mrb[101].mxu1 }
 0x2d7   :  { %v1125_v53 = vpop.f32.mrb[102].mxu1 }
 0x2d8   :  { %v1252_v54 = vmax.f32 %v1244_v28, %v1125_v53  ;;  %v1127_v55 = vpop.f32.mrb[103].mxu1 }
 0x2dd   :  { %v1130_v56 = vpop.f32.mrb[104].mxu1 }
 0x2de   :  { %v1253_v57 = vmax.f32 %v1245_v33, %v1130_v56  ;;  %v1132_v58 = vpop.f32.mrb[105].mxu1 }
 0x2df   :  { %v1133_v59 = vpop.f32.mrb[106].mxu1 }
 0x2e0   :  { %v1254_v60 = vmax.f32 %v1246_v36, %v1133_v59  ;;  %v1135_v61 = vpop.f32.mrb[107].mxu1 }
 0x2e5   :  { %v1138_v62 = vpop.f32.mrb[108].mxu1 }
 0x2e6   :  { %v1255_v63 = vmax.f32 %v1247_v39, %v1138_v62  ;;  %v1140_v0 = vpop.f32.mrb[109].mxu1 }
 0x2e7   :  { %v1141_v1 = vpop.f32.mrb[110].mxu1  ;;  %v9522_v0 = vld [vmem:[%s10783_s2 + $0x20] sm:$0xff]  }
 0x2e8   :  { %v1256_v2 = vmax.f32 %v1248_v42, %v1141_v1  ;;  %v1143_v3 = vpop.f32.mrb[111].mxu1 }
 0x2ed   :  { %v1146_v4 = vpop.f32.mrb[112].mxu1 }
 0x2ee   :  { %v1257_v5 = vmax.f32 %v1249_v45, %v1146_v4  ;;  %v1148_v6 = vpop.f32.mrb[113].mxu1 }
 0x2ef   :  { %v1149_v7 = vpop.f32.mrb[114].mxu1 }
 0x2f0   :  { %v1258_v8 = vmax.f32 %v1250_v48, %v1149_v7  ;;  %v1151_v9 = vpop.f32.mrb[115].mxu1 }
 0x2f5   :  { %v1154_v10 = vpop.f32.mrb[116].mxu1 }
 0x2f6   :  { %v1259_v11 = vmax.f32 %v1251_v51, %v1154_v10  ;;  %v1156_v12 = vpop.f32.mrb[117].mxu1 }
 0x2f7   :  { %v1157_v13 = vpop.f32.mrb[118].mxu1  ;;  %v9586_v12 = vld [vmem:[%s10783_s2 + $0x30] sm:$0xff]  }
 0x2f8   :  { %v1260_v14 = vmax.f32 %v1252_v54, %v1157_v13  ;;  %v1159_v15 = vpop.f32.mrb[119].mxu1  ;;  %v9598_v13 = vld [vmem:[%s10783_s2 + $0x38] sm:$0xff]  }
 0x2f9   :  { %v9614_v15 = vld [vmem:[%s10783_s2 + $0x8] sm:$0xff]  }
 0x2fd   :  { %v1162_v16 = vpop.f32.mrb[120].mxu1 }
 0x2fe   :  { %v1261_v17 = vmax.f32 %v1253_v57, %v1162_v16  ;;  %v1164_v18 = vpop.f32.mrb[121].mxu1 }
 0x2ff   :  { %v1165_v19 = vpop.f32.mrb[122].mxu1 }
 0x300   :  { %v1262_v31 = vmax.f32 %v1254_v60, %v1165_v19  ;;  %v1167_v20 = vpop.f32.mrb[123].mxu1  ;;  %v9629_v19 = vld [vmem:[%s10783_s2 + $0x18] sm:$0xff]  }
 0x301   :  { %v9634_v20 = vld [vmem:[%s10783_s2 + $0x40] sm:$0xff]  }
 0x305   :  { %v1170_v21 = vpop.f32.mrb[124].mxu1 }
 0x306   :  { %v1263_v22 = vmax.f32 %v1255_v63, %v1170_v21  ;;  %v1172_v23 = vpop.f32.mrb[125].mxu1 }
 0x307   :  { %v1173_v25 = vpop.f32.mrb[126].mxu1 }
 0x308   :  { %v1264_v26 = vmax.f32 %v1256_v2, %v1173_v25  ;;  %v1175_v27 = vpop.f32.mrb[127].mxu1  ;;  %v9648_v25 = vld [vmem:[%s10783_s2 + $0x50] sm:$0xff]  }
 0x309   :  { %v9657_v27 = vld [vmem:[%s10783_s2 + $0x58] sm:$0xff]  }
 0x30d   :  { %v1178_v28 = vpop.f32.mrb[128].mxu1 }
 0x30e   :  { %v1265_v29 = vmax.f32 %v1257_v5, %v1178_v28  ;;  %v1180_v32 = vpop.f32.mrb[129].mxu1 }
 0x30f   :  { %v1181_v33 = vpop.f32.mrb[130].mxu1 }
 0x310   :  { %v1266_v34 = vmax.f32 %v1258_v8, %v1181_v33  ;;  %v1183_v35 = vpop.f32.mrb[131].mxu1  ;;  %v9671_v33 = vld [vmem:[%s10783_s2 + $0x68] sm:$0xff]  }
 0x311   :  { %v9676_v35 = vld [vmem:[%s10783_s2 + $0x70] sm:$0xff]  }
 0x312   :  { %v1277_v36 = vpack.c.bf16 %v1266_v34, %v1265_v29  ;;  %v9662_v29 = vld [vmem:[%s10783_s2 + $0x60] sm:$0xff]  }
 0x314   :  { %7924 = vmatprep.mubr.msk.bf16.mxu0 %vm1281_vm3, %v1277_v36 }
 0x315   :  { %v1186_v37 = vpop.f32.mrb[132].mxu1 }
 0x316   :  { %v1267_v38 = vmax.f32 %v1259_v11, %v1186_v37  ;;  %v1188_v39 = vpop.f32.mrb[133].mxu1  ;;  %v9581_v11 = vld [vmem:[%s10783_s2 + $0x28] sm:$0xff]   ;;  %v9685_v37 = vld [vmem:[%s10783_s2 + $0x78] sm:$0xff]  }
 0x317   :  { %v1189_v40 = vpop.f32.mrb[134].mxu1  ;;  %v9690_v39 = vld [vmem:[%s10783_s2 + $0x80] sm:$0xff]  }
 0x318   :  { %v1268_v41 = vmax.f32 %v1260_v14, %v1189_v40  ;;  %v1191_v42 = vpop.f32.mrb[135].mxu1  ;;  %v9604_v14 = vld [vmem:[%s10783_s2] sm:$0xff]  }
 0x31a   :  { %v1278_v43 = vpack.c.bf16 %v1268_v41, %v1267_v38  ;;  %v9699_v41 = vld [vmem:[%s10783_s2 + $0x88] sm:$0xff]  }
 0x31c   :  { %7925 = vmatmul.mubr.msk.bf16.vlgmr.msra.gmra.mrb[32].mxu0 %vm1281_vm3, %v1278_v43  ;;  %v9704_v43 = vld [vmem:[%s10783_s2 + $0x90] sm:$0xff]  }
 0x31d   :  { %v1194_v44 = vpop.f32.mrb[136].mxu1 }
 0x31e   :  { %v1269_v45 = vmax.f32 %v1261_v17, %v1194_v44  ;;  %v1196_v46 = vpop.f32.mrb[137].mxu1  ;;  %v9620_v17 = vld [vmem:[%s10783_s2 + $0x10] sm:$0xff]  }
 0x31f   :  { %v1197_v47 = vpop.f32.mrb[138].mxu1 }
 0x320   :  { %v1270_v48 = vmax.f32 %v1262_v31, %v1197_v47  ;;  %v1199_v49 = vpop.f32.mrb[139].mxu1  ;;  %v9718_v47 = vld [vmem:[%s10783_s2 + $0xa0] sm:$0xff]  }
 0x321   :  { %v9727_v49 = vld [vmem:[%s10783_s2 + $0xa8] sm:$0xff]  }
 0x322   :  { %v1279_v50 = vpack.c.bf16 %v1270_v48, %v1269_v45  ;;  %v9713_v45 = vld [vmem:[%s10783_s2 + $0x98] sm:$0xff]  }
 0x324   :  { %7928 = vmatprep.mubr.msk.bf16.mxu0 %vm1281_vm3, %v1279_v50 }
 0x325   :  { %v1202_v51 = vpop.f32.mrb[140].mxu1 }
 0x326   :  { %v1271_v52 = vmax.f32 %v1263_v22, %v1202_v51  ;;  %v1204_v53 = vpop.f32.mrb[141].mxu1  ;;  %v9643_v22 = vld [vmem:[%s10783_s2 + $0x48] sm:$0xff]   ;;  %v9732_v51 = vld [vmem:[%s10783_s2 + $0xb0] sm:$0xff]  }
 0x327   :  { %v1205_v54 = vpop.f32.mrb[142].mxu1  ;;  %v9741_v53 = vld [vmem:[%s10783_s2 + $0xb8] sm:$0xff]  }
 0x328   :  { %v1272_v55 = vmax.f32 %v1264_v26, %v1205_v54  ;;  %v1207_v56 = vpop.f32.mrb[143].mxu1 }
 0x32a   :  { %v1280_v57 = vpack.c.bf16 %v1272_v55, %v1271_v52  ;;  %v9746_v55 = vld [vmem:[%s10783_s2 + $0xc0] sm:$0xff]  }
 0x32c   :  { %7929 = vmatmul.mubr.msk.bf16.gmra.mrb[36].mxu0 %vm1281_vm3, %v1280_v57  ;;  %v9755_v57 = vld [vmem:[%s10783_s2 + $0xc8] sm:$0xff]  }
 0x32d   :  { %7940 = vmatprep.mubr.msk.bf16.mxu0 %vm1420_vm4, %v9522_v0 }
 0x3ef   :  { %v7926_v58 = vpop.f32.mrb[32].mxu0 }
 0x3f0   :  { %v1332_v59 = vpop.f32.mrb[33].mxu0 }
 0x3f1   :  { %v7927_v60 = vpop.f32.mrb[34].mxu0 }
 0x3f2   :  { %v9509_v61 = vpack.c.bf16 %v7927_v60, %v7926_v58  ;;  %v1335_v62 = vpop.f32.mrb[35].mxu0 }
 0x3f3   :  { %v9511_v63 = vpack.c.bf16 %v1335_v62, %v1332_v59  ;;  %v9760_v59 = vld [vmem:[%s10783_s2 + $0xd0] sm:$0xff]  }
 0x3f5   :  { %1408 = vrot.lane.b32.xlu0 %v9511_v63, %s9066_s16 }
 0x3f9   :  { %1410 = vrot.lane.b32.xlu0 %v9509_v61, %s9066_s16 }
 0x3fd   :  { %1624 = vrot.lane.b32.xlu0 %v9511_v63, %s9067_s17 }
 0x3ff   :  { %v7930_v1 = vpop.f32.mrb[36].mxu0 }
 0x400   :  { %v1348_v2 = vpop.f32.mrb[37].mxu0 }
 0x401   :  { %v7931_v3 = vpop.f32.mrb[38].mxu0 }
 0x402   :  { %v9526_v4 = vpack.c.bf16 %v7931_v3, %v7930_v1  ;;  %v1351_v5 = vpop.f32.mrb[39].mxu0 }
 0x403   :  { %v1373_v6 = vpack.c.bf16 %v1351_v5, %v1348_v2  ;;  %v9783_v2 = vld [vmem:[%s10783_s2 + $0xe8] sm:$0xff]  }
 0x405   :  { %1628 = vrot.lane.b32.xlu0 %v1373_v6, %s9067_s17  ;;  %1412 = vrot.lane.b32.xlu1 %v1373_v6, %s9066_s16 }
 0x409   :  { %1750 = vrot.lane.b32.xlu0 %v9511_v63, %s9068_s20  ;;  %1414 = vrot.lane.b32.xlu1 %v9526_v4, %s9066_s16 }
 0x40d   :  { %1754 = vrot.lane.b32.xlu0 %v1373_v6, %s9068_s20  ;;  %1626 = vrot.lane.b32.xlu1 %v9509_v61, %s9067_s17 }
 0x411   :  { %1876 = vrot.lane.b32.xlu0 %v9511_v63, %s9069_s21  ;;  %1630 = vrot.lane.b32.xlu1 %v9526_v4, %s9067_s17 }
 0x415   :  { %1880 = vrot.lane.b32.xlu0 %v1373_v6, %s9069_s21  ;;  %1752 = vrot.lane.b32.xlu1 %v9509_v61, %s9068_s20 }
 0x419   :  { %2002 = vrot.lane.b32.xlu0 %v9511_v63, %s9070_s22  ;;  %1756 = vrot.lane.b32.xlu1 %v9526_v4, %s9068_s20 }
 0x41d   :  { %2006 = vrot.lane.b32.xlu0 %v1373_v6, %s9070_s22  ;;  %1878 = vrot.lane.b32.xlu1 %v9509_v61, %s9069_s21 }
 0x421   :  { %2128 = vrot.lane.b32.xlu0 %v9511_v63, %s9071_s0  ;;  %1882 = vrot.lane.b32.xlu1 %v9526_v4, %s9069_s21 }
 0x425   :  { %2132 = vrot.lane.b32.xlu0 %v1373_v6, %s9071_s0  ;;  %2004 = vrot.lane.b32.xlu1 %v9509_v61, %s9070_s22 }
 0x429   :  { %2254 = vrot.lane.b32.xlu0 %v9511_v63, %s9072_s23  ;;  %2008 = vrot.lane.b32.xlu1 %v9526_v4, %s9070_s22 }
 0x42d   :  { %2258 = vrot.lane.b32.xlu0 %v1373_v6, %s9072_s23  ;;  %2130 = vrot.lane.b32.xlu1 %v9509_v61, %s9071_s0 }
 0x431   :  { %2380 = vrot.lane.b32.xlu0 %v9511_v63, %s9073_s24  ;;  %2134 = vrot.lane.b32.xlu1 %v9526_v4, %s9071_s0 }
 0x435   :  { %2384 = vrot.lane.b32.xlu0 %v1373_v6, %s9073_s24  ;;  %2256 = vrot.lane.b32.xlu1 %v9509_v61, %s9072_s23 }
 0x439   :  { %2260 = vrot.lane.b32.xlu1 %v9526_v4, %s9072_s23 }
 0x43d   :  { %2382 = vrot.lane.b32.xlu1 %v9509_v61, %s9073_s24 }
 0x441   :  { %2386 = vrot.lane.b32.xlu1 %v9526_v4, %s9073_s24 }
 0x467   :  { %v1409_v7 = vpop.permute.xlu0 %1408 }
 0x468   :  { %7932 = vmatprep.subr.bf16.mxu0 %v1409_v7 }
 0x469   :  { %7933 = vmatpush3.bf16.msra.mxu0 %v1409_v7 }
 0x46b   :  { %v1411_v8 = vpop.permute.xlu0 %1410 }
 0x46c   :  { %7934 = vmatprep.subr.bf16.mxu0 %v1411_v8 }
 0x46d   :  { %7935 = vmatpush3.bf16.msra.mxu0 %v1411_v8  ;;  %v9802_v8 = vld [vmem:[%s10783_s2 + $0x100] sm:$0xff]  }
 0x46f   :  { %v1625_v16 = vpop.permute.xlu0 %1624 }
 0x477   :  { %v1413_v9 = vpop.permute.xlu1 %1412  ;;  %v1629_v31 = vpop.permute.xlu0 %1628 }
 0x478   :  { %7936 = vmatprep.subr.bf16.mxu0 %v1413_v9 }
 0x479   :  { %7937 = vmatpush3.bf16.msra.mxu0 %v1413_v9 }
 0x47b   :  { %v1415_v10 = vpop.permute.xlu1 %1414  ;;  %v1751_v23 = vpop.permute.xlu0 %1750 }
 0x47c   :  { %7938 = vmatprep.subr.bf16.mxu0 %v1415_v10 }
 0x47d   :  { %7939 = vmatpush3.bf16.msra.mxu0 %v1415_v10  ;;  %v9811_v10 = vld [vmem:[%s10783_s2 + $0x108] sm:$0xff]  }
 0x47e   :  { %7948 = vmatprep.subr.bf16.mxu0 %v9511_v63 }
 0x47f   :  { %v1627_v18 = vpop.permute.xlu1 %1626  ;;  %v1755_v28 = vpop.permute.xlu0 %1754 }
 0x480   :  { %7941 = vmatmul.mubr.msk.bf16.vlgmr.msra.gmra.mrb[40].mxu0 %vm1420_vm4, %v9581_v11 }
 0x481   :  { %7949 = vmatpush3.bf16.msra.mxu0 %v9511_v63  ;;  %7944 = vmatprep.mubr.msk.bf16.mxu0 %vm1420_vm4, %v9586_v12  ;;  %v9774_v63 = vld [vmem:[%s10783_s2 + $0xe0] sm:$0xff]  }
 0x482   :  { %7950 = vmatprep.subr.bf16.mxu0 %v9509_v61 }
 0x483   :  { %v1631_v21 = vpop.permute.xlu1 %1630  ;;  %v1877_v34 = vpop.permute.xlu0 %1876 }
 0x485   :  { %7951 = vmatpush3.bf16.msra.mxu0 %v9509_v61  ;;  %v9769_v61 = vld [vmem:[%s10783_s2 + $0xd8] sm:$0xff]  }
 0x486   :  { %7952 = vmatprep.subr.bf16.mxu0 %v1373_v6 }
 0x487   :  { %v1753_v26 = vpop.permute.xlu1 %1752  ;;  %v1881_v38 = vpop.permute.xlu0 %1880 }
 0x488   :  { %7945 = vmatmul.mubr.msk.bf16.gmra.mrb[44].mxu0 %vm1420_vm4, %v9598_v13 }
 0x489   :  { %7953 = vmatpush3.bf16.msra.mxu0 %v1373_v6  ;;  %7956 = vmatprep.mubr.msk.bf16.mxu0 %vm1420_vm4, %v9604_v14  ;;  %v9797_v6 = vld [vmem:[%s10783_s2 + $0xf8] sm:$0xff]  }
 0x48a   :  { %7954 = vmatprep.subr.bf16.mxu0 %v9526_v4 }
 0x48b   :  { %v1757_v32 = vpop.permute.xlu1 %1756  ;;  %v2003_v42 = vpop.permute.xlu0 %2002 }
 0x48d   :  { %7955 = vmatpush3.bf16.msra.mxu0 %v9526_v4  ;;  %v9788_v4 = vld [vmem:[%s10783_s2 + $0xf0] sm:$0xff]  }
 0x48e   :  { %7964 = vmatprep.subr.bf16.mxu0 %v1625_v16 }
 0x48f   :  { %v1879_v36 = vpop.permute.xlu1 %1878  ;;  %v2007_v46 = vpop.permute.xlu0 %2006 }
 0x490   :  { %7957 = vmatmul.mubr.msk.bf16.vlgmr.msra.gmra.mrb[40].mxu0 %vm1420_vm4, %v9614_v15 }
 0x491   :  { %7965 = vmatpush3.bf16.msra.mxu0 %v1625_v16  ;;  %7960 = vmatprep.mubr.msk.bf16.mxu0 %vm1420_vm4, %v9620_v17  ;;  %v9816_v16 = vld [vmem:[%s10783_s2 + $0x110] sm:$0xff]  }
 0x492   :  { %7966 = vmatprep.subr.bf16.mxu0 %v1627_v18 }
 0x493   :  { %v1883_v40 = vpop.permute.xlu1 %1882  ;;  %v2129_v50 = vpop.permute.xlu0 %2128 }
 0x495   :  { %7967 = vmatpush3.bf16.msra.mxu0 %v1627_v18  ;;  %v9825_v18 = vld [vmem:[%s10783_s2 + $0x118] sm:$0xff]  }
 0x496   :  { %7968 = vmatprep.subr.bf16.mxu0 %v1629_v31 }
 0x497   :  { %v2005_v44 = vpop.permute.xlu1 %2004  ;;  %v2133_v54 = vpop.permute.xlu0 %2132 }
 0x498   :  { %7961 = vmatmul.mubr.msk.bf16.gmra.mrb[44].mxu0 %vm1420_vm4, %v9629_v19 }
 0x499   :  { %7969 = vmatpush3.bf16.msra.mxu0 %v1629_v31  ;;  %7972 = vmatprep.mubr.msk.bf16.mxu0 %vm1420_vm4, %v9634_v20  ;;  %v1275_v31 = vld [vmem:[%s10780_s5 + $0x80] sm:$0x7] }
 0x49a   :  { %7970 = vmatprep.subr.bf16.mxu0 %v1631_v21 }
 0x49b   :  { %v2009_v48 = vpop.permute.xlu1 %2008  ;;  %v2255_v58 = vpop.permute.xlu0 %2254 }
 0x49d   :  { %7971 = vmatpush3.bf16.msra.mxu0 %v1631_v21  ;;  %v2515_v21 = vsel %vm1294_vm2, %v1275_v31, 0 }
 0x49e   :  { %7980 = vmatprep.subr.bf16.mxu0 %v1751_v23 }
 0x49f   :  { %v2131_v52 = vpop.permute.xlu1 %2130  ;;  %v2259_v62 = vpop.permute.xlu0 %2258 }
 0x4a0   :  { %7973 = vmatmul.mubr.msk.bf16.vlgmr.msra.gmra.mrb[40].mxu0 %vm1420_vm4, %v9643_v22 }
 0x4a1   :  { %7981 = vmatpush3.bf16.msra.mxu0 %v1751_v23  ;;  %7976 = vmatprep.mubr.msk.bf16.mxu0 %vm1420_vm4, %v9648_v25  ;;  %v1274_v23 = vld [vmem:[%s10780_s5 + $0x78] sm:$0x1] }
 0x4a2   :  { %7982 = vmatprep.subr.bf16.mxu0 %v1753_v26 }
 0x4a3   :  { %v2135_v56 = vpop.permute.xlu1 %2134  ;;  %v2381_v3 = vpop.permute.xlu0 %2380 }
 0x4a5   :  { %7983 = vmatpush3.bf16.msra.mxu0 %v1753_v26  ;;  %v2477_v26 = vunpack.c.l.bf16 %v1274_v23 }
 0x4a6   :  { %7984 = vmatprep.subr.bf16.mxu0 %v1755_v28 }
 0x4a7   :  { %v2257_v60 = vpop.permute.xlu1 %2256  ;;  %v2385_v7 = vpop.permute.xlu0 %2384 }
 0x4a8   :  { %7977 = vmatmul.mubr.msk.bf16.gmra.mrb[44].mxu0 %vm1420_vm4, %v9657_v27 }
 0x4a9   :  { %7985 = vmatpush3.bf16.msra.mxu0 %v1755_v28  ;;  %7988 = vmatprep.mubr.msk.bf16.mxu0 %vm1420_vm4, %v9662_v29  ;;  %v2481_v28 = vrot.slane %v2477_v26, %v9211_v30 }
 0x4aa   :  { %7986 = vmatprep.subr.bf16.mxu0 %v1757_v32 }
 0x4ab   :  { %v2261_v1 = vpop.permute.xlu1 %2260 }
 0x4ad   :  { %7987 = vmatpush3.bf16.msra.mxu0 %v1757_v32 }
 0x4ae   :  { %7996 = vmatprep.subr.bf16.mxu0 %v1877_v34 }
 0x4af   :  { %v2383_v5 = vpop.permute.xlu1 %2382 }
 0x4b0   :  { %7989 = vmatmul.mubr.msk.bf16.vlgmr.msra.gmra.mrb[40].mxu0 %vm1420_vm4, %v9671_v33 }
 0x4b1   :  { %7997 = vmatpush3.bf16.msra.mxu0 %v1877_v34  ;;  %7992 = vmatprep.mubr.msk.bf16.mxu0 %vm1420_vm4, %v9676_v35 }
 0x4b2   :  { %7998 = vmatprep.subr.bf16.mxu0 %v1879_v36 }
 0x4b3   :  { %v2387_v9 = vpop.permute.xlu1 %2386 }
 0x4b5   :  { %7999 = vmatpush3.bf16.msra.mxu0 %v1879_v36 }
 0x4b6   :  { %8000 = vmatprep.subr.bf16.mxu0 %v1881_v38 }
 0x4b8   :  { %7993 = vmatmul.mubr.msk.bf16.gmra.mrb[44].mxu0 %vm1420_vm4, %v9685_v37 }
 0x4b9   :  { %8001 = vmatpush3.bf16.msra.mxu0 %v1881_v38  ;;  %8004 = vmatprep.mubr.msk.bf16.mxu0 %vm1420_vm4, %v9690_v39 }
 0x4ba   :  { %8002 = vmatprep.subr.bf16.mxu0 %v1883_v40 }
 0x4bd   :  { %8003 = vmatpush3.bf16.msra.mxu0 %v1883_v40 }
 0x4be   :  { %8012 = vmatprep.subr.bf16.mxu0 %v2003_v42 }
 0x4c0   :  { %8005 = vmatmul.mubr.msk.bf16.vlgmr.msra.gmra.mrb[40].mxu0 %vm1420_vm4, %v9699_v41 }
 0x4c1   :  { %8013 = vmatpush3.bf16.msra.mxu0 %v2003_v42  ;;  %8008 = vmatprep.mubr.msk.bf16.mxu0 %vm1420_vm4, %v9704_v43 }
 0x4c2   :  { %8014 = vmatprep.subr.bf16.mxu0 %v2005_v44 }
 0x4c5   :  { %8015 = vmatpush3.bf16.msra.mxu0 %v2005_v44 }
 0x4c6   :  { %8016 = vmatprep.subr.bf16.mxu0 %v2007_v46 }
 0x4c8   :  { %8009 = vmatmul.mubr.msk.bf16.gmra.mrb[44].mxu0 %vm1420_vm4, %v9713_v45 }
 0x4c9   :  { %8017 = vmatpush3.bf16.msra.mxu0 %v2007_v46  ;;  %8020 = vmatprep.mubr.msk.bf16.mxu0 %vm1420_vm4, %v9718_v47 }
 0x4ca   :  { %8018 = vmatprep.subr.bf16.mxu0 %v2009_v48 }
 0x4cd   :  { %8019 = vmatpush3.bf16.msra.mxu0 %v2009_v48 }
 0x4ce   :  { %8028 = vmatprep.subr.bf16.mxu0 %v2129_v50 }
 0x4d0   :  { %8021 = vmatmul.mubr.msk.bf16.vlgmr.msra.gmra.mrb[40].mxu0 %vm1420_vm4, %v9727_v49 }
 0x4d1   :  { %8029 = vmatpush3.bf16.msra.mxu0 %v2129_v50  ;;  %8024 = vmatprep.mubr.msk.bf16.mxu0 %vm1420_vm4, %v9732_v51 }
 0x4d2   :  { %8030 = vmatprep.subr.bf16.mxu0 %v2131_v52 }
 0x4d5   :  { %8031 = vmatpush3.bf16.msra.mxu0 %v2131_v52 }
 0x4d6   :  { %8032 = vmatprep.subr.bf16.mxu0 %v2133_v54 }
 0x4d8   :  { %8025 = vmatmul.mubr.msk.bf16.gmra.mrb[44].mxu0 %vm1420_vm4, %v9741_v53 }
 0x4d9   :  { %8033 = vmatpush3.bf16.msra.mxu0 %v2133_v54  ;;  %8036 = vmatprep.mubr.msk.bf16.mxu0 %vm1420_vm4, %v9746_v55 }
 0x4da   :  { %8034 = vmatprep.subr.bf16.mxu0 %v2135_v56 }
 0x4dd   :  { %8035 = vmatpush3.bf16.msra.mxu0 %v2135_v56 }
 0x4de   :  { %8044 = vmatprep.subr.bf16.mxu0 %v2255_v58 }
 0x4e0   :  { %8037 = vmatmul.mubr.msk.bf16.vlgmr.msra.gmra.mrb[40].mxu0 %vm1420_vm4, %v9755_v57 }
 0x4e1   :  { %8045 = vmatpush3.bf16.msra.mxu0 %v2255_v58  ;;  %8040 = vmatprep.mubr.msk.bf16.mxu0 %vm1420_vm4, %v9760_v59 }
 0x4e2   :  { %8046 = vmatprep.subr.bf16.mxu0 %v2257_v60 }
 0x4e5   :  { %8047 = vmatpush3.bf16.msra.mxu0 %v2257_v60 }
 0x4e6   :  { %8048 = vmatprep.subr.bf16.mxu0 %v2259_v62 }
 0x4e8   :  { %8041 = vmatmul.mubr.msk.bf16.gmra.mrb[44].mxu0 %vm1420_vm4, %v9769_v61 }
 0x4e9   :  { %8049 = vmatpush3.bf16.msra.mxu0 %v2259_v62  ;;  %8052 = vmatprep.mubr.msk.bf16.mxu0 %vm1420_vm4, %v9774_v63 }
 0x4ea   :  { %8050 = vmatprep.subr.bf16.mxu0 %v2261_v1 }
 0x4ed   :  { %8051 = vmatpush3.bf16.msra.mxu0 %v2261_v1 }
 0x4ee   :  { %8060 = vmatprep.subr.bf16.mxu0 %v2381_v3 }
 0x4f0   :  { %8053 = vmatmul.mubr.msk.bf16.vlgmr.msra.gmra.mrb[40].mxu0 %vm1420_vm4, %v9783_v2 }
 0x4f1   :  { %8061 = vmatpush3.bf16.msra.mxu0 %v2381_v3  ;;  %8056 = vmatprep.mubr.msk.bf16.mxu0 %vm1420_vm4, %v9788_v4 }
 0x4f2   :  { %8062 = vmatprep.subr.bf16.mxu0 %v2383_v5 }
 0x4f5   :  { %8063 = vmatpush3.bf16.msra.mxu0 %v2383_v5 }
 0x4f6   :  { %8064 = vmatprep.subr.bf16.mxu0 %v2385_v7 }
 0x4f8   :  { %8057 = vmatmul.mubr.msk.bf16.gmra.mrb[44].mxu0 %vm1420_vm4, %v9797_v6 }
 0x4f9   :  { %8065 = vmatpush3.bf16.msra.mxu0 %v2385_v7  ;;  %8068 = vmatprep.mubr.msk.bf16.mxu0 %vm1420_vm4, %v9802_v8 }
 0x4fa   :  { %8066 = vmatprep.subr.bf16.mxu0 %v2387_v9 }
 0x4fd   :  { %8067 = vmatpush3.bf16.msra.mxu0 %v2387_v9 }
 0x4fe   :  { %8802 = vmatprep.subr.msk.bf16.mxu0 %vm1294_vm2, %v1275_v31 }
 0x500   :  { %8069 = vmatmul.mubr.msk.bf16.vlgmr.msra.gmra.mrb[40].mxu0 %vm1420_vm4, %v9811_v10 }
 0x501   :  { %8072 = vmatprep.mubr.msk.bf16.mxu0 %vm1420_vm4, %v9816_v16  ;;  %8077 = vmatpush3.bf16.msra.mxu0 %v2515_v21 }
 0x508   :  { %8073 = vmatmul.mubr.msk.bf16.gmra.mrb[44].mxu0 %vm1420_vm4, %v9825_v18 }
 0x5d3   :  { %v8070_v32 = vpop.f32.mrb[40].mxu0 }
 0x5d4   :  { %v2438_v34 = vpop.f32.mrb[41].mxu0  ;;  %v9840_v40 = vadd.f32 %v8070_v32, %v2481_v28 }
 0x5d5   :  { %v9838_v36 = vadd.f32 %v2481_v28, %v2438_v34  ;;  %v8071_v38 = vpop.f32.mrb[42].mxu0 }
 0x5d6   :  { %v9842_v42 = vadd.f32 %v8071_v38, %v2481_v28  ;;  %v2441_v44 = vpop.f32.mrb[43].mxu0  ;;  %v2492_v54 = vmax.f32 %v9840_v40, 0.0 }
 0x5d7   :  { %v9844_v46 = vadd.f32 %v2481_v28, %v2441_v44  ;;  %v2490_v50 = vmax.f32 %v9838_v36, 0.0 }
 0x5d8   :  { %v2493_v48 = vmax.f32 %v9842_v42, 0.0 }
 0x5d9   :  { %v2491_v52 = vmax.f32 %v9844_v46, 0.0 }
 0x5da   :  { %v2499_v60 = vpack.c.bf16 %v2493_v48, %v2492_v54 }
 0x5db   :  { %v2498_v56 = vpack.c.bf16 %v2491_v52, %v2490_v50  ;;  %v8074_v58 = vpop.f32.mrb[44].mxu0 }
 0x5dc   :  { %v2454_v62 = vpop.f32.mrb[45].mxu0  ;;  %v9861_v5 = vadd.f32 %v8074_v58, %v2481_v28 }
 0x5dd   :  { %v9858_v1 = vadd.f32 %v2481_v28, %v2454_v62  ;;  %v8075_v3 = vpop.f32.mrb[46].mxu0  ;;  %8078 = vmatprep.mubr.msk.bf16.mxu0 %vm1281_vm3, %v2498_v56 }
 0x5de   :  { %v9863_v7 = vadd.f32 %v8075_v3, %v2481_v28  ;;  %v2457_v9 = vpop.f32.mrb[47].mxu0  ;;  %8079 = vmatmul.mubr.msk.bf16.vlgmr.msra.gmra.mrb[48].mxu0 %vm1281_vm3, %v2499_v60  ;;  %v2496_v32 = vmax.f32 %v9861_v5, 0.0 }
 0x5df   :  { %v9866_v31 = vadd.f32 %v2481_v28, %v2457_v9  ;;  %v2494_v23 = vmax.f32 %v9858_v1, 0.0 }
 0x5e0   :  { %v10790_v21 = vmax.f32 %v9863_v7, 0.0 }
 0x5e1   :  { %v10789_v26 = vmax.f32 %v9866_v31, 0.0 }
 0x5e2   :  { %v2501_v38 = vpack.c.bf16 %v10790_v21, %v2496_v32 }
 0x5e3   :  { %v2500_v34 = vpack.c.bf16 %v10789_v26, %v2494_v23 }
 0x5e5   :  { %8082 = vmatprep.mubr.msk.bf16.mxu0 %vm1281_vm3, %v2500_v34 }
 0x5e6   :  { %8083 = vmatmul.mubr.msk.bf16.gmra.mrb[52].mxu0 %vm1281_vm3, %v2501_v38 }
 0x5e7   :  { %8094 = vmatprep.mubr.msk.bf16.mxu0 %vm1420_vm4, %v9522_v0 }
 0x6b1   :  { %v8080_v28 = vpop.f32.mrb[48].mxu0 }
 0x6b2   :  { %v2551_v44 = vpop.f32.mrb[49].mxu0 }
 0x6b3   :  { %v8081_v56 = vpop.f32.mrb[50].mxu0 }
 0x6b4   :  { %v2583_v58 = vpack.c.bf16 %v8081_v56, %v8080_v28  ;;  %v2554_v60 = vpop.f32.mrb[51].mxu0 }
 0x6b5   :  { %v2582_v62 = vpack.c.bf16 %v2554_v60, %v2551_v44 }
 0x6b6   :  { %2592 = vrot.lane.b32.xlu1 %v2583_v58, %s9066_s16 }
 0x6b7   :  { %2590 = vrot.lane.b32.xlu0 %v2582_v62, %s9066_s16 }
 0x6b9   :  { %v8084_v3 = vpop.f32.mrb[52].mxu0 }
 0x6ba   :  { %v2567_v9 = vpop.f32.mrb[53].mxu0 }
 0x6bb   :  { %v8085_v24 = vpop.f32.mrb[54].mxu0 }
 0x6bc   :  { %v2585_v26 = vpack.c.bf16 %v8085_v24, %v8084_v3  ;;  %v2570_v34 = vpop.f32.mrb[55].mxu0 }
 0x6bd   :  { %v2584_v21 = vpack.c.bf16 %v2570_v34, %v2567_v9 }
 0x6be   :  { %2596 = vrot.lane.b32.xlu1 %v2585_v26, %s9066_s16 }
 0x6bf   :  { %2594 = vrot.lane.b32.xlu0 %v2584_v21, %s9066_s16 }
 0x6c2   :  { %2734 = vrot.lane.b32.xlu1 %v2583_v58, %s9067_s17 }
 0x6c3   :  { %2732 = vrot.lane.b32.xlu0 %v2582_v62, %s9067_s17 }
 0x6c6   :  { %2738 = vrot.lane.b32.xlu1 %v2585_v26, %s9067_s17 }
 0x6c7   :  { %2736 = vrot.lane.b32.xlu0 %v2584_v21, %s9067_s17 }
 0x6ca   :  { %2819 = vrot.lane.b32.xlu1 %v2583_v58, %s9068_s20 }
 0x6cb   :  { %2817 = vrot.lane.b32.xlu0 %v2582_v62, %s9068_s20 }
 0x6ce   :  { %2823 = vrot.lane.b32.xlu1 %v2585_v26, %s9068_s20 }
 0x6cf   :  { %2821 = vrot.lane.b32.xlu0 %v2584_v21, %s9068_s20 }
 0x6d2   :  { %2904 = vrot.lane.b32.xlu1 %v2583_v58, %s9069_s21 }
 0x6d3   :  { %2902 = vrot.lane.b32.xlu0 %v2582_v62, %s9069_s21 }
 0x6d6   :  { %2908 = vrot.lane.b32.xlu1 %v2585_v26, %s9069_s21 }
 0x6d7   :  { %2906 = vrot.lane.b32.xlu0 %v2584_v21, %s9069_s21 }
 0x6da   :  { %2989 = vrot.lane.b32.xlu1 %v2583_v58, %s9070_s22 }
 0x6db   :  { %2987 = vrot.lane.b32.xlu0 %v2582_v62, %s9070_s22 }
 0x6de   :  { %2993 = vrot.lane.b32.xlu1 %v2585_v26, %s9070_s22 }
 0x6df   :  { %2991 = vrot.lane.b32.xlu0 %v2584_v21, %s9070_s22 }
 0x6e2   :  { %3074 = vrot.lane.b32.xlu1 %v2583_v58, %s9071_s0 }
 0x6e3   :  { %3072 = vrot.lane.b32.xlu0 %v2582_v62, %s9071_s0 }
 0x6e6   :  { %3078 = vrot.lane.b32.xlu1 %v2585_v26, %s9071_s0 }
 0x6e7   :  { %3076 = vrot.lane.b32.xlu0 %v2584_v21, %s9071_s0 }
 0x6ea   :  { %3159 = vrot.lane.b32.xlu1 %v2583_v58, %s9072_s23 }
 0x6eb   :  { %3157 = vrot.lane.b32.xlu0 %v2582_v62, %s9072_s23 }
 0x6ee   :  { %3163 = vrot.lane.b32.xlu1 %v2585_v26, %s9072_s23 }
 0x6ef   :  { %3161 = vrot.lane.b32.xlu0 %v2584_v21, %s9072_s23 }
 0x6f2   :  { %3244 = vrot.lane.b32.xlu1 %v2583_v58, %s9073_s24 }
 0x6f3   :  { %3242 = vrot.lane.b32.xlu0 %v2582_v62, %s9073_s24 }
 0x6f6   :  { %3248 = vrot.lane.b32.xlu1 %v2585_v26, %s9073_s24 }
 0x6f7   :  { %3246 = vrot.lane.b32.xlu0 %v2584_v21, %s9073_s24 }
 0x728   :  { %v2593_v0 = vpop.permute.xlu1 %2592 }
 0x729   :  { %v2591_v24 = vpop.permute.xlu0 %2590 }
 0x72a   :  { %8086 = vmatprep.subr.bf16.mxu0 %v2591_v24 }
 0x72b   :  { %8087 = vmatpush3.bf16.msra.mxu0 %v2591_v24 }
 0x72c   :  { %8088 = vmatprep.subr.bf16.mxu0 %v2593_v0 }
 0x72f   :  { %8089 = vmatpush3.bf16.msra.mxu0 %v2593_v0 }
 0x730   :  { %v2597_v28 = vpop.permute.xlu1 %2596 }
 0x731   :  { %v2595_v38 = vpop.permute.xlu0 %2594 }
 0x732   :  { %8090 = vmatprep.subr.bf16.mxu0 %v2595_v38 }
 0x733   :  { %8091 = vmatpush3.bf16.msra.mxu0 %v2595_v38 }
 0x734   :  { %8092 = vmatprep.subr.bf16.mxu0 %v2597_v28 }
 0x735   :  { %v2733_v44 = vpop.permute.xlu0 %2732 }
 0x737   :  { %8093 = vmatpush3.bf16.msra.mxu0 %v2597_v28 }
 0x738   :  { %8102 = vmatprep.subr.bf16.mxu0 %v2582_v62 }
 0x73a   :  { %8095 = vmatmul.mubr.msk.bf16.vlgmr.msra.gmra.mrb[56].mxu0 %vm1420_vm4, %v9581_v11  ;;  %v2735_v11 = vpop.permute.xlu1 %2734 }
 0x73b   :  { %8103 = vmatpush3.bf16.msra.mxu0 %v2582_v62  ;;  %8098 = vmatprep.mubr.msk.bf16.mxu0 %vm1420_vm4, %v9586_v12  ;;  %v2737_v12 = vpop.permute.xlu0 %2736 }
 0x73c   :  { %8104 = vmatprep.subr.bf16.mxu0 %v2583_v58 }
 0x73f   :  { %8105 = vmatpush3.bf16.msra.mxu0 %v2583_v58 }
 0x740   :  { %8106 = vmatprep.subr.bf16.mxu0 %v2584_v21 }
 0x742   :  { %8099 = vmatmul.mubr.msk.bf16.gmra.mrb[60].mxu0 %vm1420_vm4, %v9598_v13  ;;  %v2739_v13 = vpop.permute.xlu1 %2738 }
 0x743   :  { %8107 = vmatpush3.bf16.msra.mxu0 %v2584_v21  ;;  %8110 = vmatprep.mubr.msk.bf16.mxu0 %vm1420_vm4, %v9604_v14  ;;  %v2818_v14 = vpop.permute.xlu0 %2817 }
 0x744   :  { %8108 = vmatprep.subr.bf16.mxu0 %v2585_v26 }
 0x747   :  { %8109 = vmatpush3.bf16.msra.mxu0 %v2585_v26 }
 0x748   :  { %8118 = vmatprep.subr.bf16.mxu0 %v2733_v44 }
 0x74a   :  { %8111 = vmatmul.mubr.msk.bf16.vlgmr.msra.gmra.mrb[56].mxu0 %vm1420_vm4, %v9614_v15  ;;  %v2820_v15 = vpop.permute.xlu1 %2819 }
 0x74b   :  { %8119 = vmatpush3.bf16.msra.mxu0 %v2733_v44  ;;  %8114 = vmatprep.mubr.msk.bf16.mxu0 %vm1420_vm4, %v9620_v17  ;;  %v2822_v17 = vpop.permute.xlu0 %2821 }
 0x74c   :  { %8120 = vmatprep.subr.bf16.mxu0 %v2735_v11 }
 0x74f   :  { %8121 = vmatpush3.bf16.msra.mxu0 %v2735_v11 }
 0x750   :  { %8122 = vmatprep.subr.bf16.mxu0 %v2737_v12 }
 0x752   :  { %8115 = vmatmul.mubr.msk.bf16.gmra.mrb[60].mxu0 %vm1420_vm4, %v9629_v19  ;;  %v2824_v19 = vpop.permute.xlu1 %2823 }
 0x753   :  { %8123 = vmatpush3.bf16.msra.mxu0 %v2737_v12  ;;  %8126 = vmatprep.mubr.msk.bf16.mxu0 %vm1420_vm4, %v9634_v20  ;;  %v2903_v20 = vpop.permute.xlu0 %2902 }
 0x754   :  { %8124 = vmatprep.subr.bf16.mxu0 %v2739_v13 }
 0x757   :  { %8125 = vmatpush3.bf16.msra.mxu0 %v2739_v13 }
 0x758   :  { %8134 = vmatprep.subr.bf16.mxu0 %v2818_v14 }
 0x75a   :  { %8127 = vmatmul.mubr.msk.bf16.vlgmr.msra.gmra.mrb[56].mxu0 %vm1420_vm4, %v9643_v22  ;;  %v2905_v22 = vpop.permute.xlu1 %2904 }
 0x75b   :  { %8135 = vmatpush3.bf16.msra.mxu0 %v2818_v14  ;;  %8130 = vmatprep.mubr.msk.bf16.mxu0 %vm1420_vm4, %v9648_v25  ;;  %v2907_v25 = vpop.permute.xlu0 %2906 }
 0x75c   :  { %8136 = vmatprep.subr.bf16.mxu0 %v2820_v15 }
 0x75f   :  { %8137 = vmatpush3.bf16.msra.mxu0 %v2820_v15  ;;  %v10792_v15 = vmax.f32 %v9866_v31, 0.0  ;;  %v3358_v31 = vld [vmem:[%s10780_s5 + $0x100] sm:$0x7] }
 0x760   :  { %8138 = vmatprep.subr.bf16.mxu0 %v2822_v17 }
 0x762   :  { %8131 = vmatmul.mubr.msk.bf16.gmra.mrb[60].mxu0 %vm1420_vm4, %v9657_v27  ;;  %v2909_v27 = vpop.permute.xlu1 %2908 }
 0x763   :  { %8139 = vmatpush3.bf16.msra.mxu0 %v2822_v17  ;;  %8142 = vmatprep.mubr.msk.bf16.mxu0 %vm1420_vm4, %v9662_v29  ;;  %v2988_v29 = vpop.permute.xlu0 %2987 }
 0x764   :  { %8140 = vmatprep.subr.bf16.mxu0 %v2824_v19 }
 0x767   :  { %8141 = vmatpush3.bf16.msra.mxu0 %v2824_v19 }
 0x768   :  { %8150 = vmatprep.subr.bf16.mxu0 %v2903_v20 }
 0x76a   :  { %8143 = vmatmul.mubr.msk.bf16.vlgmr.msra.gmra.mrb[56].mxu0 %vm1420_vm4, %v9671_v33  ;;  %v2990_v33 = vpop.permute.xlu1 %2989 }
 0x76b   :  { %8151 = vmatpush3.bf16.msra.mxu0 %v2903_v20  ;;  %8146 = vmatprep.mubr.msk.bf16.mxu0 %vm1420_vm4, %v9676_v35  ;;  %v2992_v35 = vpop.permute.xlu0 %2991 }
 0x76c   :  { %8152 = vmatprep.subr.bf16.mxu0 %v2905_v22 }
 0x76f   :  { %8153 = vmatpush3.bf16.msra.mxu0 %v2905_v22 }
 0x770   :  { %8154 = vmatprep.subr.bf16.mxu0 %v2907_v25 }
 0x772   :  { %8147 = vmatmul.mubr.msk.bf16.gmra.mrb[60].mxu0 %vm1420_vm4, %v9685_v37  ;;  %v2994_v37 = vpop.permute.xlu1 %2993 }
 0x773   :  { %8155 = vmatpush3.bf16.msra.mxu0 %v2907_v25  ;;  %8158 = vmatprep.mubr.msk.bf16.mxu0 %vm1420_vm4, %v9690_v39  ;;  %v3073_v39 = vpop.permute.xlu0 %3072 }
 0x774   :  { %8156 = vmatprep.subr.bf16.mxu0 %v2909_v27 }
 0x777   :  { %8157 = vmatpush3.bf16.msra.mxu0 %v2909_v27 }
 0x778   :  { %8166 = vmatprep.subr.bf16.mxu0 %v2988_v29 }
 0x77a   :  { %8159 = vmatmul.mubr.msk.bf16.vlgmr.msra.gmra.mrb[56].mxu0 %vm1420_vm4, %v9699_v41  ;;  %v3075_v41 = vpop.permute.xlu1 %3074 }
 0x77b   :  { %8167 = vmatpush3.bf16.msra.mxu0 %v2988_v29  ;;  %8162 = vmatprep.mubr.msk.bf16.mxu0 %vm1420_vm4, %v9704_v43  ;;  %v3077_v43 = vpop.permute.xlu0 %3076 }
 0x77c   :  { %8168 = vmatprep.subr.bf16.mxu0 %v2990_v33 }
 0x77f   :  { %8169 = vmatpush3.bf16.msra.mxu0 %v2990_v33 }
 0x780   :  { %8170 = vmatprep.subr.bf16.mxu0 %v2992_v35 }
 0x782   :  { %8163 = vmatmul.mubr.msk.bf16.gmra.mrb[60].mxu0 %vm1420_vm4, %v9713_v45  ;;  %v3079_v45 = vpop.permute.xlu1 %3078 }
 0x783   :  { %8171 = vmatpush3.bf16.msra.mxu0 %v2992_v35  ;;  %8174 = vmatprep.mubr.msk.bf16.mxu0 %vm1420_vm4, %v9718_v47  ;;  %v3158_v47 = vpop.permute.xlu0 %3157 }
 0x784   :  { %8172 = vmatprep.subr.bf16.mxu0 %v2994_v37 }
 0x787   :  { %8173 = vmatpush3.bf16.msra.mxu0 %v2994_v37  ;;  %v8990_v37 = vld [vmem:[%s10780_s5 + $0x90] ss:$8 sps:$4 sm:$0x3f]  }
 0x788   :  { %8182 = vmatprep.subr.bf16.mxu0 %v3073_v39 }
 0x78a   :  { %8175 = vmatmul.mubr.msk.bf16.vlgmr.msra.gmra.mrb[56].mxu0 %vm1420_vm4, %v9727_v49  ;;  %v3160_v49 = vpop.permute.xlu1 %3159 }
 0x78b   :  { %8183 = vmatpush3.bf16.msra.mxu0 %v3073_v39  ;;  %8178 = vmatprep.mubr.msk.bf16.mxu0 %vm1420_vm4, %v9732_v51  ;;  %v3162_v51 = vpop.permute.xlu0 %3161  ;;  %v3484_v39 = vsel %vm3482_vm6, %v8990_v37, 0 }
 0x78c   :  { %8184 = vmatprep.subr.bf16.mxu0 %v3075_v41 }
 0x78f   :  { %8185 = vmatpush3.bf16.msra.mxu0 %v3075_v41  ;;  %v3359_v41 = vld [vmem:[%s10780_s5 + $0x108] sm:$0x1] }
 0x790   :  { %8186 = vmatprep.subr.bf16.mxu0 %v3077_v43 }
 0x792   :  { %8179 = vmatmul.mubr.msk.bf16.gmra.mrb[60].mxu0 %vm1420_vm4, %v9741_v53  ;;  %v3164_v53 = vpop.permute.xlu1 %3163 }
 0x793   :  { %8187 = vmatpush3.bf16.msra.mxu0 %v3077_v43  ;;  %8190 = vmatprep.mubr.msk.bf16.mxu0 %vm1420_vm4, %v9746_v55  ;;  %v3243_v55 = vpop.permute.xlu0 %3242  ;;  %v3414_v43 = vunpack.c.l.bf16 %v3359_v41 }
 0x794   :  { %8188 = vmatprep.subr.bf16.mxu0 %v3079_v45 }
 0x797   :  { %8189 = vmatpush3.bf16.msra.mxu0 %v3079_v45  ;;  %v3418_v45 = vrot.slane %v3414_v43, %v9211_v30 }
 0x798   :  { %8198 = vmatprep.subr.bf16.mxu0 %v3158_v47 }
 0x79a   :  { %8191 = vmatmul.mubr.msk.bf16.vlgmr.msra.gmra.mrb[56].mxu0 %vm1420_vm4, %v9755_v57  ;;  %v3245_v57 = vpop.permute.xlu1 %3244 }
 0x79b   :  { %8199 = vmatpush3.bf16.msra.mxu0 %v3158_v47  ;;  %8194 = vmatprep.mubr.msk.bf16.mxu0 %vm1420_vm4, %v9760_v59  ;;  %v3247_v59 = vpop.permute.xlu0 %3246 }
 0x79c   :  { %8200 = vmatprep.subr.bf16.mxu0 %v3160_v49 }
 0x79f   :  { %8201 = vmatpush3.bf16.msra.mxu0 %v3160_v49 }
 0x7a0   :  { %8202 = vmatprep.subr.bf16.mxu0 %v3162_v51 }
 0x7a2   :  { %8195 = vmatmul.mubr.msk.bf16.gmra.mrb[60].mxu0 %vm1420_vm4, %v9769_v61  ;;  %v3249_v61 = vpop.permute.xlu1 %3248 }
 0x7a3   :  { %8203 = vmatpush3.bf16.msra.mxu0 %v3162_v51  ;;  %8206 = vmatprep.mubr.msk.bf16.mxu0 %vm1420_vm4, %v9774_v63  ;;  %v9074_v63 = vmov 0.0  }
 0x7a4   :  { %8204 = vmatprep.subr.bf16.mxu0 %v3164_v53  ;;  %8230 = vmatprep.subr.bf16.mxu1 %v9074_v63 }
 0x7a5   :  { %8238 = vmatprep.mubr.msk.bf16.mxu1 %vm9075_vm5, %v9074_v63 }
 0x7a7   :  { %8205 = vmatpush3.bf16.msra.mxu0 %v3164_v53 }
 0x7a8   :  { %8214 = vmatprep.subr.bf16.mxu0 %v3243_v55 }
 0x7aa   :  { %8207 = vmatmul.mubr.msk.bf16.vlgmr.msra.gmra.mrb[56].mxu0 %vm1420_vm4, %v9783_v2  ;;  %v1276_v2 = vld [vmem:[%s10780_s5 + $0x88] sm:$0x1] }
 0x7ab   :  { %8215 = vmatpush3.bf16.msra.mxu0 %v3243_v55  ;;  %8210 = vmatprep.mubr.msk.bf16.mxu0 %vm1420_vm4, %v9788_v4  ;;  %v3327_v4 = vunpack.c.l.bf16 %v1276_v2 }
 0x7ac   :  { %8216 = vmatprep.subr.bf16.mxu0 %v3245_v57 }
 0x7af   :  { %8217 = vmatpush3.bf16.msra.mxu0 %v3245_v57 }
 0x7b0   :  { %8218 = vmatprep.subr.bf16.mxu0 %v3247_v59 }
 0x7b2   :  { %8211 = vmatmul.mubr.msk.bf16.gmra.mrb[60].mxu0 %vm1420_vm4, %v9797_v6  ;;  %v3331_v6 = vrot.slane %v3327_v4, %v9211_v30 }
 0x7b3   :  { %8219 = vmatpush3.bf16.msra.mxu0 %v3247_v59  ;;  %8222 = vmatprep.mubr.msk.bf16.mxu0 %vm1420_vm4, %v9802_v8 }
 0x7b4   :  { %8220 = vmatprep.subr.bf16.mxu0 %v3249_v61 }
 0x7b7   :  { %8221 = vmatpush3.bf16.msra.mxu0 %v3249_v61 }
 0x7b8   :  { %8284 = vmatprep.subr.bf16.mxu0 %v9074_v63 }
 0x7ba   :  { %8223 = vmatmul.mubr.msk.bf16.vlgmr.msra.gmra.mrb[56].mxu0 %vm1420_vm4, %v9811_v10 }
 0x7bb   :  { %8226 = vmatprep.mubr.msk.bf16.mxu0 %vm1420_vm4, %v9816_v16 }
 0x7c2   :  { %8227 = vmatmul.mubr.msk.bf16.gmra.mrb[60].mxu0 %vm1420_vm4, %v9825_v18 }
 0x7c3   :  { %8286 = vmatprep.mubr.msk.bf16.mxu0 %vm9075_vm5, %v9074_v63 }
 0x88d   :  { %v8224_v8 = vpop.f32.mrb[56].mxu0 }
 0x88e   :  { %v3334_v10 = vadd.f32 %v8224_v8, %v3331_v6  ;;  %v3288_v16 = vpop.f32.mrb[57].mxu0 }
 0x88f   :  { %v3332_v18 = vadd.f32 %v3331_v6, %v3288_v16  ;;  %v8225_v21 = vpop.f32.mrb[58].mxu0  ;;  %v10053_v16 = vld [vmem:[%s10780_s5 + $0x158] ss:$8 sps:$4 sm:$0xff]  }
 0x890   :  { %v3342_v26 = vadd.f32 %v3334_v10, %v2492_v54  ;;  %v3335_v56 = vadd.f32 %v8225_v21, %v3331_v6  ;;  %v3291_v58 = vpop.f32.mrb[59].mxu0  ;;  %v10064_v21 = vld [vmem:[%s10780_s5 + $0x148] ss:$8 sps:$4 sm:$0xff]  }
 0x891   :  { %v3340_v60 = vadd.f32 %v3332_v18, %v2490_v50  ;;  %v3333_v62 = vadd.f32 %v3331_v6, %v3291_v58 }
 0x892   :  { %v3343_v3 = vadd.f32 %v3335_v56, %v2493_v48  ;;  %v3350_v34 = vmax.f32 %v3342_v26, 0.0  ;;  %v10069_v56 = vld [vmem:[%s10780_s5 + $0x198] ss:$8 sps:$4 sm:$0xff]  }
 0x893   :  { %v3341_v9 = vadd.f32 %v3333_v62, %v2491_v52  ;;  %v3348_v0 = vmax.f32 %v3340_v60, 0.0  ;;  %v10791_v52 = vmax.f32 %v9863_v7, 0.0  ;;  %v8989_v7 = vld [vmem:[%s10780_s5 + $0x220] ss:$8 sps:$4 sm:$0xff]  }
 0x894   :  { %v3351_v24 = vmax.f32 %v3343_v3, 0.0  ;;  %v10085_v62 = vld [vmem:[%s10780_s5 + $0x168] ss:$8 sps:$4 sm:$0xff]   ;;  %v10090_v3 = vld [vmem:[%s10780_s5 + $0x1b8] ss:$8 sps:$4 sm:$0xff]  }
 0x895   :  { %v3349_v38 = vmax.f32 %v3341_v9, 0.0  ;;  %v8228_v28 = vpop.f32.mrb[60].mxu0  ;;  %v10104_v9 = vld [vmem:[%s10780_s5 + $0x178] ss:$8 sps:$4 sm:$0xff]  }
 0x896   :  { %v3361_v44 = vpack.c.bf16 %v3351_v24, %v3350_v34  ;;  %v3338_v40 = vadd.f32 %v8228_v28, %v3331_v6  ;;  %v3304_v54 = vpop.f32.mrb[61].mxu0  ;;  %v10114_v24 = vld [vmem:[%s10780_s5 + $0x188] ss:$8 sps:$4 sm:$0xff]  }
 0x897   :  { %v3360_v11 = vpack.c.bf16 %v3349_v38, %v3348_v0  ;;  %v3336_v12 = vadd.f32 %v3331_v6, %v3304_v54  ;;  %v8229_v13 = vpop.f32.mrb[62].mxu0  ;;  %v10124_v38 = vld [vmem:[%s10780_s5 + $0x1a8] ss:$8 sps:$4 sm:$0xff]  }
 0x898   :  { %v3346_v36 = vadd.f32 %v3338_v40, %v2496_v32  ;;  %v3339_v50 = vadd.f32 %v8229_v13, %v3331_v6  ;;  %v3307_v42 = vpop.f32.mrb[63].mxu0  ;;  %v9000_v40 = vld [vmem:[%s10780_s5 + $0xa8] ss:$8 sps:$4 sm:$0x3f]  }
 0x899   :  { %v3344_v46 = vadd.f32 %v3336_v12, %v2494_v23  ;;  %v3337_v48 = vadd.f32 %v3331_v6, %v3307_v42  ;;  %8231 = vmatpush3.bf16.msra.mxu1 %v3360_v11  ;;  %v3423_v23 = vsel %vm1294_vm2, %v3358_v31, 0  ;;  %v4046_v54 = vsel %vm3482_vm6, %v9000_v40, 0 }
 0x89a   :  { %v3347_v14 = vadd.f32 %v3339_v50, %v10791_v52  ;;  %8232 = vmatprep.subr.bf16.mxu1 %v9074_v63  ;;  %v3354_v19 = vmax.f32 %v3346_v36, 0.0 }
 0x89b   :  { %v3345_v17 = vadd.f32 %v3337_v48, %v10792_v15  ;;  %v3352_v22 = vmax.f32 %v3344_v46, 0.0 }
 0x89c   :  { %v3355_v20 = vmax.f32 %v3347_v14, 0.0 }
 0x89d   :  { %v3353_v5 = vmax.f32 %v3345_v17, 0.0  ;;  %8233 = vmatpush3.bf16.msra.mxu1 %v3361_v44  ;;  %v10134_v44 = vld [vmem:[%s10780_s5 + $0x1c8] ss:$8 sps:$4 sm:$0xff]  }
 0x89e   :  { %v3363_v32 = vpack.c.bf16 %v3355_v20, %v3354_v19  ;;  %8234 = vmatprep.subr.bf16.mxu1 %v9074_v63 }
 0x89f   :  { %v3362_v1 = vpack.c.bf16 %v3353_v5, %v3352_v22 }
 0x8a1   :  { %8235 = vmatpush3.bf16.msra.mxu1 %v3362_v1 }
 0x8a2   :  { %8236 = vmatprep.subr.bf16.mxu1 %v9074_v63 }
 0x8a5   :  { %8237 = vmatpush3.bf16.msra.mxu1 %v3363_v32 }
 0x8a6   :  { %8242 = vmatprep.subr.bf16.mxu1 %v9074_v63 }
 0x8a8   :  { %8239 = vmatmul.mubr.msk.bf16.vlgmr.msra.gmra.mrb[144].mxu1 %vm1420_vm4, %v8989_v7 }
 0x8a9   :  { %8244 = vmatprep.mubr.msk.bf16.mxu1 %vm9075_vm5, %v9074_v63  ;;  %8243 = vmatpush3.bf16.msra.mxu1 %v3423_v23 }
 0x8aa   :  { %8248 = vmatprep.subr.bf16.mxu1 %v9074_v63 }
 0x97b   :  { %v3406_v25 = vpop.f32.mrb[144].mxu1 }
 0x97c   :  { %v8240_v27 = vpop.f32.mrb[145].mxu1 }
 0x97d   :  { %v3409_v29 = vpop.f32.mrb[146].mxu1 }
 0x97e   :  { %v3413_v33 = vpack.c.bf16 %v3409_v29, %v3406_v25  ;;  %v8241_v35 = vpop.f32.mrb[147].mxu1 }
 0x980   :  { %8245 = vmatmul.mubr.msk.bf16.vlgmr.msra.gmra.mrb[148].mxu1 %vm1281_vm3, %v3413_v33 }
 0x981   :  { %8250 = vmatprep.mubr.msk.bf16.mxu1 %vm9075_vm5, %v9074_v63  ;;  %8249 = vmatpush3.bf16.msra.mxu1 %v3484_v39 }
 0x982   :  { %8254 = vmatprep.subr.bf16.mxu1 %v9074_v63 }
 0xa53   :  { %v3459_v47 = vpop.f32.mrb[148].mxu1 }
 0xa54   :  { %v8246_v49 = vpop.f32.mrb[149].mxu1  ;;  %v3460_v53 = vadd.f32 %v3459_v47, %v3418_v45 }
 0xa55   :  { %v3462_v51 = vpop.f32.mrb[150].mxu1 }
 0xa56   :  { %v3463_v55 = vadd.f32 %v3462_v51, %v3418_v45  ;;  %v8247_v57 = vpop.f32.mrb[151].mxu1 }
 0xa58   :  { %v3472_v59 = vpack.c.bf16 %v3463_v55, %v3460_v53 }
 0xa5a   :  { %8251 = vmatmul.mubr.msk.bf16.vlgmr.msra.gmra.mrb[152].mxu1 %vm3478_vm7, %v3472_v59 }
 0xa5b   :  { %8256 = vmatprep.mubr.msk.bf16.mxu1 %vm9075_vm5, %v9074_v63 }
 0xb2d   :  { %v3520_v61 = vpop.f32.mrb[152].mxu1 }
 0xb2e   :  { %v8252_v2 = vpop.f32.mrb[153].mxu1 }
 0xb2f   :  { %v3523_v4 = vpop.f32.mrb[154].mxu1  ;;  %v3468_v2 = vld [vmem:[%s10780_s5 + $0xa0] sm:$0x1] }
 0xb30   :  { %v3529_v6 = vpack.c.bf16 %v3523_v4, %v3520_v61  ;;  %v8253_v8 = vpop.f32.mrb[155].mxu1 }
 0xb32   :  { %3538 = vrot.lane.b32.xlu0 %v3529_v6, %s9067_s17  ;;  %3642 = vrot.lane.b32.xlu1 %v3529_v6, %s9069_s21 }
 0xb36   :  { %3698 = vrot.lane.b32.xlu0 %v3529_v6, %s9071_s0  ;;  %3754 = vrot.lane.b32.xlu1 %v3529_v6, %s9073_s24 }
 0xb3a   :  { %3810 = vrot.lane.b32.xlu0 %v3529_v6, %s9076_s8  ;;  %3866 = vrot.lane.b32.xlu1 %v3529_v6, %s9077_s9 }
 0xb3e   :  { %3922 = vrot.lane.b32.xlu0 %v3529_v6, %s9078_s10  ;;  %3978 = vrot.lane.b32.xlu1 %v3529_v6, %s9079_s11 }
 0xba4   :  { %v3539_v10 = vpop.permute.xlu0 %3538  ;;  %v3643_v58 = vpop.permute.xlu1 %3642 }
 0xba5   :  { %8255 = vmatpush3.bf16.msra.mxu1 %v3539_v10 }
 0xba6   :  { %8260 = vmatprep.subr.bf16.mxu1 %v9074_v63 }
 0xba8   :  { %8257 = vmatmul.mubr.msk.bf16.vlgmr.msra.gmra.mrb[156].mxu1 %vm3541_vm8, %v10053_v16  ;;  %v3699_v18 = vpop.permute.xlu0 %3698  ;;  %v3755_v34 = vpop.permute.xlu1 %3754 }
 0xba9   :  { %8261 = vmatpush3.bf16.msra.mxu1 %v3529_v6  ;;  %8262 = vmatprep.mubr.msk.bf16.mxu1 %vm9075_vm5, %v9074_v63 }
 0xbaa   :  { %8266 = vmatprep.subr.bf16.mxu1 %v9074_v63 }
 0xbac   :  { %v3811_v26 = vpop.permute.xlu0 %3810  ;;  %v3867_v0 = vpop.permute.xlu1 %3866 }
 0xbad   :  { %8285 = vmatpush3.bf16.msra.mxu0 %v3811_v26 }
 0xbae   :  { %8296 = vmatprep.subr.bf16.mxu0 %v9074_v63 }
 0xbb0   :  { %8263 = vmatmul.mubr.msk.bf16.vlgmr.msra.gmra.mrb[160].mxu1 %vm3541_vm8, %v10064_v21  ;;  %8287 = vmatmul.mubr.msk.bf16.vlgmr.msra.gmra.mrb[64].mxu0 %vm3541_vm8, %v10069_v56  ;;  %v3923_v60 = vpop.permute.xlu0 %3922  ;;  %v3979_v28 = vpop.permute.xlu1 %3978 }
 0xbb1   :  { %8267 = vmatpush3.bf16.msra.mxu1 %v3643_v58  ;;  %8268 = vmatprep.mubr.msk.bf16.mxu1 %vm9075_vm5, %v9074_v63  ;;  %v4027_v58 = vunpack.c.l.bf16 %v3468_v2 }
 0xbb2   :  { %8272 = vmatprep.subr.bf16.mxu1 %v9074_v63  ;;  %8297 = vmatpush3.bf16.msra.mxu0 %v3923_v60 }
 0xbb3   :  { %8298 = vmatprep.mubr.msk.bf16.mxu0 %vm9075_vm5, %v9074_v63  ;;  %8308 = vmatprep.subr.bf16.mxu0 %v9074_v63 }
 0xbb8   :  { %8269 = vmatmul.mubr.msk.bf16.vlgmr.msra.gmra.mrb[164].mxu1 %vm3541_vm8, %v10085_v62  ;;  %8299 = vmatmul.mubr.msk.bf16.vlgmr.msra.gmra.mrb[68].mxu0 %vm3541_vm8, %v10090_v3 }
 0xbb9   :  { %8273 = vmatpush3.bf16.msra.mxu1 %v3699_v18  ;;  %8274 = vmatprep.mubr.msk.bf16.mxu1 %vm9075_vm5, %v9074_v63 }
 0xbba   :  { %8278 = vmatprep.subr.bf16.mxu1 %v9074_v63  ;;  %8310 = vmatprep.mubr.msk.bf16.mxu0 %vm9075_vm5, %v9074_v63 }
 0xbbb   :  { %8309 = vmatpush3.bf16.msra.mxu0 %v4046_v54 }
 0xbbc   :  { %8320 = vmatprep.subr.bf16.mxu0 %v9074_v63 }
 0xbc0   :  { %8275 = vmatmul.mubr.msk.bf16.vlgmr.msra.gmra.mrb[168].mxu1 %vm3541_vm8, %v10104_v9 }
 0xbc1   :  { %8279 = vmatpush3.bf16.msra.mxu1 %v3755_v34  ;;  %8280 = vmatprep.mubr.msk.bf16.mxu1 %vm9075_vm5, %v9074_v63  ;;  %v4031_v34 = vrot.slane %v4027_v58, %v9211_v30 }
 0xbc2   :  { %8290 = vmatprep.subr.bf16.mxu1 %v9074_v63 }
 0xbc8   :  { %8281 = vmatmul.mubr.msk.bf16.vlgmr.msra.gmra.mrb[172].mxu1 %vm3541_vm8, %v10114_v24 }
 0xbc9   :  { %8291 = vmatpush3.bf16.msra.mxu1 %v3867_v0  ;;  %8292 = vmatprep.mubr.msk.bf16.mxu1 %vm9075_vm5, %v9074_v63 }
 0xbca   :  { %8302 = vmatprep.subr.bf16.mxu1 %v9074_v63 }
 0xbd0   :  { %8293 = vmatmul.mubr.msk.bf16.vlgmr.msra.gmra.mrb[176].mxu1 %vm3541_vm8, %v10124_v38 }
 0xbd1   :  { %8303 = vmatpush3.bf16.msra.mxu1 %v3979_v28  ;;  %8304 = vmatprep.mubr.msk.bf16.mxu1 %vm9075_vm5, %v9074_v63 }
 0xbd2   :  { %8314 = vmatprep.subr.bf16.mxu1 %v9074_v63 }
 0xbd8   :  { %8305 = vmatmul.mubr.msk.bf16.vlgmr.msra.gmra.mrb[180].mxu1 %vm3541_vm8, %v10134_v44 }
 0xbd9   :  { %8316 = vmatprep.mubr.msk.bf16.mxu1 %vm9075_vm5, %v9074_v63 }
 0xc7b   :  { %v3579_v11 = vpop.f32.mrb[156].mxu1 }
 0xc7c   :  { %v8258_v12 = vpop.f32.mrb[157].mxu1 }
 0xc7d   :  { %v3582_v13 = vpop.f32.mrb[158].mxu1 }
 0xc7e   :  { %v8259_v36 = vpop.f32.mrb[159].mxu1 }
 0xc83   :  { %v3628_v50 = vpop.f32.mrb[160].mxu1  ;;  %v3850_v42 = vpop.f32.mrb[64].mxu0 }
 0xc84   :  { %v3629_v46 = vadd.f32 %v3628_v50, %v3579_v11  ;;  %v8264_v48 = vpop.f32.mrb[161].mxu1  ;;  %v8288_v52 = vpop.f32.mrb[65].mxu0 }
 0xc85   :  { %v3631_v14 = vpop.f32.mrb[162].mxu1  ;;  %v3853_v15 = vpop.f32.mrb[66].mxu0 }
 0xc86   :  { %v3632_v17 = vadd.f32 %v3631_v14, %v3582_v13  ;;  %v8265_v19 = vpop.f32.mrb[163].mxu1  ;;  %v8289_v20 = vpop.f32.mrb[67].mxu0 }
 0xc8b   :  { %v3682_v22 = vpop.f32.mrb[164].mxu1  ;;  %v3962_v5 = vpop.f32.mrb[68].mxu0 }
 0xc8c   :  { %v3689_v32 = vadd.f32 %v3682_v22, %v3629_v46  ;;  %v8270_v1 = vpop.f32.mrb[165].mxu1  ;;  %v8300_v7 = vpop.f32.mrb[69].mxu0 }
 0xc8d   :  { %v3685_v31 = vpop.f32.mrb[166].mxu1  ;;  %v3965_v23 = vpop.f32.mrb[70].mxu0 }
 0xc8e   :  { %v3690_v25 = vadd.f32 %v3685_v31, %v3632_v17  ;;  %v8271_v27 = vpop.f32.mrb[167].mxu1  ;;  %v8301_v29 = vpop.f32.mrb[71].mxu0 }
 0xc93   :  { %v3738_v33 = vpop.f32.mrb[168].mxu1 }
 0xc94   :  { %v3745_v35 = vadd.f32 %v3738_v33, %v3689_v32  ;;  %v8276_v37 = vpop.f32.mrb[169].mxu1 }
 0xc95   :  { %v3741_v39 = vpop.f32.mrb[170].mxu1 }
 0xc96   :  { %v3746_v41 = vadd.f32 %v3741_v39, %v3690_v25  ;;  %v8277_v43 = vpop.f32.mrb[171].mxu1 }
 0xc9b   :  { %v3794_v45 = vpop.f32.mrb[172].mxu1 }
 0xc9c   :  { %v3801_v47 = vadd.f32 %v3794_v45, %v3745_v35  ;;  %v8282_v49 = vpop.f32.mrb[173].mxu1 }
 0xc9d   :  { %v3797_v51 = vpop.f32.mrb[174].mxu1 }
 0xc9e   :  { %v3802_v53 = vadd.f32 %v3797_v51, %v3746_v41  ;;  %v3857_v55 = vadd.f32 %v3850_v42, %v3801_v47  ;;  %v8283_v57 = vpop.f32.mrb[175].mxu1 }
 0xca0   :  { %v3858_v59 = vadd.f32 %v3853_v15, %v3802_v53 }
 0xca3   :  { %v3906_v61 = vpop.f32.mrb[176].mxu1 }
 0xca4   :  { %v3913_v4 = vadd.f32 %v3906_v61, %v3857_v55  ;;  %v8294_v6 = vpop.f32.mrb[177].mxu1 }
 0xca5   :  { %v3909_v8 = vpop.f32.mrb[178].mxu1 }
 0xca6   :  { %v3914_v10 = vadd.f32 %v3909_v8, %v3858_v59  ;;  %v3969_v18 = vadd.f32 %v3962_v5, %v3913_v4  ;;  %v8295_v26 = vpop.f32.mrb[179].mxu1 }
 0xca8   :  { %v3970_v60 = vadd.f32 %v3965_v23, %v3914_v10 }
 0xcab   :  { %v4018_v0 = vpop.f32.mrb[180].mxu1 }
 0xcac   :  { %v4025_v28 = vadd.f32 %v4018_v0, %v3969_v18  ;;  %v8306_v40 = vpop.f32.mrb[181].mxu1  ;;  %v3471_v0 = vld [vmem:[%s10780_s5 + $0xb8] sm:$0x1] }
 0xcad   :  { %v4021_v54 = vpop.f32.mrb[182].mxu1 }
 0xcae   :  { %v10149_v11 = vadd.f32 %v4031_v34, %v4025_v28  ;;  %v4026_v12 = vadd.f32 %v4021_v54, %v3970_v60  ;;  %v8307_v13 = vpop.f32.mrb[183].mxu1 }
 0xcb0   :  { %v10151_v36 = vadd.f32 %v4031_v34, %v4026_v12  ;;  %v4034_v50 = vmax.f32 %v10149_v11, 0.0  ;;  %v9001_v11 = vld [vmem:[%s10780_s5 + $0x110] ss:$8 sps:$4 sm:$0x3f]  }
 0xcb2   :  { %v4035_v42 = vmax.f32 %v10151_v36, 0.0  ;;  %v9002_v36 = vld [vmem:[%s10780_s5 + $0xc0] ss:$8 sps:$4 sm:$0xff]  }
 0xcb4   :  { %v4036_v46 = vpack.c.bf16 %v4035_v42, %v4034_v50 }
 0xcb6   :  { %8311 = vmatmul.mubr.msk.bf16.vlgmr.msra.gmra.mrb[72].mxu0 %vm3478_vm7, %v4036_v46 }
 0xcb7   :  { %8322 = vmatprep.mubr.msk.bf16.mxu0 %vm9075_vm5, %v9074_v63 }
 0xd89   :  { %v4082_v48 = vpop.f32.mrb[72].mxu0 }
 0xd8a   :  { %v8312_v52 = vpop.f32.mrb[73].mxu0 }
 0xd8b   :  { %v4085_v14 = vpop.f32.mrb[74].mxu0  ;;  %v4498_v52 = vunpack.c.l.bf16 %v3471_v0 }
 0xd8c   :  { %v4089_v15 = vpack.c.bf16 %v4085_v14, %v4082_v48  ;;  %v8313_v17 = vpop.f32.mrb[75].mxu0 }
 0xd8e   :  { %4091 = vrot.lane.b32.xlu0 %v4089_v15, %s9067_s17  ;;  %4176 = vrot.lane.b32.xlu1 %v4089_v15, %s9069_s21 }
 0xd8f   :  { %8321 = vmatpush3.bf16.msra.mxu0 %v4089_v15 }
 0xd90   :  { %8332 = vmatprep.subr.bf16.mxu0 %v9074_v63 }
 0xd92   :  { %4222 = vrot.lane.b32.xlu0 %v4089_v15, %s9071_s0  ;;  %4268 = vrot.lane.b32.xlu1 %v4089_v15, %s9073_s24 }
 0xd93   :  { %8323 = vmatmul.mubr.msk.bf16.vlgmr.msra.gmra.mrb[76].mxu0 %vm3541_vm8, %v10064_v21 }
 0xd94   :  { %8334 = vmatprep.mubr.msk.bf16.mxu0 %vm9075_vm5, %v9074_v63 }
 0xd96   :  { %4314 = vrot.lane.b32.xlu0 %v4089_v15, %s9076_s8  ;;  %4360 = vrot.lane.b32.xlu1 %v4089_v15, %s9077_s9 }
 0xd9a   :  { %4406 = vrot.lane.b32.xlu0 %v4089_v15, %s9078_s10  ;;  %4452 = vrot.lane.b32.xlu1 %v4089_v15, %s9079_s11  ;;  %v4502_v15 = vrot.slane %v4498_v52, %v9211_v30 }
 0xe00   :  { %v4092_v19 = vpop.permute.xlu0 %4091  ;;  %v4177_v20 = vpop.permute.xlu1 %4176 }
 0xe01   :  { %8315 = vmatpush3.bf16.msra.mxu1 %v4092_v19 }
 0xe02   :  { %8326 = vmatprep.subr.bf16.mxu1 %v9074_v63 }
 0xe04   :  { %8317 = vmatmul.mubr.msk.bf16.vlgmr.msra.gmra.mrb[184].mxu1 %vm3541_vm8, %v10053_v16  ;;  %v4223_v21 = vpop.permute.xlu0 %4222  ;;  %v4269_v16 = vpop.permute.xlu1 %4268 }
 0xe05   :  { %8327 = vmatpush3.bf16.msra.mxu1 %v4177_v20  ;;  %8328 = vmatprep.mubr.msk.bf16.mxu1 %vm9075_vm5, %v9074_v63 }
 0xe06   :  { %8333 = vmatpush3.bf16.msra.mxu0 %v4223_v21  ;;  %8338 = vmatprep.subr.bf16.mxu1 %v9074_v63 }
 0xe07   :  { %8344 = vmatprep.subr.bf16.mxu0 %v9074_v63 }
 0xe08   :  { %v4315_v22 = vpop.permute.xlu0 %4314 }
 0xe09   :  { %8335 = vmatmul.mubr.msk.bf16.vlgmr.msra.gmra.mrb[80].mxu0 %vm3541_vm8, %v10104_v9 }
 0xe0a   :  { %8345 = vmatpush3.bf16.msra.mxu0 %v4315_v22  ;;  %8346 = vmatprep.mubr.msk.bf16.mxu0 %vm9075_vm5, %v9074_v63 }
 0xe0b   :  { %8356 = vmatprep.subr.bf16.mxu0 %v9074_v63 }
 0xe0c   :  { %8329 = vmatmul.mubr.msk.bf16.vlgmr.msra.gmra.mrb[188].mxu1 %vm3541_vm8, %v10085_v62  ;;  %v4407_v9 = vpop.permute.xlu0 %4406  ;;  %v4361_v62 = vpop.permute.xlu1 %4360 }
 0xe0d   :  { %8339 = vmatpush3.bf16.msra.mxu1 %v4269_v16  ;;  %8340 = vmatprep.mubr.msk.bf16.mxu1 %vm9075_vm5, %v9074_v63 }
 0xe0e   :  { %8350 = vmatprep.subr.bf16.mxu1 %v9074_v63 }
 0xe11   :  { %8347 = vmatmul.mubr.msk.bf16.vlgmr.msra.gmra.mrb[84].mxu0 %vm3541_vm8, %v10069_v56  ;;  %v4453_v56 = vpop.permute.xlu1 %4452 }
 0xe12   :  { %8357 = vmatpush3.bf16.msra.mxu0 %v4407_v9  ;;  %8358 = vmatprep.mubr.msk.bf16.mxu0 %vm9075_vm5, %v9074_v63 }
 0xe13   :  { %8368 = vmatprep.subr.bf16.mxu0 %v9074_v63 }
 0xe14   :  { %8341 = vmatmul.mubr.msk.bf16.vlgmr.msra.gmra.mrb[192].mxu1 %vm3541_vm8, %v10114_v24 }
 0xe15   :  { %8351 = vmatpush3.bf16.msra.mxu1 %v4361_v62  ;;  %8352 = vmatprep.mubr.msk.bf16.mxu1 %vm9075_vm5, %v9074_v63 }
 0xe16   :  { %8362 = vmatprep.subr.bf16.mxu1 %v9074_v63 }
 0xe19   :  { %8359 = vmatmul.mubr.msk.bf16.vlgmr.msra.gmra.mrb[88].mxu0 %vm3541_vm8, %v10090_v3 }
 0xe1a   :  { %8370 = vmatprep.mubr.msk.bf16.mxu0 %vm9075_vm5, %v9074_v63 }
 0xe1c   :  { %8353 = vmatmul.mubr.msk.bf16.vlgmr.msra.gmra.mrb[196].mxu1 %vm3541_vm8, %v10124_v38 }
 0xe1d   :  { %8363 = vmatpush3.bf16.msra.mxu1 %v4453_v56  ;;  %8364 = vmatprep.mubr.msk.bf16.mxu1 %vm9075_vm5, %v9074_v63 }
 0xe1e   :  { %8374 = vmatprep.subr.bf16.mxu1 %v9074_v63 }
 0xe24   :  { %8365 = vmatmul.mubr.msk.bf16.vlgmr.msra.gmra.mrb[200].mxu1 %vm3541_vm8, %v10134_v44 }
 0xe25   :  { %8376 = vmatprep.mubr.msk.bf16.mxu1 %vm9075_vm5, %v9074_v63 }
 0xe66   :  { %v4169_v3 = vpop.f32.mrb[76].mxu0 }
 0xe67   :  { %v8324_v24 = vpop.f32.mrb[77].mxu0 }
 0xe68   :  { %v4172_v5 = vpop.f32.mrb[78].mxu0 }
 0xe69   :  { %v8325_v32 = vpop.f32.mrb[79].mxu0 }
 0xed7   :  { %v4128_v1 = vpop.f32.mrb[184].mxu1 }
 0xed8   :  { %v8318_v7 = vpop.f32.mrb[185].mxu1  ;;  %v4170_v38 = vadd.f32 %v4169_v3, %v4128_v1  ;;  %v4509_v1 = vld [vmem:[%s10780_s5 + $0x230] sm:$0x3] }
 0xed9   :  { %v4131_v31 = vpop.f32.mrb[186].mxu1  ;;  %v10793_v7 = vmov 0  }
 0xeda   :  { %v8319_v23 = vpop.f32.mrb[187].mxu1  ;;  %v4173_v25 = vadd.f32 %v4172_v5, %v4131_v31 }
 0xedc   :  { %v4259_v27 = vpop.f32.mrb[80].mxu0 }
 0xedd   :  { %v8336_v29 = vpop.f32.mrb[81].mxu0 }
 0xede   :  { %v4262_v33 = vpop.f32.mrb[82].mxu0  ;;  %v4616_v29 = vld [vmem:[%s10780_s5 + $0xd0] sm:$0xff] }
 0xedf   :  { %v4213_v35 = vpop.f32.mrb[188].mxu1  ;;  %v8337_v37 = vpop.f32.mrb[83].mxu0 }
 0xee0   :  { %v4220_v39 = vadd.f32 %v4213_v35, %v4170_v38  ;;  %v8330_v44 = vpop.f32.mrb[189].mxu1  ;;  %v7334_v35 = vcombine.low %v4616_v29, %v4616_v29 }
 0xee1   :  { %v4216_v41 = vpop.f32.mrb[190].mxu1 }
 0xee2   :  { %v4221_v43 = vadd.f32 %v4216_v41, %v4173_v25  ;;  %v4266_v45 = vadd.f32 %v4259_v27, %v4220_v39  ;;  %v8331_v47 = vpop.f32.mrb[191].mxu1  ;;  %v4644_v37 = vsel %vm4642_vm9, %v7334_v35, 0  ;;  %v4512_v39 = vld [vmem:[%s10780_s5 + $0x120] sm:$0x1] }
 0xee3   :  { %v4558_v44 = vunpack.c.l.bf16 %v4512_v39 }
 0xee4   :  { %v4267_v49 = vadd.f32 %v4262_v33, %v4221_v43  ;;  %v4351_v51 = vpop.f32.mrb[84].mxu0  ;;  %v7335_v33 = vcombine.high %v4616_v29, %v4616_v29 }
 0xee5   :  { %v8348_v53 = vpop.f32.mrb[85].mxu0  ;;  %v4562_v41 = vrot.slane %v4558_v44, %v9211_v30 }
 0xee6   :  { %v4354_v55 = vpop.f32.mrb[86].mxu0 }
 0xee7   :  { %v4305_v57 = vpop.f32.mrb[192].mxu1  ;;  %v8349_v59 = vpop.f32.mrb[87].mxu0 }
 0xee8   :  { %v4312_v61 = vadd.f32 %v4305_v57, %v4266_v45  ;;  %v8342_v2 = vpop.f32.mrb[193].mxu1 }
 0xee9   :  { %v4308_v4 = vpop.f32.mrb[194].mxu1 }
 0xeea   :  { %v4313_v6 = vadd.f32 %v4308_v4, %v4267_v49  ;;  %v4358_v8 = vadd.f32 %v4351_v51, %v4312_v61  ;;  %v8343_v10 = vpop.f32.mrb[195].mxu1 }
 0xeec   :  { %v4359_v18 = vadd.f32 %v4354_v55, %v4313_v6  ;;  %v4443_v26 = vpop.f32.mrb[88].mxu0  ;;  %v10261_v6 = vld [vmem:[%s10780_s5 + $0x1d8] sm:$0x3] }
 0xeed   :  { %v8360_v58 = vpop.f32.mrb[89].mxu0 }
 0xeee   :  { %v4446_v60 = vpop.f32.mrb[90].mxu0  ;;  %v10279_v58 = vld [vmem:[%s10780_s5 + $0x1e0] sm:$0x3] }
 0xeef   :  { %v4397_v34 = vpop.f32.mrb[196].mxu1  ;;  %v8361_v28 = vpop.f32.mrb[91].mxu0 }
 0xef0   :  { %v4404_v40 = vadd.f32 %v4397_v34, %v4358_v8  ;;  %v8354_v54 = vpop.f32.mrb[197].mxu1 }
 0xef1   :  { %v4400_v12 = vpop.f32.mrb[198].mxu1 }
 0xef2   :  { %v4405_v13 = vadd.f32 %v4400_v12, %v4359_v18  ;;  %v4450_v46 = vadd.f32 %v4443_v26, %v4404_v40  ;;  %v8355_v48 = vpop.f32.mrb[199].mxu1  ;;  %v10292_v40 = vld [vmem:[%s10780_s5 + $0x1f0] sm:$0x3] }
 0xef4   :  { %v4451_v14 = vadd.f32 %v4446_v60, %v4405_v13 }
 0xef7   :  { %v4489_v17 = vpop.f32.mrb[200].mxu1 }
 0xef8   :  { %v4496_v19 = vadd.f32 %v4489_v17, %v4450_v46  ;;  %v8366_v20 = vpop.f32.mrb[201].mxu1  ;;  %v10299_v46 = vld [vmem:[%s10780_s5 + $0x1e8] sm:$0x3]  ;;  %v10321_v17 = vld [vmem:[%s10780_s5 + $0x1f8] sm:$0x3] }
 0xef9   :  { %v4492_v21 = vpop.f32.mrb[202].mxu1 }
 0xefa   :  { %v4503_v22 = vadd.f32 %v4502_v15, %v4496_v19  ;;  %v4497_v16 = vadd.f32 %v4492_v21, %v4451_v14  ;;  %v8367_v9 = vpop.f32.mrb[203].mxu1  ;;  %v10316_v14 = vld [vmem:[%s10780_s5 + $0x200] sm:$0x3] }
 0xefc   :  { %v4505_v62 = vadd.f32 %v4503_v22, %v4034_v50  ;;  %v4504_v56 = vadd.f32 %v4502_v15, %v4497_v16  ;;  %v4572_v50 = vsel %vm3482_vm6, %v9001_v11, 0  ;;  %v10337_v22 = vld [vmem:[%s10780_s5 + $0x210] sm:$0x3]  ;;  %v10342_v16 = vld [vmem:[%s10780_s5 + $0x208] sm:$0x3] }
 0xefd   :  { %8375 = vmatpush3.bf16.msra.mxu1 %v4572_v50  ;;  %v4620_v11 = vld [vmem:[%s10780_s5 + $0xf0] sm:$0xff] }
 0xefe   :  { %v4506_v3 = vadd.f32 %v4504_v56, %v4035_v42  ;;  %v4507_v24 = vmax.f32 %v4505_v62, 0.0  ;;  %v9004_v42 = vld [vmem:[%s10780_s5 + $0xc4] ss:$8 sps:$4 sm:$0xff]   ;;  %8380 = vmatprep.subr.bf16.mxu1 %v9074_v63  ;;  %v10356_v56 = vld [vmem:[%s10780_s5 + $0x218] sm:$0x3]  ;;  %v7350_v50 = vcombine.high %v4620_v11, %v4620_v11 }
 0xf00   :  { %v4508_v5 = vmax.f32 %v4506_v3, 0.0 }
 0xf02   :  { %v4513_v32 = vpack.c.bf16 %v4508_v5, %v4507_v24 }
 0xf04   :  { %8369 = vmatpush3.bf16.msra.mxu0 %v4513_v32 }
 0xf05   :  { %4649 = vmatprep.subr.bf16.mxu0 %v9004_v42 }
 0xf07   :  { %8371 = vmatmul.mubr.msk.bf16.vlgmr.msra.gmra.mrb[92].mxu0 %vm3541_vm8, %v4509_v1  ;;  %v9009_v1 = vld [vmem:[%s10780_s5 + $0xe4] ss:$8 sps:$4 sm:$0xff]  }
 0xf08   :  { %4681 = vmatprep.mubr.bf16.mxu0 %v10793_v7  ;;  %4650 = vmatpush1.bf16.msra.mxu0 %v9002_v36  ;;  %v7349_v36 = vcombine.low %v4620_v11, %v4620_v11 }
 0xf09   :  { %7336 = vmatprep.subr.msk.bf16.mxu0 %vm4642_vm9, %v7335_v33 }
 0xf0a   :  { %v5173_v42 = vsel %vm4642_vm9, %v7349_v36, 0 }
 0xf0c   :  { %4652 = vmatpush1.bf16.msra.mxu0 %v4644_v37 }
 0xf0d   :  { %8386 = vmatprep.subr.bf16.mxu0 %v9074_v63 }
 0xfda   :  { %v4551_v38 = vpop.f32.mrb[92].mxu0 }
 0xfdb   :  { %v4557_v31 = vpack.c.bf16 %v4551_v38, %v4551_v38  ;;  %v8372_v23 = vpop.f32.mrb[93].mxu0 }
 0xfdc   :  { %v4554_v25 = vpop.f32.mrb[94].mxu0 }
 0xfdd   :  { %8377 = vmatmul.mubr.msk.bf16.vlgmr.msra.gmra.mrb[204].mxu1 %vm3478_vm7, %v4557_v31  ;;  %v8373_v27 = vpop.f32.mrb[95].mxu0 }
 0xfde   :  { %8382 = vmatprep.mubr.msk.bf16.mxu1 %vm9075_vm5, %v9074_v63 }
0x10b0   :  { %v4608_v43 = vpop.f32.mrb[204].mxu1 }
0x10b1   :  { %v4609_v45 = vadd.f32 %v4608_v43, %v4562_v41  ;;  %v8378_v47 = vpop.f32.mrb[205].mxu1 }
0x10b2   :  { %v4611_v49 = vpop.f32.mrb[206].mxu1 }
0x10b3   :  { %v4622_v51 = vpack.c.bf16 %v4609_v45, %v4609_v45  ;;  %v8379_v53 = vpop.f32.mrb[207].mxu1 }
0x10b5   :  { %7337 = vmatmul.mubr.msk.bf16.vlgmr.msra.gmra.mrb[96].mxu0 %vm4638_vm10, %v4622_v51 }
0x10b6   :  { %8388 = vmatprep.mubr.msk.bf16.mxu0 %vm9075_vm5, %v9074_v63 }
0x1188   :  { %v4683_v55 = vpop.f32.mrb[96].mxu0 }
0x1189   :  { %v4691_v57 = vpack.c.bf16 %v4683_v55, %v4683_v55  ;;  %v4685_v59 = vpop.f32.mrb[97].mxu0 }
0x118a   :  { %v4687_v61 = vpop.f32.mrb[98].mxu0  ;;  %v4941_v8 = vpack.c.bf16 %v4685_v59, %v4685_v59 }
0x118b   :  { %4694 = vrot.lane.b32.xlu0 %v4691_v57, %s9069_s21  ;;  %4791 = vrot.lane.b32.xlu1 %v4691_v57, %s9073_s24  ;;  %v4748_v2 = vsel %vm4700_vm11, %v4691_v57, 0  ;;  %v4688_v4 = vpop.f32.mrb[99].mxu0 }
0x118c   :  { %8387 = vmatpush3.bf16.msra.mxu0 %v4748_v2 }
0x118d   :  { %8398 = vmatprep.subr.bf16.mxu0 %v9074_v63 }
0x118f   :  { %4841 = vrot.lane.b32.xlu0 %v4691_v57, %s9077_s9  ;;  %4891 = vrot.lane.b32.xlu1 %v4691_v57, %s9079_s11 }
0x1190   :  { %8389 = vmatmul.mubr.msk.bf16.vlgmr.msra.gmra.mrb[100].mxu0 %vm4696_vm12, %v10261_v6 }
0x1191   :  { %8400 = vmatprep.mubr.msk.bf16.mxu0 %vm9075_vm5, %v9074_v63 }
0x1193   :  { %4943 = vrot.lane.b32.xlu0 %v4691_v57, %s9080_s28  ;;  %4945 = vrot.lane.b32.xlu1 %v4941_v8, %s9080_s28 }
0x1197   :  { %4997 = vrot.lane.b32.xlu0 %v4941_v8, %s9081_s29  ;;  %5047 = vrot.lane.b32.xlu1 %v4941_v8, %s9082_s30 }
0x119b   :  { %5097 = vrot.lane.b32.xlu0 %v4941_v8, %s9083_s7 }
0x11fd   :  { %v4695_v10 = vpop.permute.xlu0 %4694  ;;  %v4792_v18 = vpop.permute.xlu1 %4791 }
0x11fe   :  { %v4702_v26 = vsel %vm4700_vm11, %v4695_v10, 0  ;;  %v4797_v0 = vsel %vm4700_vm11, %v4792_v18, 0 }
0x11ff   :  { %8381 = vmatpush3.bf16.msra.mxu1 %v4702_v26 }
0x1200   :  { %8392 = vmatprep.subr.bf16.mxu1 %v9074_v63 }
0x1201   :  { %v4842_v60 = vpop.permute.xlu0 %4841  ;;  %v4892_v34 = vpop.permute.xlu1 %4891 }
0x1202   :  { %8383 = vmatmul.mubr.msk.bf16.vlgmr.msra.gmra.mrb[208].mxu1 %vm4696_vm12, %v10279_v58  ;;  %v4847_v28 = vsel %vm4700_vm11, %v4842_v60, 0  ;;  %v4897_v52 = vsel %vm4700_vm11, %v4892_v34, 0  ;;  %v4617_v34 = vld [vmem:[%s10780_s5 + $0xd8] sm:$0x1] }
0x1203   :  { %8393 = vmatpush3.bf16.msra.mxu1 %v4797_v0  ;;  %8394 = vmatprep.mubr.msk.bf16.mxu1 %vm9075_vm5, %v9074_v63 }
0x1204   :  { %8399 = vmatpush3.bf16.msra.mxu0 %v4847_v28  ;;  %8404 = vmatprep.subr.bf16.mxu1 %v9074_v63 }
0x1205   :  { %v4944_v54 = vpop.permute.xlu0 %4943  ;;  %v4946_v12 = vpop.permute.xlu1 %4945  ;;  %8410 = vmatprep.subr.bf16.mxu0 %v9074_v63 }
0x1206   :  { %v4948_v13 = vsel %vm4947_vm13, %v4944_v54, %v4946_v12 }
0x1207   :  { %8401 = vmatmul.mubr.msk.bf16.vlgmr.msra.gmra.mrb[104].mxu0 %vm4696_vm12, %v10292_v40  ;;  %v4953_v48 = vsel %vm4700_vm11, %v4948_v13, 0 }
0x1208   :  { %8411 = vmatpush3.bf16.msra.mxu0 %v4953_v48  ;;  %8412 = vmatprep.mubr.msk.bf16.mxu0 %vm9075_vm5, %v9074_v63 }
0x1209   :  { %8422 = vmatprep.subr.bf16.mxu0 %v9074_v63  ;;  %v5048_v15 = vpop.permute.xlu1 %5047  ;;  %v4998_v19 = vpop.permute.xlu0 %4997 }
0x120a   :  { %8395 = vmatmul.mubr.msk.bf16.vlgmr.msra.gmra.mrb[212].mxu1 %vm4696_vm12, %v10299_v46  ;;  %v5053_v20 = vsel %vm4700_vm11, %v5048_v15, 0  ;;  %v5003_v21 = vsel %vm4700_vm11, %v4998_v19, 0 }
0x120b   :  { %8405 = vmatpush3.bf16.msra.mxu1 %v4897_v52  ;;  %8406 = vmatprep.mubr.msk.bf16.mxu1 %vm9075_vm5, %v9074_v63  ;;  %v5146_v52 = vunpack.c.l.bf16 %v4617_v34 }
0x120c   :  { %8416 = vmatprep.subr.bf16.mxu1 %v9074_v63 }
0x120d   :  { %v5098_v9 = vpop.permute.xlu0 %5097  ;;  %v5150_v15 = vrot.slane %v5146_v52, %v9211_v30 }
0x120e   :  { %v5103_v62 = vsel %vm4700_vm11, %v5098_v9, 0 }
0x120f   :  { %8413 = vmatmul.mubr.msk.bf16.vlgmr.msra.gmra.mrb[108].mxu0 %vm4696_vm12, %v10316_v14 }
0x1210   :  { %8423 = vmatpush3.bf16.msra.mxu0 %v5053_v20  ;;  %8424 = vmatprep.mubr.msk.bf16.mxu0 %vm9075_vm5, %v9074_v63 }
0x1211   :  { %5178 = vmatprep.subr.bf16.mxu0 %v9009_v1 }
0x1212   :  { %8407 = vmatmul.mubr.msk.bf16.vlgmr.msra.gmra.mrb[216].mxu1 %vm4696_vm12, %v10321_v17 }
0x1213   :  { %8417 = vmatpush3.bf16.msra.mxu1 %v5003_v21  ;;  %8418 = vmatprep.mubr.msk.bf16.mxu1 %vm9075_vm5, %v9074_v63 }
0x1214   :  { %8428 = vmatprep.subr.bf16.mxu1 %v9074_v63 }
0x1217   :  { %8425 = vmatmul.mubr.msk.bf16.vlgmr.msra.gmra.mrb[112].mxu0 %vm4696_vm12, %v10337_v22 }
0x1218   :  { %5210 = vmatprep.mubr.bf16.mxu0 %v10793_v7  ;;  %v9007_v7 = vld [vmem:[%s10780_s5 + $0xe0] ss:$8 sps:$4 sm:$0xff]  }
0x1219   :  { %5179 = vmatpush1.bf16.msra.mxu0 %v9007_v7 }
0x121a   :  { %8419 = vmatmul.mubr.msk.bf16.vlgmr.msra.gmra.mrb[220].mxu1 %vm4696_vm12, %v10342_v16  ;;  %7351 = vmatprep.subr.msk.bf16.mxu0 %vm4642_vm9, %v7350_v50 }
0x121b   :  { %8429 = vmatpush3.bf16.msra.mxu1 %v5103_v62  ;;  %8430 = vmatprep.mubr.msk.bf16.mxu1 %vm9075_vm5, %v9074_v63 }
0x121c   :  { %8434 = vmatprep.subr.bf16.mxu1 %v9074_v63 }
0x121d   :  { %5181 = vmatpush1.bf16.msra.mxu0 %v5173_v42 }
0x121e   :  { %8440 = vmatprep.subr.bf16.mxu0 %v9074_v63 }
0x1222   :  { %8431 = vmatmul.mubr.msk.bf16.vlgmr.msra.gmra.mrb[224].mxu1 %vm4696_vm12, %v10356_v56 }
0x1223   :  { %8436 = vmatprep.mubr.msk.bf16.mxu1 %vm9075_vm5, %v9074_v63 }
0x1263   :  { %v4784_v3 = vpop.f32.mrb[100].mxu0 }
0x1264   :  { %v8390_v24 = vpop.f32.mrb[101].mxu0 }
0x1265   :  { %v4787_v5 = vpop.f32.mrb[102].mxu0 }
0x1266   :  { %v8391_v32 = vpop.f32.mrb[103].mxu0 }
0x12d5   :  { %v4738_v38 = vpop.f32.mrb[208].mxu1 }
0x12d6   :  { %v8384_v31 = vpop.f32.mrb[209].mxu1  ;;  %v4785_v23 = vadd.f32 %v4784_v3, %v4738_v38 }
0x12d7   :  { %v4741_v25 = vpop.f32.mrb[210].mxu1 }
0x12d8   :  { %v8385_v27 = vpop.f32.mrb[211].mxu1 }
0x12da   :  { %v4883_v29 = vpop.f32.mrb[104].mxu0 }
0x12db   :  { %v8402_v33 = vpop.f32.mrb[105].mxu0 }
0x12dc   :  { %v4886_v35 = vpop.f32.mrb[106].mxu0 }
0x12dd   :  { %v4833_v37 = vpop.f32.mrb[212].mxu1  ;;  %v8403_v39 = vpop.f32.mrb[107].mxu0 }
0x12de   :  { %v4839_v44 = vadd.f32 %v4833_v37, %v4785_v23  ;;  %v8396_v41 = vpop.f32.mrb[213].mxu1 }
0x12df   :  { %v4836_v43 = vpop.f32.mrb[214].mxu1 }
0x12e0   :  { %v4889_v45 = vadd.f32 %v4883_v29, %v4839_v44  ;;  %v8397_v47 = vpop.f32.mrb[215].mxu1 }
0x12e2   :  { %v4989_v49 = vpop.f32.mrb[108].mxu0 }
0x12e3   :  { %v8414_v51 = vpop.f32.mrb[109].mxu0 }
0x12e4   :  { %v4992_v53 = vpop.f32.mrb[110].mxu0 }
0x12e5   :  { %v4933_v55 = vpop.f32.mrb[216].mxu1  ;;  %v8415_v57 = vpop.f32.mrb[111].mxu0 }
0x12e6   :  { %v4939_v59 = vadd.f32 %v4933_v55, %v4889_v45  ;;  %v8408_v61 = vpop.f32.mrb[217].mxu1 }
0x12e7   :  { %v4936_v2 = vpop.f32.mrb[218].mxu1 }
0x12e8   :  { %v4995_v4 = vadd.f32 %v4989_v49, %v4939_v59  ;;  %v8409_v8 = vpop.f32.mrb[219].mxu1 }
0x12ea   :  { %v5089_v10 = vpop.f32.mrb[112].mxu0 }
0x12eb   :  { %v8426_v18 = vpop.f32.mrb[113].mxu0 }
0x12ec   :  { %v5092_v26 = vpop.f32.mrb[114].mxu0 }
0x12ed   :  { %v5039_v60 = vpop.f32.mrb[220].mxu1  ;;  %v8427_v0 = vpop.f32.mrb[115].mxu0 }
0x12ee   :  { %v5045_v28 = vadd.f32 %v5039_v60, %v4995_v4  ;;  %v8420_v54 = vpop.f32.mrb[221].mxu1 }
0x12ef   :  { %v5042_v12 = vpop.f32.mrb[222].mxu1 }
0x12f0   :  { %v5095_v13 = vadd.f32 %v5089_v10, %v5045_v28  ;;  %v8421_v48 = vpop.f32.mrb[223].mxu1 }
0x12f5   :  { %v5139_v19 = vpop.f32.mrb[224].mxu1 }
0x12f6   :  { %v5145_v20 = vadd.f32 %v5139_v19, %v5095_v13  ;;  %v8432_v21 = vpop.f32.mrb[225].mxu1 }
0x12f7   :  { %v5142_v9 = vpop.f32.mrb[226].mxu1 }
0x12f8   :  { %v5151_v62 = vadd.f32 %v5150_v15, %v5145_v20  ;;  %v8433_v3 = vpop.f32.mrb[227].mxu1 }
0x12f9   :  { %v4621_v3 = vld [vmem:[%s10780_s5 + $0xf8] sm:$0x1] }
0x12fa   :  { %v10378_v24 = vmax.f32 %v5151_v62, 0.0 }
0x12fc   :  { %v5153_v5 = vpack.c.bf16 %v10378_v24, %v10378_v24 }
0x12fe   :  { %7352 = vmatmul.mubr.msk.bf16.vlgmr.msra.gmra.mrb[116].mxu0 %vm4638_vm10, %v5153_v5 }
0x12ff   :  { %8442 = vmatprep.mubr.msk.bf16.mxu0 %vm9075_vm5, %v9074_v63 }
0x13d1   :  { %v5212_v32 = vpop.f32.mrb[116].mxu0 }
0x13d2   :  { %v5219_v1 = vpack.c.bf16 %v5212_v32, %v5212_v32  ;;  %v5214_v7 = vpop.f32.mrb[117].mxu0 }
0x13d3   :  { %v5216_v11 = vpop.f32.mrb[118].mxu0  ;;  %v5447_v42 = vpack.c.bf16 %v5214_v7, %v5214_v7 }
0x13d4   :  { %5221 = vrot.lane.b32.xlu1 %v5219_v1, %s9069_s21  ;;  %5309 = vrot.lane.b32.xlu0 %v5219_v1, %s9073_s24  ;;  %v5267_v50 = vsel %vm4700_vm11, %v5219_v1, 0  ;;  %v5217_v36 = vpop.f32.mrb[119].mxu0 }
0x13d5   :  { %8441 = vmatpush3.bf16.msra.mxu0 %v5267_v50  ;;  %v5636_v36 = vunpack.c.l.bf16 %v4621_v3 }
0x13d6   :  { %8452 = vmatprep.subr.bf16.mxu0 %v9074_v63 }
0x13d8   :  { %5355 = vrot.lane.b32.xlu1 %v5219_v1, %s9077_s9  ;;  %5401 = vrot.lane.b32.xlu0 %v5219_v1, %s9079_s11 }
0x13d9   :  { %8443 = vmatmul.mubr.msk.bf16.vlgmr.msra.gmra.mrb[120].mxu0 %vm4696_vm12, %v10261_v6 }
0x13da   :  { %8454 = vmatprep.mubr.msk.bf16.mxu0 %vm9075_vm5, %v9074_v63 }
0x13dc   :  { %5449 = vrot.lane.b32.xlu1 %v5219_v1, %s9080_s28  ;;  %5451 = vrot.lane.b32.xlu0 %v5447_v42, %s9080_s28 }
0x13e0   :  { %5498 = vrot.lane.b32.xlu1 %v5447_v42, %s9081_s29  ;;  %5544 = vrot.lane.b32.xlu0 %v5447_v42, %s9082_s30 }
0x13e4   :  { %5590 = vrot.lane.b32.xlu1 %v5447_v42, %s9083_s7  ;;  %v5640_v42 = vrot.slane %v5636_v36, %v9211_v30  ;;  %v9013_v30 = vld [vmem:[%s10780_s5 + $0x138] ss:$0 sps:$4 sm:$0xff]  }
0x1446   :  { %v5222_v38 = vpop.permute.xlu1 %5221  ;;  %v5310_v31 = vpop.permute.xlu0 %5309 }
0x1447   :  { %v5224_v23 = vsel %vm4700_vm11, %v5222_v38, 0  ;;  %v5312_v27 = vsel %vm4700_vm11, %v5310_v31, 0 }
0x1448   :  { %8435 = vmatpush3.bf16.msra.mxu1 %v5224_v23 }
0x1449   :  { %8446 = vmatprep.subr.bf16.mxu1 %v9074_v63 }
0x144a   :  { %v5356_v6 = vpop.permute.xlu1 %5355  ;;  %v5402_v25 = vpop.permute.xlu0 %5401 }
0x144b   :  { %8437 = vmatmul.mubr.msk.bf16.vlgmr.msra.gmra.mrb[228].mxu1 %vm4696_vm12, %v10279_v58  ;;  %v5358_v29 = vsel %vm4700_vm11, %v5356_v6, 0  ;;  %v5404_v39 = vsel %vm4700_vm11, %v5402_v25, 0 }
0x144c   :  { %8447 = vmatpush3.bf16.msra.mxu1 %v5312_v27  ;;  %8448 = vmatprep.mubr.msk.bf16.mxu1 %vm9075_vm5, %v9074_v63 }
0x144d   :  { %8453 = vmatpush3.bf16.msra.mxu0 %v5358_v29  ;;  %8458 = vmatprep.subr.bf16.mxu1 %v9074_v63 }
0x144e   :  { %v5450_v33 = vpop.permute.xlu1 %5449  ;;  %v5452_v35 = vpop.permute.xlu0 %5451  ;;  %8464 = vmatprep.subr.bf16.mxu0 %v9074_v63 }
0x144f   :  { %v5453_v37 = vsel %vm4947_vm13, %v5450_v33, %v5452_v35 }
0x1450   :  { %8455 = vmatmul.mubr.msk.bf16.vlgmr.msra.gmra.mrb[124].mxu0 %vm4696_vm12, %v10292_v40  ;;  %v5455_v58 = vsel %vm4700_vm11, %v5453_v37, 0 }
0x1451   :  { %8465 = vmatpush3.bf16.msra.mxu0 %v5455_v58  ;;  %8466 = vmatprep.mubr.msk.bf16.mxu0 %vm9075_vm5, %v9074_v63  ;;  %v5644_v58 = vld [vmem:[%s10780_s5 + $0x238] sm:$0x1] }
0x1452   :  { %8476 = vmatprep.subr.bf16.mxu0 %v9074_v63  ;;  %v5545_v40 = vpop.permute.xlu0 %5544  ;;  %v5499_v44 = vpop.permute.xlu1 %5498 }
0x1453   :  { %8449 = vmatmul.mubr.msk.bf16.vlgmr.msra.gmra.mrb[232].mxu1 %vm4696_vm12, %v10299_v46  ;;  %v5547_v41 = vsel %vm4700_vm11, %v5545_v40, 0  ;;  %v5501_v46 = vsel %vm4700_vm11, %v5499_v44, 0  ;;  %v9015_v40 = vld [vmem:[%s10784_s3 + $0x8] sm:$0xff]  }
0x1454   :  { %8459 = vmatpush3.bf16.msra.mxu1 %v5404_v39  ;;  %8460 = vmatprep.mubr.msk.bf16.mxu1 %vm9075_vm5, %v9074_v63  ;;  %v9014_v39 = vld [vmem:[%s10784_s3] sm:$0xff]  }
0x1455   :  { %8470 = vmatprep.subr.bf16.mxu1 %v9074_v63 }
0x1458   :  { %8467 = vmatmul.mubr.msk.bf16.vlgmr.msra.gmra.mrb[128].mxu0 %vm4696_vm12, %v10316_v14  ;;  %v5591_v14 = vpop.permute.xlu1 %5590 }
0x1459   :  { %8477 = vmatpush3.bf16.msra.mxu0 %v5547_v41  ;;  %8478 = vmatprep.mubr.msk.bf16.mxu0 %vm9075_vm5, %v9074_v63 }
0x145a   :  { %8488 = vmatprep.subr.bf16.mxu0 %v9074_v63 }
0x145b   :  { %8461 = vmatmul.mubr.msk.bf16.vlgmr.msra.gmra.mrb[236].mxu1 %vm4696_vm12, %v10321_v17  ;;  %v5593_v17 = vsel %vm4700_vm11, %v5591_v14, 0 }
0x145c   :  { %8471 = vmatpush3.bf16.msra.mxu1 %v5501_v46  ;;  %8472 = vmatprep.mubr.msk.bf16.mxu1 %vm9075_vm5, %v9074_v63 }
0x145d   :  { %8482 = vmatprep.subr.bf16.mxu1 %v9074_v63 }
0x1460   :  { %8479 = vmatmul.mubr.msk.bf16.vlgmr.msra.gmra.mrb[132].mxu0 %vm4696_vm12, %v10337_v22 }
0x1461   :  { %8490 = vmatprep.mubr.msk.bf16.mxu0 %vm9075_vm5, %v9074_v63 }
0x1463   :  { %8473 = vmatmul.mubr.msk.bf16.vlgmr.msra.gmra.mrb[240].mxu1 %vm4696_vm12, %v10342_v16  ;;  %v9012_v16 = vld [vmem:[%s10780_s5 + $0x128] ss:$8 sps:$4 sm:$0xff]  }
0x1464   :  { %8483 = vmatpush3.bf16.msra.mxu1 %v5593_v17  ;;  %8484 = vmatprep.mubr.msk.bf16.mxu1 %vm9075_vm5, %v9074_v63 }
0x1465   :  { %8494 = vmatprep.subr.bf16.mxu1 %v9074_v63 }
0x146b   :  { %8485 = vmatmul.mubr.msk.bf16.vlgmr.msra.gmra.mrb[244].mxu1 %vm4696_vm12, %v10356_v56 }
0x146c   :  { %8498 = vmatprep.mubr.msk.bf16.mxu1 %vm9075_vm5, %v9074_v63  ;;  %8495 = vmatpush3.bf16.msra.mxu1 %v9012_v16 }
0x146d   :  { %8496 = vmatprep.subr.bf16.mxu1 %v9074_v63 }
0x14ac   :  { %v5303_v22 = vpop.f32.mrb[120].mxu0 }
0x14ad   :  { %v8444_v43 = vpop.f32.mrb[121].mxu0 }
0x14ae   :  { %v5306_v45 = vpop.f32.mrb[122].mxu0  ;;  %v9017_v43 = vld [vmem:[%s10784_s3 + $0x18] sm:$0xff]  }
0x14af   :  { %v8445_v47 = vpop.f32.mrb[123].mxu0  ;;  %v5648_v45 = vld [vmem:[%s10780_s5 + $0x140] sm:$0x1] }
0x14b0   :  { %v5697_v47 = vunpack.c.l.bf16 %v5648_v45 }
0x151e   :  { %v5260_v49 = vpop.f32.mrb[228].mxu1 }
0x151f   :  { %v8438_v51 = vpop.f32.mrb[229].mxu1  ;;  %v5304_v53 = vadd.f32 %v5303_v22, %v5260_v49  ;;  %v9016_v22 = vld [vmem:[%s10784_s3 + $0x10] sm:$0xff]  }
0x1520   :  { %v5263_v55 = vpop.f32.mrb[230].mxu1 }
0x1521   :  { %v8439_v57 = vpop.f32.mrb[231].mxu1 }
0x1523   :  { %v5394_v56 = vpop.f32.mrb[124].mxu0 }
0x1524   :  { %v8456_v59 = vpop.f32.mrb[125].mxu0 }
0x1525   :  { %v5397_v61 = vpop.f32.mrb[126].mxu0  ;;  %v9019_v59 = vld [vmem:[%s10784_s3 + $0x28] sm:$0xff]  }
0x1526   :  { %v5348_v2 = vpop.f32.mrb[232].mxu1  ;;  %v8457_v4 = vpop.f32.mrb[127].mxu0  ;;  %v9020_v61 = vld [vmem:[%s10784_s3 + $0x30] sm:$0xff]  }
0x1527   :  { %v5354_v8 = vadd.f32 %v5348_v2, %v5304_v53  ;;  %v8450_v10 = vpop.f32.mrb[233].mxu1  ;;  %v5760_v2 = vld [vmem:[%s10785_s4] sm:$0x1] }
0x1528   :  { %v5351_v18 = vpop.f32.mrb[234].mxu1  ;;  %v5761_v4 = vunpack.c.l.bf16 %v5760_v2 }
0x1529   :  { %v5400_v26 = vadd.f32 %v5394_v56, %v5354_v8  ;;  %v8451_v60 = vpop.f32.mrb[235].mxu1  ;;  %v9018_v56 = vld [vmem:[%s10784_s3 + $0x20] sm:$0xff]  }
0x152b   :  { %v5491_v34 = vpop.f32.mrb[128].mxu0 }
0x152c   :  { %v8468_v0 = vpop.f32.mrb[129].mxu0 }
0x152d   :  { %v5494_v28 = vpop.f32.mrb[130].mxu0 }
0x152e   :  { %v5440_v54 = vpop.f32.mrb[236].mxu1  ;;  %v8469_v12 = vpop.f32.mrb[131].mxu0  ;;  %v9021_v28 = vld [vmem:[%s10784_s3 + $0x38] sm:$0xff]  }
0x152f   :  { %v5446_v13 = vadd.f32 %v5440_v54, %v5400_v26  ;;  %v8462_v48 = vpop.f32.mrb[237].mxu1  ;;  %v9022_v54 = vld [vmem:[%s10784_s3 + $0x40] sm:$0xff]   ;;  %v9023_v12 = vld [vmem:[%s10784_s3 + $0x48] sm:$0xff]  }
0x1530   :  { %v5443_v52 = vpop.f32.mrb[238].mxu1 }
0x1531   :  { %v5497_v15 = vadd.f32 %v5491_v34, %v5446_v13  ;;  %v8463_v19 = vpop.f32.mrb[239].mxu1  ;;  %v7376_v13 = vld [vmem:[%s10785_s4 + $0x1] sm:$0x1] }
0x1532   :  { %v5835_v48 = vunpack.c.l.bf16 %v7376_v13  ;;  %v7431_v13 = vld [vmem:[%s10785_s4 + $0x6] sm:$0x1] }
0x1533   :  { %v5583_v20 = vpop.f32.mrb[132].mxu0 }
0x1534   :  { %v8480_v21 = vpop.f32.mrb[133].mxu0 }
0x1535   :  { %v5586_v9 = vpop.f32.mrb[134].mxu0 }
0x1536   :  { %v5537_v62 = vpop.f32.mrb[240].mxu1  ;;  %v8481_v5 = vpop.f32.mrb[135].mxu0 }
0x1537   :  { %v5543_v32 = vadd.f32 %v5537_v62, %v5497_v15  ;;  %v8474_v1 = vpop.f32.mrb[241].mxu1  ;;  %v9024_v5 = vld [vmem:[%s10784_s3 + $0x50] sm:$0xff]  }
0x1538   :  { %v5540_v7 = vpop.f32.mrb[242].mxu1  ;;  %v9026_v1 = vld [vmem:[%s10784_s3 + $0x60] sm:$0xff]  }
0x1539   :  { %v5589_v11 = vadd.f32 %v5583_v20, %v5543_v32  ;;  %v8475_v50 = vpop.f32.mrb[243].mxu1  ;;  %v9025_v32 = vld [vmem:[%s10784_s3 + $0x58] sm:$0xff]   ;;  %v7387_v7 = vld [vmem:[%s10785_s4 + $0x2] sm:$0x1] }
0x153e   :  { %v5629_v38 = vpop.f32.mrb[244].mxu1 }
0x153f   :  { %v5635_v31 = vadd.f32 %v5629_v38, %v5589_v11  ;;  %v8486_v23 = vpop.f32.mrb[245].mxu1  ;;  %v5909_v11 = vunpack.c.l.bf16 %v7387_v7 }
0x1540   :  { %v5632_v6 = vpop.f32.mrb[246].mxu1 }
0x1541   :  { %v5641_v25 = vadd.f32 %v5640_v42, %v5635_v31  ;;  %v8487_v27 = vpop.f32.mrb[247].mxu1 }
0x1542   :  { %v9028_v27 = vld [vmem:[%s10784_s3 + $0x70] sm:$0xff]  }
0x1543   :  { %v5642_v29 = vadd.f32 %v5641_v25, %v10378_v24  ;;  %v5711_v24 = vsel %vm4642_vm9, %v9013_v30, 0  ;;  %v9027_v25 = vld [vmem:[%s10784_s3 + $0x68] sm:$0xff]  }
0x1544   :  { %8497 = vmatpush3.bf16.msra.mxu1 %v5711_v24 }
0x1545   :  { %v5643_v33 = vmax.f32 %v5642_v29, 0.0  ;;  %8512 = vmatprep.subr.bf16.mxu1 %v9074_v63  ;;  %v9029_v29 = vld [vmem:[%s10784_s3 + $0x78] sm:$0xff]  }
0x1547   :  { %v5649_v35 = vpack.c.bf16 %v5643_v33, %v5643_v33  ;;  %v7398_v33 = vld [vmem:[%s10785_s4 + $0x3] sm:$0x1] }
0x1549   :  { %v5654_v37 = vsel %vm4700_vm11, %v5649_v35, 0  ;;  %v5982_v35 = vunpack.c.l.bf16 %v7398_v33  ;;  %v7453_v33 = vld [vmem:[%s10785_s4 + $0x8] sm:$0x1] }
0x154a   :  { %8489 = vmatpush3.bf16.msra.mxu0 %v5654_v37 }
0x154b   :  { %8502 = vmatprep.subr.bf16.mxu0 %v9074_v63 }
0x154d   :  { %8491 = vmatmul.mubr.msk.bf16.vlgmr.msra.gmra.mrb[136].mxu0 %vm4696_vm12, %v5644_v58 }
0x154e   :  { %8508 = vmatprep.mubr.msk.bf16.mxu0 %vm9075_vm5, %v9074_v63  ;;  %8503 = vmatpush3.bf16.msra.mxu0 %v9014_v39 }
0x154f   :  { %8504 = vmatprep.subr.bf16.mxu0 %v9074_v63 }
0x1552   :  { %8505 = vmatpush3.bf16.msra.mxu0 %v9015_v40 }
0x1553   :  { %8506 = vmatprep.subr.bf16.mxu0 %v9074_v63 }
0x1556   :  { %8507 = vmatpush3.bf16.msra.mxu0 %v9016_v22  ;;  %v7409_v22 = vld [vmem:[%s10785_s4 + $0x4] sm:$0x1] }
0x1557   :  { %8522 = vmatprep.subr.bf16.mxu0 %v9074_v63 }
0x1620   :  { %v5690_v44 = vpop.f32.mrb[136].mxu0 }
0x1621   :  { %v5696_v41 = vpack.c.bf16 %v5690_v44, %v5690_v44  ;;  %v8492_v46 = vpop.f32.mrb[137].mxu0 }
0x1622   :  { %v5693_v14 = vpop.f32.mrb[138].mxu0  ;;  %v9030_v46 = vld [vmem:[%s10784_s3 + $0x80] sm:$0xff]  }
0x1623   :  { %8499 = vmatmul.mubr.msk.bf16.vlgmr.msra.gmra.mrb[248].mxu1 %vm4638_vm10, %v5696_v41  ;;  %v8493_v17 = vpop.f32.mrb[139].mxu0  ;;  %v9031_v14 = vld [vmem:[%s10784_s3 + $0x88] sm:$0xff]  }
0x1624   :  { %8518 = vmatprep.mubr.msk.bf16.mxu1 %vm9075_vm5, %v9074_v63  ;;  %8513 = vmatpush3.bf16.msra.mxu1 %v9017_v43  ;;  %v9032_v17 = vld [vmem:[%s10784_s3 + $0x90] sm:$0xff]   ;;  %v6056_v43 = vunpack.c.l.bf16 %v7409_v22 }
0x1625   :  { %8514 = vmatprep.subr.bf16.mxu1 %v9074_v63 }
0x1628   :  { %8515 = vmatpush3.bf16.msra.mxu1 %v9018_v56  ;;  %v9034_v56 = vld [vmem:[%s10784_s3 + $0xa0] sm:$0xff]  }
0x1629   :  { %8516 = vmatprep.subr.bf16.mxu1 %v9074_v63 }
0x162c   :  { %8517 = vmatpush3.bf16.msra.mxu1 %v9019_v59  ;;  %v9035_v59 = vld [vmem:[%s10784_s3 + $0xa8] sm:$0xff]  }
0x162d   :  { %8532 = vmatprep.subr.bf16.mxu1 %v9074_v63 }
0x16f6   :  { %v5747_v16 = vpop.f32.mrb[248].mxu1 }
0x16f7   :  { %v5748_v49 = vadd.f32 %v5747_v16, %v5697_v47  ;;  %v8500_v51 = vpop.f32.mrb[249].mxu1 }
0x16f8   :  { %v5750_v53 = vpop.f32.mrb[250].mxu1 }
0x16f9   :  { %v5759_v55 = vpack.c.bf16 %v5748_v49, %v5748_v49  ;;  %v8501_v57 = vpop.f32.mrb[251].mxu1 }
0x16fa   :  { %v9033_v57 = vld [vmem:[%s10784_s3 + $0x98] sm:$0xff]  }
0x16fb   :  { %8509 = vmatmul.mubr.msk.bf16.vlgmr.msra.gmra.mrb[140].mxu0 %vm5780_vm14, %v5759_v55 }
0x16fc   :  { %8528 = vmatprep.mubr.msk.bf16.mxu0 %vm9075_vm5, %v9074_v63  ;;  %8523 = vmatpush3.bf16.msra.mxu0 %v9020_v61  ;;  %v7420_v61 = vld [vmem:[%s10785_s4 + $0x5] sm:$0x1] }
0x16fd   :  { %8524 = vmatprep.subr.bf16.mxu0 %v9074_v63  ;;  %v6129_v2 = vunpack.c.l.bf16 %v7420_v61  ;;  %v7475_v61 = vld [vmem:[%s10785_s4 + $0xa] sm:$0x1] }
0x1700   :  { %8525 = vmatpush3.bf16.msra.mxu0 %v9021_v28  ;;  %v9036_v28 = vld [vmem:[%s10784_s3 + $0xb0] sm:$0xff]  }
0x1701   :  { %8526 = vmatprep.subr.bf16.mxu0 %v9074_v63 }
0x1704   :  { %8527 = vmatpush3.bf16.msra.mxu0 %v9022_v54  ;;  %v9037_v54 = vld [vmem:[%s10784_s3 + $0xb8] sm:$0xff]  }
0x1705   :  { %8542 = vmatprep.subr.bf16.mxu0 %v9074_v63 }
0x17ce   :  { %v5818_v8 = vpop.f32.mrb[140].mxu0 }
0x17cf   :  { %v5819_v10 = vadd.f32 %v5818_v8, %v5761_v4  ;;  %v8510_v18 = vpop.f32.mrb[141].mxu0 }
0x17d0   :  { %v5821_v26 = vpop.f32.mrb[142].mxu0 }
0x17d1   :  { %v5824_v60 = vmax.f32 %v5819_v10, 0.0  ;;  %v8511_v34 = vpop.f32.mrb[143].mxu0 }
0x17d3   :  { %v5832_v0 = vpack.c.bf16 %v5824_v60, %v5824_v60 }
0x17d5   :  { %8519 = vmatmul.mubr.msk.bf16.vlgmr.msra.gmra.mrb[252].mxu1 %vm5780_vm14, %v5832_v0 }
0x17d6   :  { %8538 = vmatprep.mubr.msk.bf16.mxu1 %vm9075_vm5, %v9074_v63  ;;  %8533 = vmatpush3.bf16.msra.mxu1 %v9023_v12  ;;  %v9038_v12 = vld [vmem:[%s10784_s3 + $0xc0] sm:$0xff]  }
0x17d7   :  { %8534 = vmatprep.subr.bf16.mxu1 %v9074_v63 }
0x17da   :  { %8535 = vmatpush3.bf16.msra.mxu1 %v9024_v5  ;;  %v9040_v5 = vld [vmem:[%s10784_s3 + $0xd0] sm:$0xff]  }
0x17db   :  { %8536 = vmatprep.subr.bf16.mxu1 %v9074_v63 }
0x17de   :  { %8537 = vmatpush3.bf16.msra.mxu1 %v9025_v32  ;;  %v9041_v32 = vld [vmem:[%s10784_s3 + $0xd8] sm:$0xff]  }
0x17df   :  { %8552 = vmatprep.subr.bf16.mxu1 %v9074_v63 }
0x18a8   :  { %v5891_v52 = vpop.f32.mrb[252].mxu1 }
0x18a9   :  { %v5892_v15 = vadd.f32 %v5891_v52, %v5835_v48  ;;  %v8520_v19 = vpop.f32.mrb[253].mxu1  ;;  %v6203_v48 = vunpack.c.l.bf16 %v7431_v13 }
0x18aa   :  { %v5894_v20 = vpop.f32.mrb[254].mxu1 }
0x18ab   :  { %v5897_v21 = vadd.f32 %v5892_v15, %v5824_v60  ;;  %v8521_v9 = vpop.f32.mrb[255].mxu1 }
0x18ad   :  { %v5898_v62 = vmax.f32 %v5897_v21, 0.0 }
0x18af   :  { %v5906_v3 = vpack.c.bf16 %v5898_v62, %v5898_v62 }
0x18b1   :  { %8529 = vmatmul.mubr.msk.bf16.vlgmr.msra.gmra.mrb[144].mxu0 %vm5780_vm14, %v5906_v3  ;;  %v9039_v3 = vld [vmem:[%s10784_s3 + $0xc8] sm:$0xff]  }
0x18b2   :  { %8548 = vmatprep.mubr.msk.bf16.mxu0 %vm9075_vm5, %v9074_v63  ;;  %8543 = vmatpush3.bf16.msra.mxu0 %v9026_v1  ;;  %v7442_v1 = vld [vmem:[%s10785_s4 + $0x7] sm:$0x1] }
0x18b3   :  { %8544 = vmatprep.subr.bf16.mxu0 %v9074_v63  ;;  %v6276_v7 = vunpack.c.l.bf16 %v7442_v1  ;;  %v7497_v1 = vld [vmem:[%s10785_s4 + $0xc] sm:$0x1] }
0x18b6   :  { %8545 = vmatpush3.bf16.msra.mxu0 %v9027_v25  ;;  %v9042_v25 = vld [vmem:[%s10784_s3 + $0xe0] sm:$0xff]  }
0x18b7   :  { %8546 = vmatprep.subr.bf16.mxu0 %v9074_v63 }
0x18ba   :  { %8547 = vmatpush3.bf16.msra.mxu0 %v9028_v27  ;;  %v9043_v27 = vld [vmem:[%s10784_s3 + $0xe8] sm:$0xff]  }
0x18bb   :  { %8562 = vmatprep.subr.bf16.mxu0 %v9074_v63 }
0x1984   :  { %v5965_v50 = vpop.f32.mrb[144].mxu0 }
0x1985   :  { %v5966_v36 = vadd.f32 %v5965_v50, %v5909_v11  ;;  %v8530_v42 = vpop.f32.mrb[145].mxu0 }
0x1986   :  { %v5968_v38 = vpop.f32.mrb[146].mxu0 }
0x1987   :  { %v5971_v31 = vmax.f32 %v5966_v36, 0.0  ;;  %v8531_v23 = vpop.f32.mrb[147].mxu0 }
0x1989   :  { %v5979_v6 = vpack.c.bf16 %v5971_v31, %v5971_v31 }
0x198b   :  { %8539 = vmatmul.mubr.msk.bf16.vlgmr.msra.gmra.mrb[0].mxu1 %vm5780_vm14, %v5979_v6 }
0x198c   :  { %8558 = vmatprep.mubr.msk.bf16.mxu1 %vm9075_vm5, %v9074_v63  ;;  %8553 = vmatpush3.bf16.msra.mxu1 %v9029_v29  ;;  %v9044_v29 = vld [vmem:[%s10784_s3 + $0xf0] sm:$0xff]  }
0x198d   :  { %8554 = vmatprep.subr.bf16.mxu1 %v9074_v63 }
0x1990   :  { %8555 = vmatpush3.bf16.msra.mxu1 %v9030_v46  ;;  %v9046_v46 = vld [vmem:[%s10784_s3 + $0x100] sm:$0xff]  }
0x1991   :  { %8556 = vmatprep.subr.bf16.mxu1 %v9074_v63 }
0x1994   :  { %8557 = vmatpush3.bf16.msra.mxu1 %v9031_v14  ;;  %v9047_v14 = vld [vmem:[%s10784_s3 + $0x108] sm:$0xff]  }
0x1995   :  { %8572 = vmatprep.subr.bf16.mxu1 %v9074_v63 }
0x1a5e   :  { %v6038_v37 = vpop.f32.mrb[0].mxu1 }
0x1a5f   :  { %v6039_v58 = vadd.f32 %v6038_v37, %v5982_v35  ;;  %v8540_v30 = vpop.f32.mrb[1].mxu1  ;;  %v6350_v35 = vunpack.c.l.bf16 %v7453_v33 }
0x1a60   :  { %v6041_v24 = vpop.f32.mrb[2].mxu1 }
0x1a61   :  { %v6044_v39 = vadd.f32 %v6039_v58, %v5971_v31  ;;  %v8541_v40 = vpop.f32.mrb[3].mxu1 }
0x1a63   :  { %v6045_v44 = vmax.f32 %v6044_v39, 0.0 }
0x1a65   :  { %v6053_v41 = vpack.c.bf16 %v6045_v44, %v6045_v44 }
0x1a67   :  { %8549 = vmatmul.mubr.msk.bf16.vlgmr.msra.gmra.mrb[148].mxu0 %vm5780_vm14, %v6053_v41  ;;  %v9045_v41 = vld [vmem:[%s10784_s3 + $0xf8] sm:$0xff]  }
0x1a68   :  { %8568 = vmatprep.mubr.msk.bf16.mxu0 %vm9075_vm5, %v9074_v63  ;;  %8563 = vmatpush3.bf16.msra.mxu0 %v9032_v17  ;;  %v7464_v17 = vld [vmem:[%s10785_s4 + $0x9] sm:$0x1] }
0x1a69   :  { %8564 = vmatprep.subr.bf16.mxu0 %v9074_v63  ;;  %v6423_v22 = vunpack.c.l.bf16 %v7464_v17  ;;  %v7519_v17 = vld [vmem:[%s10785_s4 + $0xe] sm:$0x1] }
0x1a6c   :  { %8565 = vmatpush3.bf16.msra.mxu0 %v9033_v57  ;;  %v9048_v57 = vld [vmem:[%s10784_s3 + $0x110] sm:$0xff]  }
0x1a6d   :  { %8566 = vmatprep.subr.bf16.mxu0 %v9074_v63 }
0x1a70   :  { %8567 = vmatpush3.bf16.msra.mxu0 %v9034_v56  ;;  %v9049_v56 = vld [vmem:[%s10784_s3 + $0x118] sm:$0xff]  }
0x1a71   :  { %8582 = vmatprep.subr.bf16.mxu0 %v9074_v63 }
0x1b3a   :  { %v6112_v45 = vpop.f32.mrb[148].mxu0 }
0x1b3b   :  { %v6113_v47 = vadd.f32 %v6112_v45, %v6056_v43  ;;  %v8550_v16 = vpop.f32.mrb[149].mxu0 }
0x1b3c   :  { %v6115_v49 = vpop.f32.mrb[150].mxu0 }
0x1b3d   :  { %v6118_v51 = vmax.f32 %v6113_v47, 0.0  ;;  %v8551_v53 = vpop.f32.mrb[151].mxu0 }
0x1b3f   :  { %v6126_v55 = vpack.c.bf16 %v6118_v51, %v6118_v51 }
0x1b41   :  { %8559 = vmatmul.mubr.msk.bf16.vlgmr.msra.gmra.mrb[4].mxu1 %vm5780_vm14, %v6126_v55 }
0x1b42   :  { %8578 = vmatprep.mubr.msk.bf16.mxu1 %vm9075_vm5, %v9074_v63  ;;  %8573 = vmatpush3.bf16.msra.mxu1 %v9035_v59  ;;  %v9050_v59 = vld [vmem:[%s10784_s3 + $0x120] sm:$0xff]  }
0x1b43   :  { %8574 = vmatprep.subr.bf16.mxu1 %v9074_v63 }
0x1b46   :  { %8575 = vmatpush3.bf16.msra.mxu1 %v9036_v28  ;;  %v9052_v28 = vld [vmem:[%s10784_s3 + $0x130] sm:$0xff]  }
0x1b47   :  { %8576 = vmatprep.subr.bf16.mxu1 %v9074_v63 }
0x1b4a   :  { %8577 = vmatpush3.bf16.msra.mxu1 %v9037_v54  ;;  %v9053_v54 = vld [vmem:[%s10784_s3 + $0x138] sm:$0xff]  }
0x1b4b   :  { %8592 = vmatprep.subr.bf16.mxu1 %v9074_v63 }
0x1c14   :  { %v6185_v4 = vpop.f32.mrb[4].mxu1 }
0x1c15   :  { %v6186_v8 = vadd.f32 %v6185_v4, %v6129_v2  ;;  %v8560_v10 = vpop.f32.mrb[5].mxu1  ;;  %v6497_v2 = vunpack.c.l.bf16 %v7475_v61 }
0x1c16   :  { %v6188_v18 = vpop.f32.mrb[6].mxu1 }
0x1c17   :  { %v6191_v26 = vadd.f32 %v6186_v8, %v6118_v51  ;;  %v8561_v60 = vpop.f32.mrb[7].mxu1 }
0x1c19   :  { %v6192_v34 = vmax.f32 %v6191_v26, 0.0 }
0x1c1b   :  { %v6200_v0 = vpack.c.bf16 %v6192_v34, %v6192_v34 }
0x1c1d   :  { %8569 = vmatmul.mubr.msk.bf16.vlgmr.msra.gmra.mrb[152].mxu0 %vm5780_vm14, %v6200_v0  ;;  %v9051_v0 = vld [vmem:[%s10784_s3 + $0x128] sm:$0xff]  }
0x1c1e   :  { %8588 = vmatprep.mubr.msk.bf16.mxu0 %vm9075_vm5, %v9074_v63  ;;  %8583 = vmatpush3.bf16.msra.mxu0 %v9038_v12  ;;  %v7486_v12 = vld [vmem:[%s10785_s4 + $0xb] sm:$0x1] }
0x1c1f   :  { %8584 = vmatprep.subr.bf16.mxu0 %v9074_v63  ;;  %v6570_v13 = vunpack.c.l.bf16 %v7486_v12 }
0x1c22   :  { %8585 = vmatpush3.bf16.msra.mxu0 %v9039_v3  ;;  %v9054_v3 = vld [vmem:[%s10784_s3 + $0x140] sm:$0xff]  }
0x1c23   :  { %8586 = vmatprep.subr.bf16.mxu0 %v9074_v63 }
0x1c26   :  { %8587 = vmatpush3.bf16.msra.mxu0 %v9040_v5  ;;  %v9055_v5 = vld [vmem:[%s10784_s3 + $0x148] sm:$0xff]  }
0x1c27   :  { %8602 = vmatprep.subr.bf16.mxu0 %v9074_v63 }
0x1cf0   :  { %v6259_v52 = vpop.f32.mrb[152].mxu0 }
0x1cf1   :  { %v6260_v15 = vadd.f32 %v6259_v52, %v6203_v48  ;;  %v8570_v19 = vpop.f32.mrb[153].mxu0 }
0x1cf2   :  { %v6262_v20 = vpop.f32.mrb[154].mxu0 }
0x1cf3   :  { %v6265_v21 = vmax.f32 %v6260_v15, 0.0  ;;  %v8571_v9 = vpop.f32.mrb[155].mxu0 }
0x1cf5   :  { %v6273_v62 = vpack.c.bf16 %v6265_v21, %v6265_v21 }
0x1cf7   :  { %8579 = vmatmul.mubr.msk.bf16.vlgmr.msra.gmra.mrb[8].mxu1 %vm5780_vm14, %v6273_v62 }
0x1cf8   :  { %8598 = vmatprep.mubr.msk.bf16.mxu1 %vm9075_vm5, %v9074_v63  ;;  %8593 = vmatpush3.bf16.msra.mxu1 %v9041_v32  ;;  %v9056_v32 = vld [vmem:[%s10784_s3 + $0x150] sm:$0xff]  }
0x1cf9   :  { %8594 = vmatprep.subr.bf16.mxu1 %v9074_v63 }
0x1cfc   :  { %8595 = vmatpush3.bf16.msra.mxu1 %v9042_v25  ;;  %v9058_v25 = vld [vmem:[%s10784_s3 + $0x160] sm:$0xff]  }
0x1cfd   :  { %8596 = vmatprep.subr.bf16.mxu1 %v9074_v63 }
0x1d00   :  { %8597 = vmatpush3.bf16.msra.mxu1 %v9043_v27  ;;  %v9059_v27 = vld [vmem:[%s10784_s3 + $0x168] sm:$0xff]  }
0x1d01   :  { %8612 = vmatprep.subr.bf16.mxu1 %v9074_v63 }
0x1dca   :  { %v6332_v11 = vpop.f32.mrb[8].mxu1 }
0x1dcb   :  { %v6333_v50 = vadd.f32 %v6332_v11, %v6276_v7  ;;  %v8580_v36 = vpop.f32.mrb[9].mxu1  ;;  %v6644_v7 = vunpack.c.l.bf16 %v7497_v1 }
0x1dcc   :  { %v6335_v42 = vpop.f32.mrb[10].mxu1 }
0x1dcd   :  { %v6338_v38 = vadd.f32 %v6333_v50, %v6265_v21  ;;  %v8581_v31 = vpop.f32.mrb[11].mxu1 }
0x1dcf   :  { %v6339_v23 = vmax.f32 %v6338_v38, 0.0 }
0x1dd1   :  { %v6347_v6 = vpack.c.bf16 %v6339_v23, %v6339_v23 }
0x1dd3   :  { %8589 = vmatmul.mubr.msk.bf16.vlgmr.msra.gmra.mrb[156].mxu0 %vm5780_vm14, %v6347_v6  ;;  %v9057_v6 = vld [vmem:[%s10784_s3 + $0x158] sm:$0xff]  }
0x1dd4   :  { %8608 = vmatprep.mubr.msk.bf16.mxu0 %vm9075_vm5, %v9074_v63  ;;  %8603 = vmatpush3.bf16.msra.mxu0 %v9044_v29  ;;  %v7508_v29 = vld [vmem:[%s10785_s4 + $0xd] sm:$0x1] }
0x1dd5   :  { %8604 = vmatprep.subr.bf16.mxu0 %v9074_v63  ;;  %v6717_v33 = vunpack.c.l.bf16 %v7508_v29 }
0x1dd8   :  { %8605 = vmatpush3.bf16.msra.mxu0 %v9045_v41  ;;  %v9060_v41 = vld [vmem:[%s10784_s3 + $0x170] sm:$0xff]  }
0x1dd9   :  { %8606 = vmatprep.subr.bf16.mxu0 %v9074_v63 }
0x1ddc   :  { %8607 = vmatpush3.bf16.msra.mxu0 %v9046_v46  ;;  %v9061_v46 = vld [vmem:[%s10784_s3 + $0x178] sm:$0xff]  }
0x1ddd   :  { %8622 = vmatprep.subr.bf16.mxu0 %v9074_v63 }
0x1ea6   :  { %v6406_v37 = vpop.f32.mrb[156].mxu0 }
0x1ea7   :  { %v6407_v58 = vadd.f32 %v6406_v37, %v6350_v35  ;;  %v8590_v30 = vpop.f32.mrb[157].mxu0 }
0x1ea8   :  { %v6409_v24 = vpop.f32.mrb[158].mxu0 }
0x1ea9   :  { %v6412_v39 = vmax.f32 %v6407_v58, 0.0  ;;  %v8591_v40 = vpop.f32.mrb[159].mxu0 }
0x1eab   :  { %v6420_v44 = vpack.c.bf16 %v6412_v39, %v6412_v39 }
0x1ead   :  { %8599 = vmatmul.mubr.msk.bf16.vlgmr.msra.gmra.mrb[12].mxu1 %vm5780_vm14, %v6420_v44 }
0x1eae   :  { %8618 = vmatprep.mubr.msk.bf16.mxu1 %vm9075_vm5, %v9074_v63  ;;  %8613 = vmatpush3.bf16.msra.mxu1 %v9047_v14  ;;  %v9062_v14 = vld [vmem:[%s10780_s5 + $0x240] ss:$8 sps:$4 sm:$0xff]  }
0x1eaf   :  { %8614 = vmatprep.subr.bf16.mxu1 %v9074_v63 }
0x1eb2   :  { %8615 = vmatpush3.bf16.msra.mxu1 %v9048_v57  ;;  %v9064_v57 = vld [vmem:[%s10780_s5 + $0x260] ss:$8 sps:$4 sm:$0xff]  }
0x1eb3   :  { %8616 = vmatprep.subr.bf16.mxu1 %v9074_v63 }
0x1eb6   :  { %8617 = vmatpush3.bf16.msra.mxu1 %v9049_v56  ;;  %v7530_v56 = vld [vmem:[%s10785_s4 + $0xf] sm:$0x1] }
0x1eb7   :  { %8632 = vmatprep.subr.bf16.mxu1 %v9074_v63 }
0x1f80   :  { %v6479_v43 = vpop.f32.mrb[12].mxu1 }
0x1f81   :  { %v6480_v45 = vadd.f32 %v6479_v43, %v6423_v22  ;;  %v8600_v47 = vpop.f32.mrb[13].mxu1  ;;  %v6791_v22 = vunpack.c.l.bf16 %v7519_v17 }
0x1f82   :  { %v6482_v16 = vpop.f32.mrb[14].mxu1 }
0x1f83   :  { %v6485_v49 = vadd.f32 %v6480_v45, %v6412_v39  ;;  %v8601_v51 = vpop.f32.mrb[15].mxu1 }
0x1f85   :  { %v6486_v53 = vmax.f32 %v6485_v49, 0.0 }
0x1f87   :  { %v6494_v55 = vpack.c.bf16 %v6486_v53, %v6486_v53 }
0x1f89   :  { %8609 = vmatmul.mubr.msk.bf16.vlgmr.msra.gmra.mrb[160].mxu0 %vm5780_vm14, %v6494_v55  ;;  %v9063_v55 = vld [vmem:[%s10780_s5 + $0x250] ss:$8 sps:$4 sm:$0xff]  }
0x1f8a   :  { %8628 = vmatprep.mubr.msk.bf16.mxu0 %vm9075_vm5, %v9074_v63  ;;  %8623 = vmatpush3.bf16.msra.mxu0 %v9050_v59  ;;  %v6864_v59 = vunpack.c.l.bf16 %v7530_v56 }
0x1f8b   :  { %8624 = vmatprep.subr.bf16.mxu0 %v9074_v63 }
0x1f8e   :  { %8625 = vmatpush3.bf16.msra.mxu0 %v9051_v0 }
0x1f8f   :  { %8626 = vmatprep.subr.bf16.mxu0 %v9074_v63 }
0x1f92   :  { %8627 = vmatpush3.bf16.msra.mxu0 %v9052_v28 }
0x1f93   :  { %8642 = vmatprep.subr.bf16.mxu0 %v9074_v63 }
0x205c   :  { %v6553_v4 = vpop.f32.mrb[160].mxu0 }
0x205d   :  { %v6554_v8 = vadd.f32 %v6553_v4, %v6497_v2  ;;  %v8610_v10 = vpop.f32.mrb[161].mxu0 }
0x205e   :  { %v6556_v18 = vpop.f32.mrb[162].mxu0 }
0x205f   :  { %v6559_v26 = vmax.f32 %v6554_v8, 0.0  ;;  %v8611_v60 = vpop.f32.mrb[163].mxu0 }
0x2061   :  { %v6567_v34 = vpack.c.bf16 %v6559_v26, %v6559_v26 }
0x2063   :  { %8619 = vmatmul.mubr.msk.bf16.vlgmr.msra.gmra.mrb[16].mxu1 %vm5780_vm14, %v6567_v34 }
0x2064   :  { %8638 = vmatprep.mubr.msk.bf16.mxu1 %vm9075_vm5, %v9074_v63  ;;  %8633 = vmatpush3.bf16.msra.mxu1 %v9053_v54 }
0x2065   :  { %8634 = vmatprep.subr.bf16.mxu1 %v9074_v63 }
0x2068   :  { %8635 = vmatpush3.bf16.msra.mxu1 %v9054_v3 }
0x2069   :  { %8636 = vmatprep.subr.bf16.mxu1 %v9074_v63 }
0x206c   :  { %8637 = vmatpush3.bf16.msra.mxu1 %v9055_v5 }
0x206d   :  { %8652 = vmatprep.subr.bf16.mxu1 %v9074_v63 }
0x2136   :  { %v6626_v48 = vpop.f32.mrb[16].mxu1 }
0x2137   :  { %v6627_v52 = vadd.f32 %v6626_v48, %v6570_v13  ;;  %v8620_v15 = vpop.f32.mrb[17].mxu1 }
0x2138   :  { %v6629_v19 = vpop.f32.mrb[18].mxu1 }
0x2139   :  { %v6632_v20 = vadd.f32 %v6627_v52, %v6559_v26  ;;  %v8621_v21 = vpop.f32.mrb[19].mxu1 }
0x213b   :  { %v6633_v9 = vmax.f32 %v6632_v20, 0.0 }
0x213d   :  { %v6641_v62 = vpack.c.bf16 %v6633_v9, %v6633_v9 }
0x213f   :  { %8629 = vmatmul.mubr.msk.bf16.vlgmr.msra.gmra.mrb[164].mxu0 %vm5780_vm14, %v6641_v62 }
0x2140   :  { %8648 = vmatprep.mubr.msk.bf16.mxu0 %vm9075_vm5, %v9074_v63  ;;  %8643 = vmatpush3.bf16.msra.mxu0 %v9056_v32 }
0x2141   :  { %8644 = vmatprep.subr.bf16.mxu0 %v9074_v63 }
0x2144   :  { %8645 = vmatpush3.bf16.msra.mxu0 %v9057_v6 }
0x2145   :  { %8646 = vmatprep.subr.bf16.mxu0 %v9074_v63 }
0x2148   :  { %8647 = vmatpush3.bf16.msra.mxu0 %v9058_v25 }
0x2149   :  { %8662 = vmatprep.subr.bf16.mxu0 %v9074_v63 }
0x2212   :  { %v6700_v11 = vpop.f32.mrb[164].mxu0 }
0x2213   :  { %v6701_v50 = vadd.f32 %v6700_v11, %v6644_v7  ;;  %v8630_v36 = vpop.f32.mrb[165].mxu0 }
0x2214   :  { %v6703_v42 = vpop.f32.mrb[166].mxu0 }
0x2215   :  { %v6706_v38 = vmax.f32 %v6701_v50, 0.0  ;;  %v8631_v31 = vpop.f32.mrb[167].mxu0 }
0x2217   :  { %v6714_v23 = vpack.c.bf16 %v6706_v38, %v6706_v38 }
0x2219   :  { %8639 = vmatmul.mubr.msk.bf16.vlgmr.msra.gmra.mrb[20].mxu1 %vm5780_vm14, %v6714_v23 }
0x221a   :  { %8658 = vmatprep.mubr.msk.bf16.mxu1 %vm9075_vm5, %v9074_v63  ;;  %8653 = vmatpush3.bf16.msra.mxu1 %v9059_v27 }
0x221b   :  { %8654 = vmatprep.subr.bf16.mxu1 %v9074_v63 }
0x221e   :  { %8655 = vmatpush3.bf16.msra.mxu1 %v9060_v41 }
0x221f   :  { %8656 = vmatprep.subr.bf16.mxu1 %v9074_v63 }
0x2222   :  { %8657 = vmatpush3.bf16.msra.mxu1 %v9061_v46 }
0x22ec   :  { %v6773_v35 = vpop.f32.mrb[20].mxu1 }
0x22ed   :  { %v6774_v37 = vadd.f32 %v6773_v35, %v6717_v33  ;;  %v8640_v58 = vpop.f32.mrb[21].mxu1 }
0x22ee   :  { %v6776_v30 = vpop.f32.mrb[22].mxu1 }
0x22ef   :  { %v6779_v24 = vadd.f32 %v6774_v37, %v6706_v38  ;;  %v8641_v39 = vpop.f32.mrb[23].mxu1 }
0x22f1   :  { %v6780_v40 = vmax.f32 %v6779_v24, 0.0 }
0x22f3   :  { %v6788_v44 = vpack.c.bf16 %v6780_v40, %v6780_v40 }
0x22f5   :  { %8649 = vmatmul.mubr.msk.bf16.vlgmr.msra.gmra.mrb[168].mxu0 %vm5780_vm14, %v6788_v44 }
0x22f6   :  { %8668 = vmatprep.mubr.msk.bf16.mxu0 %vm9075_vm5, %v9074_v63  ;;  %8663 = vmatpush3.bf16.msra.mxu0 %v9062_v14 }
0x22f7   :  { %8664 = vmatprep.subr.bf16.mxu0 %v9074_v63 }
0x22fa   :  { %8665 = vmatpush3.bf16.msra.mxu0 %v9063_v55 }
0x22fb   :  { %8666 = vmatprep.subr.bf16.mxu0 %v9074_v63  ;;  %v6935_v63 = vld [vmem:[%s10780_s5 + $0x270] sm:$0x1] }
0x22fc   :  { %v6936_v34 = vunpack.c.l.bf16 %v6935_v63 }
0x22fe   :  { %8667 = vmatpush3.bf16.msra.mxu0 %v9064_v57 }
0x23c8   :  { %v6847_v43 = vpop.f32.mrb[168].mxu0 }
0x23c9   :  { %v6848_v45 = vadd.f32 %v6847_v43, %v6791_v22  ;;  %v8650_v47 = vpop.f32.mrb[169].mxu0 }
0x23ca   :  { %v6850_v16 = vpop.f32.mrb[170].mxu0 }
0x23cb   :  { %v6853_v49 = vmax.f32 %v6848_v45, 0.0  ;;  %v8651_v51 = vpop.f32.mrb[171].mxu0 }
0x23cd   :  { %v6861_v53 = vpack.c.bf16 %v6853_v49, %v6853_v49 }
0x23cf   :  { %8659 = vmatmul.mubr.msk.bf16.vlgmr.msra.gmra.mrb[24].mxu1 %vm5780_vm14, %v6861_v53 }
0x24a2   :  { %v6920_v61 = vpop.f32.mrb[24].mxu1 }
0x24a3   :  { %v6921_v2 = vadd.f32 %v6920_v61, %v6864_v59  ;;  %v8660_v4 = vpop.f32.mrb[25].mxu1 }
0x24a4   :  { %v6923_v8 = vpop.f32.mrb[26].mxu1 }
0x24a5   :  { %v6926_v10 = vadd.f32 %v6921_v2, %v6853_v49  ;;  %v8661_v18 = vpop.f32.mrb[27].mxu1 }
0x24a7   :  { %v6927_v26 = vmax.f32 %v6926_v10, 0.0 }
0x24a9   :  { %v6934_v60 = vpack.c.bf16 %v6927_v26, %v6927_v26 }
0x24ab   :  { %8669 = vmatmul.mubr.msk.bf16.vlgmr.msra.gmra.mrb[172].mxu0 %vm5780_vm14, %v6934_v60 }
0x257e   :  { %v6992_v0 = vpop.f32.mrb[172].mxu0 }
0x257f   :  { %v6993_v28 = vadd.f32 %v6992_v0, %v6936_v34  ;;  %v8670_v54 = vpop.f32.mrb[173].mxu0 }
0x2580   :  { %v6995_v12 = vpop.f32.mrb[174].mxu0 }
0x2581   :  { %6999 = vst.msk [vmem:[%s10786_s6] sm:$0x1] %vm6998_vm15, %v6993_v28  ;;  %v8671_v13 = vpop.f32.mrb[175].mxu0 }

</bundles_post_ra>
